<compile_context>
chip_gen: v7x
topology: tpu7x:2x2x1
jax: 0.10.0
libtpu: 0.0.40
codegen_flags: <defaults>
</compile_context>

<pallas_src>
import functools

import jax
import jax.numpy as jnp
from jax.experimental import pallas as pl
from jax.experimental.pallas import tpu as pltpu


def _round_up(x, m):
    return ((x + m - 1) // m) * m


# ----------------------------------------------------------------------------
# Pallas kernel 1: tiled matmul + bias for the 1x1 convolutions.
#   a: (M, K) bf16, w: (K, N) bf16, bias: (1, N) f32 -> (M, N) out_dtype
# bf16 operands feed the MXU at its peak rate; accumulation stays f32.
# ----------------------------------------------------------------------------
def _matmul_bias_kernel(a_ref, w_ref, b_ref, o_ref):
    acc = jnp.dot(a_ref[...], w_ref[...], preferred_element_type=jnp.float32)
    o_ref[...] = (acc + b_ref[...]).astype(o_ref.dtype)


def matmul_bias(a, w, bias, out_dtype=jnp.float32, block_rows=1024):
    M, K = a.shape
    K2, N = w.shape
    assert K == K2
    a = a.astype(jnp.bfloat16)
    w = w.astype(jnp.bfloat16)
    bias = bias.reshape(1, N).astype(jnp.float32)

    # Pad only to a sublane multiple; a cdiv grid handles the partial trailing
    # block (no full-tensor pad / post-call slice when M % 8 == 0).
    Mp = _round_up(M, 8)
    if Mp != M:
        a = jnp.pad(a, ((0, Mp - M), (0, 0)))
    tm = min(block_rows, Mp)

    out = pl.pallas_call(
        _matmul_bias_kernel,
        out_shape=jax.ShapeDtypeStruct((Mp, N), out_dtype),
        grid_spec=pltpu.PrefetchScalarGridSpec(
            num_scalar_prefetch=0,
            grid=(pl.cdiv(Mp, tm),),
            in_specs=[
                pl.BlockSpec((tm, K), lambda i: (i, 0)),
                pl.BlockSpec((K, N), lambda i: (0, 0)),   # resident weight
                pl.BlockSpec((1, N), lambda i: (0, 0)),   # resident bias
            ],
            out_specs=pl.BlockSpec((tm, N), lambda i: (i, 0)),
        ),
        compiler_params=pltpu.CompilerParams(dimension_semantics=("parallel",)),
    )(a, w, bias)
    return out[:M] if Mp != M else out


# ----------------------------------------------------------------------------
# Pallas kernel 2: windowed attention, batched over windows.
#   q, k, v : (Nw, nh, S, hd) bf16,  bias : (nh, S, S) f32 -> (Nw, nh, S, hd) bf16
# One grid step processes BW windows * all heads as 3-D batched matmuls; the
# per-head bias stays resident (constant block index -> fetched once).
# ----------------------------------------------------------------------------
def _window_attn_kernel(q_ref, k_ref, v_ref, bias_ref, o_ref, *, scale):
    BW, nh, S, hd = q_ref.shape
    B = BW * nh
    q = q_ref[...].reshape(B, S, hd)
    k = k_ref[...].reshape(B, S, hd)
    v = v_ref[...].reshape(B, S, hd)
    # bf16 x bf16 -> f32 on the MXU; contraction on trailing dims (no k.T).
    s = jnp.einsum("bqd,bkd->bqk", q, k, preferred_element_type=jnp.float32)
    s = (s.reshape(BW, nh, S, S) * scale + bias_ref[...][None]).reshape(B, S, S)
    # softmax in f32 (exact normalization; v5e has no bf16 VPU/EUP anyway).
    s = s - jnp.max(s, axis=-1, keepdims=True)
    e = jnp.exp(s)
    p = e / jnp.sum(e, axis=-1, keepdims=True)
    out = jnp.einsum("bqk,bkd->bqd", p.astype(v.dtype), v,
                     preferred_element_type=jnp.float32)
    # TODO(synk): a lane-dense (BW, nh*S*hd) store would need a tiled-dim
    # reshape in-kernel that Mosaic does not reliably lower; bf16 output halves
    # the store bytes instead.
    o_ref[...] = out.reshape(BW, nh, S, hd).astype(o_ref.dtype)


def window_attention(q, k, v, bias, scale, vmem_budget_bytes=8 << 20):
    Nw, nh, S, hd = q.shape
    q = q.astype(jnp.bfloat16)
    k = k.astype(jnp.bfloat16)
    v = v.astype(jnp.bfloat16)
    bias = bias.astype(jnp.float32)

    # VMEM accounting per window in one grid step:
    #   q/k/v blocks (bf16, double-buffered), out block (bf16, double-buffered)
    #   plus the f32 scores + exp live between the two einsums.
    per_window = (2 * 3 * nh * S * hd * 2      # q, k, v double-buffered
                  + 2 * nh * S * hd * 2        # out double-buffered
                  + 2 * nh * S * S * 4)        # f32 scores + exp
    bias_bytes = 2 * nh * S * S * 4            # resident bias (double-buffered)
    budget = max(vmem_budget_bytes - bias_bytes, per_window)
    BW = max(1, budget // per_window)
    BW = min(BW, Nw)
    if Nw >= 16:
        # keep >= 2 grid steps so the "parallel" axis can shard across
        # TensorCores (v7x has 2 TCs and only 64 MiB VMEM).
        BW = min(BW, Nw // 2)
    if BW < Nw:
        BW = max(8, (BW // 8) * 8)
    Nw_pad = _round_up(Nw, BW)
    if Nw_pad != Nw:
        pad = ((0, Nw_pad - Nw), (0, 0), (0, 0), (0, 0))
        q = jnp.pad(q, pad)
        k = jnp.pad(k, pad)
        v = jnp.pad(v, pad)

    kernel = functools.partial(_window_attn_kernel, scale=scale)
    qkv_spec = pl.BlockSpec((BW, nh, S, hd), lambda i: (i, 0, 0, 0))
    out = pl.pallas_call(
        kernel,
        out_shape=jax.ShapeDtypeStruct((Nw_pad, nh, S, hd), jnp.bfloat16),
        grid_spec=pltpu.PrefetchScalarGridSpec(
            num_scalar_prefetch=0,
            grid=(Nw_pad // BW,),
            in_specs=[
                qkv_spec,
                qkv_spec,
                qkv_spec,
                pl.BlockSpec((nh, S, S), lambda i: (0, 0, 0)),  # resident bias
            ],
            out_specs=pl.BlockSpec((BW, nh, S, hd), lambda i: (i, 0, 0, 0)),
        ),
        compiler_params=pltpu.CompilerParams(dimension_semantics=("parallel",)),
    )(q, k, v, bias)
    return out[:Nw] if Nw_pad != Nw else out


# ----------------------------------------------------------------------------
# Plain-JAX glue: bilinear grid_sample, NHWC, zeros padding, align_corners=True.
# Values are gathered in bf16 (half the gather bytes); the bilinear weights and
# the weighted sum run in f32.
# TODO(synk): data-dependent bilinear gather would need a manual-DMA Pallas
# kernel (per-window bounding-box copies); kept as XLA gather glue for now.
# ----------------------------------------------------------------------------
def grid_sample_bilinear_zeros_nhwc(inp, grid):
    # inp: (N, H, W, C); grid: (N, Ho, Wo, 2), grid[...,0]=x (W dir), [...,1]=y (H dir)
    N, H, W, C = inp.shape
    Ho, Wo = grid.shape[1], grid.shape[2]
    gx = grid[..., 0]
    gy = grid[..., 1]
    x = (gx + 1.0) * 0.5 * (W - 1)
    y = (gy + 1.0) * 0.5 * (H - 1)
    x0 = jnp.floor(x)
    y0 = jnp.floor(y)
    x1 = x0 + 1.0
    y1 = y0 + 1.0
    wx1 = x - x0
    wx0 = 1.0 - wx1
    wy1 = y - y0
    wy0 = 1.0 - wy1
    flat = inp.reshape(N, H * W, C)

    def corner(xi, yi, wgt):
        valid = (xi >= 0) & (xi <= W - 1) & (yi >= 0) & (yi <= H - 1)
        xi_c = jnp.clip(xi, 0, W - 1).astype(jnp.int32)
        yi_c = jnp.clip(yi, 0, H - 1).astype(jnp.int32)
        idx = (yi_c * W + xi_c).reshape(N, Ho * Wo)
        vals = jnp.take_along_axis(flat, idx[:, :, None], axis=1)  # (N, Ho*Wo, C)
        wv = (wgt * valid.astype(jnp.float32)).reshape(N, Ho * Wo, 1)
        return vals.astype(jnp.float32) * wv

    out = (corner(x0, y0, wx0 * wy0) + corner(x1, y0, wx1 * wy0)
           + corner(x0, y1, wx0 * wy1) + corner(x1, y1, wx1 * wy1))
    return out.reshape(N, Ho, Wo, C).astype(inp.dtype)


def cpb_mlp(x, w1, b1, w2, b2):
    # Tiny (K_in = 2, M = S*S): plain XLA per the review; kept f32.
    hid = jnp.maximum(jnp.dot(x, w1, preferred_element_type=jnp.float32) + b1, 0.0)
    return jnp.dot(hid, w2, preferred_element_type=jnp.float32) + b2


def log_relative_position_index(ws):
    coords_h = jnp.arange(ws)
    coords_w = jnp.arange(ws)
    ch, cw = jnp.meshgrid(coords_h, coords_w, indexing="ij")
    coords = jnp.stack([ch, cw])                 # (2, ws, ws)
    cf = coords.reshape(2, -1)                   # (2, ws*ws)
    rel = cf[:, :, None] - cf[:, None, :]        # (2, ws*ws, ws*ws)
    rel = jnp.transpose(rel, (1, 2, 0)).astype(jnp.float32)
    return jnp.sign(rel) * jnp.log1p(jnp.abs(rel))


# ----------------------------------------------------------------------------
# Full forward pass
# ----------------------------------------------------------------------------
def vsa_window_attention_forward(params, x, *, dim, num_heads, out_dim, window_size):
    b, C, h, w = x.shape
    assert C == dim
    ws = window_size
    nh = num_heads
    hd = out_dim // nh
    head_dim = dim // nh
    scale = head_dim ** (-0.5)

    padding_td = (ws - h % ws) % ws
    padding_lr = (ws - w % ws) % ws
    padding_top = padding_td // 2
    padding_down = padding_td - padding_top
    padding_left = padding_lr // 2
    padding_right = padding_lr - padding_left
    eh = h + padding_td
    ew = w + padding_lr
    wnh = eh // ws
    wnw = ew // ws
    Nw = b * wnh * wnw
    S = ws * ws

    # NCHW -> NHWC once at the module boundary; everything internal is NHWC.
    x_nhwc = jnp.transpose(x, (0, 2, 3, 1))                      # (b, h, w, C)
    x_pad = jnp.pad(x_nhwc, ((0, 0), (padding_top, padding_down),
                             (padding_left, padding_right), (0, 0)))

    # ---- sampling offsets / scales: AvgPool -> LeakyReLU -> 1x1 conv --------
    # Tiny (M = b*wnh*wnw, N = 4*nh): plain XLA per the review.
    pooled = x_pad.reshape(b, wnh, ws, wnw, ws, C).mean(axis=(2, 4))  # (b,wnh,wnw,C)
    pooled = jnp.where(pooled >= 0, pooled, 0.01 * pooled)            # LeakyReLU(0.01)
    pooled_flat = pooled.reshape(b * wnh * wnw, C)
    off_scl_w = jnp.concatenate([params["off_w"], params["scl_w"]], axis=1)
    off_scl_b = jnp.concatenate([params["off_b"], params["scl_b"]], axis=0)
    off_scl = jnp.dot(pooled_flat, off_scl_w,
                      preferred_element_type=jnp.float32) + off_scl_b   # (b*wnh*wnw, 4*nh)
    off_flat = off_scl[:, :2 * nh]
    scl_flat = off_scl[:, 2 * nh:]

    def to_b2hw(t):
        t = t.reshape(b, wnh, wnw, nh, 2)
        return jnp.transpose(t, (0, 3, 4, 1, 2)).reshape(b * nh, 2, wnh, wnw)

    sampling_offsets = to_b2hw(off_flat)
    sampling_scales = to_b2hw(scl_flat)
    # normalization by the UNPADDED window counts, as in the torch reference.
    sampling_offsets = jnp.stack(
        [sampling_offsets[:, 0] / (h // ws), sampling_offsets[:, 1] / (w // ws)], axis=1)

    # ---- base coordinates / window coordinates -----------------------------
    ir_h = jnp.linspace(-1.0, 1.0, eh)
    ir_w = jnp.linspace(-1.0, 1.0, ew)
    gw, gh = jnp.meshgrid(ir_w, ir_h, indexing="ij")             # (ew, eh) each
    image_reference = jnp.transpose(jnp.stack([gw, gh], 0), (0, 2, 1))[None]  # (1,2,eh,ew)
    base_coords = image_reference.reshape(1, 2, wnh, ws, wnw, ws)

    bch = jnp.arange(ws, dtype=jnp.float32) * 2.0 * ws / ws / (eh - 1)
    bch = bch - bch.mean()
    bcw = jnp.arange(ws, dtype=jnp.float32) * 2.0 * ws / ws / (ew - 1)
    bcw = bcw - bcw.mean()
    exp_bch = jnp.tile(bch[None, :], (wnh, 1)).reshape(-1)       # (wnh*ws,)
    exp_bcw = jnp.tile(bcw[None, :], (wnw, 1)).reshape(-1)       # (wnw*ws,)
    wgw, wgh = jnp.meshgrid(exp_bcw, exp_bch, indexing="ij")
    window_coords = jnp.transpose(jnp.stack([wgw, wgh], 0), (0, 2, 1))
    window_coords = window_coords.reshape(1, 2, wnh, ws, wnw, ws)

    coords = (base_coords
              + window_coords * sampling_scales[:, :, :, None, :, None]
              + sampling_offsets[:, :, :, None, :, None])        # (b*nh,2,wnh,ws,wnw,ws)
    sample_coords = jnp.transpose(coords, (0, 2, 3, 4, 5, 1)).reshape(b * nh, eh, ew, 2)

    # ---- qkv 1x1 conv (Pallas matmul, bf16 operands) on the unpadded input --
    x_flat = x_nhwc.reshape(b * h * w, C)
    qkv_flat = matmul_bias(x_flat, params["qkv_w"], params["qkv_b"],
                           out_dtype=jnp.bfloat16)                # (b*h*w, 3*out_dim)
    qkv = qkv_flat.reshape(b, h, w, 3, nh, hd)
    q = qkv[:, :, :, 0]                                           # (b, h, w, nh, hd)
    kv = qkv[:, :, :, 1:]                                         # (b, h, w, 2, nh, hd)
    pad_sp = ((0, 0), (padding_top, padding_down), (padding_left, padding_right))
    q = jnp.pad(q, pad_sp + ((0, 0), (0, 0)))                     # (b, eh, ew, nh, hd)
    kv = jnp.pad(kv, pad_sp + ((0, 0), (0, 0), (0, 0)))           # (b, eh, ew, 2, nh, hd)

    # q window partition (bf16): (b, eh, ew, nh, hd) -> (Nw, nh, S, hd)
    q_w = q.reshape(b, wnh, ws, wnw, ws, nh, hd)
    q_w = jnp.transpose(q_w, (0, 1, 3, 5, 2, 4, 6)).reshape(Nw, nh, S, hd)

    # ---- fused bilinear gather for k and v (one pass, shared indices, bf16) --
    kv_img = jnp.transpose(kv, (0, 4, 1, 2, 3, 5)).reshape(b * nh, eh, ew, 2 * hd)
    kv_sel = grid_sample_bilinear_zeros_nhwc(kv_img, sample_coords)  # (b*nh, eh, ew, 2*hd)

    kv_w = kv_sel.reshape(b, nh, wnh, ws, wnw, ws, 2 * hd)
    kv_w = jnp.transpose(kv_w, (0, 2, 4, 1, 3, 5, 6)).reshape(Nw, nh, S, 2 * hd)
    k_w = kv_w[..., :hd]
    v_w = kv_w[..., hd:]

    # ---- continuous relative position bias (plain-XLA cpb MLP) --------------
    # torch slices the (ws*ws, ws*ws, 2) table with [:h*w, :h*w]; identical to
    # the full table whenever h*w >= ws*ws (the only case the module supports).
    rel = log_relative_position_index(ws)                         # (S, S, 2)
    bias = cpb_mlp(rel.reshape(S * S, 2),
                   params["cpb_fc1_w"], params["cpb_fc1_b"],
                   params["cpb_fc2_w"], params["cpb_fc2_b"])      # (S*S, nh)
    bias = jnp.transpose(bias.reshape(S, S, nh), (2, 0, 1))       # (nh, S, S)

    # ---- windowed attention (Pallas kernel, window-batched, bf16 MXU) -------
    out_w = window_attention(q_w, k_w, v_w, bias, scale)          # (Nw, nh, S, hd) bf16

    # ---- merge windows (NHWC, bf16), crop padding, projection ---------------
    out = out_w.reshape(b, wnh, wnw, nh, ws, ws, hd)
    out = jnp.transpose(out, (0, 1, 4, 2, 5, 3, 6)).reshape(b, eh, ew, out_dim)
    out = out[:, padding_top:h + padding_top, padding_left:w + padding_left, :]

    out_flat = out.reshape(b * h * w, out_dim)
    out_flat = matmul_bias(out_flat, params["proj_w"], params["proj_b"],
                           out_dtype=jnp.float32)
    out = jnp.transpose(out_flat.reshape(b, h, w, out_dim), (0, 3, 1, 2))
    return out


# ----------------------------------------------------------------------------
# Deterministic parameter init (shapes follow the PyTorch module __init__).
# Weights are stored as (in_features, out_features) for the matmul kernels.
# ----------------------------------------------------------------------------
def init_params(key, dim, num_heads, out_dim):
    ks = jax.random.split(key, 12)

    def uinit(k, shape, fan_in):
        bound = 1.0 / (fan_in ** 0.5)
        return jax.random.uniform(k, shape, jnp.float32, -bound, bound)

    return {
        "off_w": uinit(ks[0], (dim, 2 * num_heads), dim),
        "off_b": uinit(ks[1], (2 * num_heads,), dim),
        "scl_w": uinit(ks[2], (dim, 2 * num_heads), dim),
        "scl_b": uinit(ks[3], (2 * num_heads,), dim),
        "qkv_w": uinit(ks[4], (dim, 3 * out_dim), dim),
        "qkv_b": uinit(ks[5], (3 * out_dim,), dim),
        "proj_w": uinit(ks[6], (out_dim, out_dim), out_dim),
        "proj_b": uinit(ks[7], (out_dim,), out_dim),
        "cpb_fc1_w": uinit(ks[8], (2, 256), 2),
        "cpb_fc1_b": uinit(ks[9], (256,), 2),
        "cpb_fc2_w": uinit(ks[10], (256, num_heads), 256),
        "cpb_fc2_b": uinit(ks[11], (num_heads,), 256),
    }


if __name__ == "__main__":
    key = jax.random.PRNGKey(0)
    k_param, k_x = jax.random.split(key)

    b, dim, h, w = 2, 16, 16, 16
    num_heads = 2
    out_dim = 16
    window_size = 4

    params = init_params(k_param, dim, num_heads, out_dim)
    x = jax.random.normal(k_x, (b, dim, h, w), jnp.float32)

    fwd = jax.jit(functools.partial(
        vsa_window_attention_forward,
        dim=dim, num_heads=num_heads, out_dim=out_dim, window_size=window_size))

    out = fwd(params, x)
    out = jax.block_until_ready(out)
    assert out.shape == (b, out_dim, h, w), out.shape
    assert jnp.isfinite(out).all()
    print("KERNEL_OK")
</pallas_src>

<mosaic_0001>
module attributes {stable_mosaic.version = 11 : i64} {
  func.func @_matmul_bias_kernel(%arg0: i32, %arg1: memref<512x16xbf16, #tpu.memory_space<vmem>>, %arg2: memref<16x48xbf16, #tpu.memory_space<vmem>>, %arg3: memref<1x48xf32, #tpu.memory_space<vmem>>, %arg4: memref<512x48xbf16, #tpu.memory_space<vmem>>) attributes {dimension_semantics = [#tpu.dimension_semantics<parallel>], iteration_bounds = array<i64: 1>, scalar_prefetch = 0 : i64, scratch_operands = 0 : i64, tpu.core_type = #tpu.core_type<tc>, window_params = [{transform_indices = @transform_0, window_bounds = array<i64: 512, 16>}, {pipeline_mode = #tpu.pipeline_mode<synchronous>, transform_indices = @transform_1, window_bounds = array<i64: 16, 48>}, {pipeline_mode = #tpu.pipeline_mode<synchronous>, transform_indices = @transform_2, window_bounds = array<i64: 1, 48>}, {transform_indices = @transform_3, window_bounds = array<i64: 512, 48>}]} {
    %c0 = arith.constant 0 : index
    %c0_0 = arith.constant 0 : index
    %0 = vector.load %arg1[%c0, %c0_0] : memref<512x16xbf16, #tpu.memory_space<vmem>>, vector<512x16xbf16>
    %c0_1 = arith.constant 0 : index
    %c0_2 = arith.constant 0 : index
    %1 = vector.load %arg2[%c0_1, %c0_2] : memref<16x48xbf16, #tpu.memory_space<vmem>>, vector<16x48xbf16>
    %cst = arith.constant dense<0.000000e+00> : vector<512x48xf32>
    %2 = tpu.matmul %0, %1, %cst {dimension_numbers = #tpu.dot_dimension_numbers<[1], [0], [0], [1], [0, 0, 1, 1], [], []>} : vector<512x16xbf16>, vector<16x48xbf16>, vector<512x48xf32> -> vector<512x48xf32>
    %c0_3 = arith.constant 0 : index
    %c0_4 = arith.constant 0 : index
    %3 = vector.load %arg3[%c0_3, %c0_4] : memref<1x48xf32, #tpu.memory_space<vmem>>, vector<1x48xf32>
    %4 = vector.broadcast %3 : vector<1x48xf32> to vector<512x48xf32>
    %5 = arith.addf %2, %4 : vector<512x48xf32>
    %6 = arith.truncf %5 : vector<512x48xf32> to vector<512x48xbf16>
    %c0_5 = arith.constant 0 : index
    %c0_6 = arith.constant 0 : index
    %7 = vector.load %arg4[%c0_5, %c0_6] : memref<512x48xbf16, #tpu.memory_space<vmem>>, vector<512x48xbf16>
    tpu.vector_store %arg4[%c0_5, %c0_6], %6 {strides = array<i32>} : memref<512x48xbf16, #tpu.memory_space<vmem>>, vector<512x48xbf16>,
    return
  }
  func.func @transform_0(%arg0: i32) -> (i32, i32) {
    %c0_i32 = arith.constant 0 : i32
    %c0_i32_0 = arith.constant 0 : i32
    return %arg0, %c0_i32 : i32, i32
  }
  func.func @transform_1(%arg0: i32) -> (i32, i32) {
    %c0_i32 = arith.constant 0 : i32
    %c0_i32_0 = arith.constant 0 : i32
    %c0_i32_1 = arith.constant 0 : i32
    return %c0_i32, %c0_i32_0 : i32, i32
  }
  func.func @transform_2(%arg0: i32) -> (i32, i32) {
    %c0_i32 = arith.constant 0 : i32
    %c0_i32_0 = arith.constant 0 : i32
    %c0_i32_1 = arith.constant 0 : i32
    return %c0_i32, %c0_i32_0 : i32, i32
  }
  func.func @transform_3(%arg0: i32) -> (i32, i32) {
    %c0_i32 = arith.constant 0 : i32
    %c0_i32_0 = arith.constant 0 : i32
    return %arg0, %c0_i32 : i32, i32
  }
}

module attributes {stable_mosaic.version = 11 : i64} {
  func.func @_window_attn_kernel(%arg0: i32, %arg1: memref<16x2x16x8xbf16, #tpu.memory_space<vmem>>, %arg2: memref<16x2x16x8xbf16, #tpu.memory_space<vmem>>, %arg3: memref<16x2x16x8xbf16, #tpu.memory_space<vmem>>, %arg4: memref<2x16x16xf32, #tpu.memory_space<vmem>>, %arg5: memref<16x2x16x8xbf16, #tpu.memory_space<vmem>>) attributes {dimension_semantics = [#tpu.dimension_semantics<parallel>], iteration_bounds = array<i64: 2>, scalar_prefetch = 0 : i64, scratch_operands = 0 : i64, tpu.core_type = #tpu.core_type<tc>, window_params = [{transform_indices = @transform_0, window_bounds = array<i64: 16, 2, 16, 8>}, {transform_indices = @transform_1, window_bounds = array<i64: 16, 2, 16, 8>}, {transform_indices = @transform_2, window_bounds = array<i64: 16, 2, 16, 8>}, {pipeline_mode = #tpu.pipeline_mode<synchronous>, transform_indices = @transform_3, window_bounds = array<i64: 2, 16, 16>}, {transform_indices = @transform_4, window_bounds = array<i64: 16, 2, 16, 8>}]} {
    %c0 = arith.constant 0 : index
    %c0_0 = arith.constant 0 : index
    %c0_1 = arith.constant 0 : index
    %c0_2 = arith.constant 0 : index
    %0 = vector.load %arg1[%c0, %c0_0, %c0_1, %c0_2] : memref<16x2x16x8xbf16, #tpu.memory_space<vmem>>, vector<16x2x16x8xbf16>
    %1 = vector.shape_cast %0 : vector<16x2x16x8xbf16> to vector<32x16x8xbf16>
    %c0_3 = arith.constant 0 : index
    %c0_4 = arith.constant 0 : index
    %c0_5 = arith.constant 0 : index
    %c0_6 = arith.constant 0 : index
    %2 = vector.load %arg2[%c0_3, %c0_4, %c0_5, %c0_6] : memref<16x2x16x8xbf16, #tpu.memory_space<vmem>>, vector<16x2x16x8xbf16>
    %3 = vector.shape_cast %2 : vector<16x2x16x8xbf16> to vector<32x16x8xbf16>
    %c0_7 = arith.constant 0 : index
    %c0_8 = arith.constant 0 : index
    %c0_9 = arith.constant 0 : index
    %c0_10 = arith.constant 0 : index
    %4 = vector.load %arg3[%c0_7, %c0_8, %c0_9, %c0_10] : memref<16x2x16x8xbf16, #tpu.memory_space<vmem>>, vector<16x2x16x8xbf16>
    %5 = vector.shape_cast %4 : vector<16x2x16x8xbf16> to vector<32x16x8xbf16>
    "tpu.trace_start"() <{level = 10 : i32, message = "bqd,bkd->bqk"}> : () -> ()
    %cst = arith.constant dense<0.000000e+00> : vector<32x16x16xf32>
    %6 = tpu.matmul %1, %3, %cst {dimension_numbers = #tpu.dot_dimension_numbers<[2], [2], [1], [1], [0, 0, 0, 1, 1, 1], [0], [0]>} : vector<32x16x8xbf16>, vector<32x16x8xbf16>, vector<32x16x16xf32> -> vector<32x16x16xf32>
    "tpu.trace_stop"() : () -> ()
    %7 = vector.shape_cast %6 : vector<32x16x16xf32> to vector<16x2x16x16xf32>
    %cst_11 = arith.constant 0.353553385 : f32
    %8 = vector.broadcast %cst_11 : f32 to vector<16x2x16x16xf32>
    %9 = arith.mulf %7, %8 : vector<16x2x16x16xf32>
    %c0_12 = arith.constant 0 : index
    %c0_13 = arith.constant 0 : index
    %c0_14 = arith.constant 0 : index
    %10 = vector.load %arg4[%c0_12, %c0_13, %c0_14] : memref<2x16x16xf32, #tpu.memory_space<vmem>>, vector<2x16x16xf32>
    %11 = vector.shape_cast %10 : vector<2x16x16xf32> to vector<1x2x16x16xf32>
    %12 = vector.broadcast %11 : vector<1x2x16x16xf32> to vector<16x2x16x16xf32>
    %13 = arith.addf %9, %12 : vector<16x2x16x16xf32>
    %14 = vector.shape_cast %13 : vector<16x2x16x16xf32> to vector<32x16x16xf32>
    %cst_15 = arith.constant dense<0xFF800000> : vector<32x16xf32>
    %15 = vector.multi_reduction <maximumf>, %14, %cst_15 [2] : vector<32x16x16xf32> to vector<32x16xf32>
    %16 = vector.shape_cast %15 : vector<32x16xf32> to vector<32x16x1xf32>
    %17 = vector.broadcast %16 : vector<32x16x1xf32> to vector<32x16x16xf32>
    %18 = arith.subf %14, %17 : vector<32x16x16xf32>
    %19 = math.exp %18 : vector<32x16x16xf32>
    %cst_16 = arith.constant dense<0.000000e+00> : vector<32x16xf32>
    %20 = vector.multi_reduction <add>, %19, %cst_16 [2] : vector<32x16x16xf32> to vector<32x16xf32>
    %21 = vector.shape_cast %20 : vector<32x16xf32> to vector<32x16x1xf32>
    %22 = vector.broadcast %21 : vector<32x16x1xf32> to vector<32x16x16xf32>
    %23 = arith.divf %19, %22 : vector<32x16x16xf32>
    %24 = arith.truncf %23 : vector<32x16x16xf32> to vector<32x16x16xbf16>
    "tpu.trace_start"() <{level = 10 : i32, message = "bqk,bkd->bqd"}> : () -> ()
    %cst_17 = arith.constant dense<0.000000e+00> : vector<32x16x8xf32>
    %25 = tpu.matmul %24, %5, %cst_17 {dimension_numbers = #tpu.dot_dimension_numbers<[2], [1], [1], [2], [0, 0, 0, 1, 1, 2], [0], [0]>} : vector<32x16x16xbf16>, vector<32x16x8xbf16>, vector<32x16x8xf32> -> vector<32x16x8xf32>
    "tpu.trace_stop"() : () -> ()
    %26 = vector.shape_cast %25 : vector<32x16x8xf32> to vector<16x2x16x8xf32>
    %27 = arith.truncf %26 : vector<16x2x16x8xf32> to vector<16x2x16x8xbf16>
    %c0_18 = arith.constant 0 : index
    %c0_19 = arith.constant 0 : index
    %c0_20 = arith.constant 0 : index
    %c0_21 = arith.constant 0 : index
    %28 = vector.load %arg5[%c0_18, %c0_19, %c0_20, %c0_21] : memref<16x2x16x8xbf16, #tpu.memory_space<vmem>>, vector<16x2x16x8xbf16>
    tpu.vector_store %arg5[%c0_18, %c0_19, %c0_20, %c0_21], %27 {strides = array<i32>} : memref<16x2x16x8xbf16, #tpu.memory_space<vmem>>, vector<16x2x16x8xbf16>,
    return
  }
  func.func @transform_0(%arg0: i32) -> (i32, i32, i32, i32) {
    %c0_i32 = arith.constant 0 : i32
    %c0_i32_0 = arith.constant 0 : i32
    %c0_i32_1 = arith.constant 0 : i32
    %c0_i32_2 = arith.constant 0 : i32
    return %arg0, %c0_i32, %c0_i32_0, %c0_i32_1 : i32, i32, i32, i32
  }
  func.func @transform_1(%arg0: i32) -> (i32, i32, i32, i32) {
    %c0_i32 = arith.constant 0 : i32
    %c0_i32_0 = arith.constant 0 : i32
    %c0_i32_1 = arith.constant 0 : i32
    %c0_i32_2 = arith.constant 0 : i32
    return %arg0, %c0_i32, %c0_i32_0, %c0_i32_1 : i32, i32, i32, i32
  }
  func.func @transform_2(%arg0: i32) -> (i32, i32, i32, i32) {
    %c0_i32 = arith.constant 0 : i32
    %c0_i32_0 = arith.constant 0 : i32
    %c0_i32_1 = arith.constant 0 : i32
    %c0_i32_2 = arith.constant 0 : i32
    return %arg0, %c0_i32, %c0_i32_0, %c0_i32_1 : i32, i32, i32, i32
  }
  func.func @transform_3(%arg0: i32) -> (i32, i32, i32) {
    %c0_i32 = arith.constant 0 : i32
    %c0_i32_0 = arith.constant 0 : i32
    %c0_i32_1 = arith.constant 0 : i32
    %c0_i32_2 = arith.constant 0 : i32
    return %c0_i32, %c0_i32_0, %c0_i32_1 : i32, i32, i32
  }
  func.func @transform_4(%arg0: i32) -> (i32, i32, i32, i32) {
    %c0_i32 = arith.constant 0 : i32
    %c0_i32_0 = arith.constant 0 : i32
    %c0_i32_1 = arith.constant 0 : i32
    %c0_i32_2 = arith.constant 0 : i32
    return %arg0, %c0_i32, %c0_i32_0, %c0_i32_1 : i32, i32, i32, i32
  }
}

module attributes {stable_mosaic.version = 11 : i64} {
  func.func @_matmul_bias_kernel(%arg0: i32, %arg1: memref<512x16xbf16, #tpu.memory_space<vmem>>, %arg2: memref<16x16xbf16, #tpu.memory_space<vmem>>, %arg3: memref<1x16xf32, #tpu.memory_space<vmem>>, %arg4: memref<512x16xf32, #tpu.memory_space<vmem>>) attributes {dimension_semantics = [#tpu.dimension_semantics<parallel>], iteration_bounds = array<i64: 1>, scalar_prefetch = 0 : i64, scratch_operands = 0 : i64, tpu.core_type = #tpu.core_type<tc>, window_params = [{transform_indices = @transform_0, window_bounds = array<i64: 512, 16>}, {pipeline_mode = #tpu.pipeline_mode<synchronous>, transform_indices = @transform_1, window_bounds = array<i64: 16, 16>}, {pipeline_mode = #tpu.pipeline_mode<synchronous>, transform_indices = @transform_2, window_bounds = array<i64: 1, 16>}, {transform_indices = @transform_3, window_bounds = array<i64: 512, 16>}]} {
    %c0 = arith.constant 0 : index
    %c0_0 = arith.constant 0 : index
    %0 = vector.load %arg1[%c0, %c0_0] : memref<512x16xbf16, #tpu.memory_space<vmem>>, vector<512x16xbf16>
    %c0_1 = arith.constant 0 : index
    %c0_2 = arith.constant 0 : index
    %1 = vector.load %arg2[%c0_1, %c0_2] : memref<16x16xbf16, #tpu.memory_space<vmem>>, vector<16x16xbf16>
    %cst = arith.constant dense<0.000000e+00> : vector<512x16xf32>
    %2 = tpu.matmul %0, %1, %cst {dimension_numbers = #tpu.dot_dimension_numbers<[1], [0], [0], [1], [0, 0, 1, 1], [], []>} : vector<512x16xbf16>, vector<16x16xbf16>, vector<512x16xf32> -> vector<512x16xf32>
    %c0_3 = arith.constant 0 : index
    %c0_4 = arith.constant 0 : index
    %3 = vector.load %arg3[%c0_3, %c0_4] : memref<1x16xf32, #tpu.memory_space<vmem>>, vector<1x16xf32>
    %4 = vector.broadcast %3 : vector<1x16xf32> to vector<512x16xf32>
    %5 = arith.addf %2, %4 : vector<512x16xf32>
    %c0_5 = arith.constant 0 : index
    %c0_6 = arith.constant 0 : index
    %6 = vector.load %arg4[%c0_5, %c0_6] : memref<512x16xf32, #tpu.memory_space<vmem>>, vector<512x16xf32>
    tpu.vector_store %arg4[%c0_5, %c0_6], %5 {strides = array<i32>} : memref<512x16xf32, #tpu.memory_space<vmem>>, vector<512x16xf32>,
    return
  }
  func.func @transform_0(%arg0: i32) -> (i32, i32) {
    %c0_i32 = arith.constant 0 : i32
    %c0_i32_0 = arith.constant 0 : i32
    return %arg0, %c0_i32 : i32, i32
  }
  func.func @transform_1(%arg0: i32) -> (i32, i32) {
    %c0_i32 = arith.constant 0 : i32
    %c0_i32_0 = arith.constant 0 : i32
    %c0_i32_1 = arith.constant 0 : i32
    return %c0_i32, %c0_i32_0 : i32, i32
  }
  func.func @transform_2(%arg0: i32) -> (i32, i32) {
    %c0_i32 = arith.constant 0 : i32
    %c0_i32_0 = arith.constant 0 : i32
    %c0_i32_1 = arith.constant 0 : i32
    return %c0_i32, %c0_i32_0 : i32, i32
  }
  func.func @transform_3(%arg0: i32) -> (i32, i32) {
    %c0_i32 = arith.constant 0 : i32
    %c0_i32_0 = arith.constant 0 : i32
    return %arg0, %c0_i32 : i32, i32
  }
}

</mosaic_0001>

<bundles_post_ra>
// kernel: tile.14
= control target key start
LH: loop header
LB: loop body
LE: loop exit
PB: predicated region body
PF: predicated region fallthrough
CT: control target
= control target key end

     0   :  { %s22_s0 = inlined_call_operand.vmem [shape: f32[4], index: 0, kind: input, shape index: {}]   ;;  %s23_s1 = inlined_call_operand.vmem [shape: f32[4,1,1,4], index: 1, kind: output, shape index: {}]  }
   0x1   :  { %v4_v0 = vld [vmem:[%s22_s0] ss:$0 sm:$0xff] }
   0x2   :  { %5 = vst [vmem:[%s23_s1] sm:$0xf] %v4_v0 }

// kernel: tile.15
= control target key start
LH: loop header
LB: loop body
LE: loop exit
PB: predicated region body
PF: predicated region fallthrough
CT: control target
= control target key end

     0   :  { %vm7_vm0 = vcmask 31744   ;;  %s37_s8 = smov 4   ;;  %s38_s9 = smov 8   ;;  %vm13_vm1 = vcmask 130144   ;;  %vm19_vm2 = vcmask 97344   ;;  %vm25_vm3 = vcmask 64544   ;;  %s55_s0 = inlined_call_operand.vmem [shape: f32[4,1,1,4], index: 0, kind: input, shape index: {}]   ;;  %s56_s1 = inlined_call_operand.vmem [shape: f32[16], index: 1, kind: output, shape index: {}]  }
   0x1   :  { %v4_v0 = vld [vmem:[%s55_s0] sm:$0xf]  ;;  %s36_s0 = smov 12  }
   0x2   :  { %5 = vst [vmem:[#allocation1] sm:$0xf] %v4_v0 }
   0x9   :  { %v10_v1 = vld [vmem:[#allocation1 + $0x3] sm:$0x1]   ;;  %v22_v2 = vld [vmem:[#allocation1 + $0x1] sm:$0x1]   ;;  %v6_v3 = vld [vmem:[#allocation1] sm:$0x1]  }
   0xa   :  { %11 = vrot.lane.b32.xlu0 %v10_v1, %s36_s0  ;;  %23 = vrot.lane.b32.xlu1 %v22_v2, %s37_s8  ;;  %v16_v4 = vld [vmem:[#allocation1 + $0x2] sm:$0x1]   ;;  %8 = vst.msk [vmem:[#allocation0] sm:$0x1] %vm7_vm0, %v6_v3  }
   0xe   :  { %17 = vrot.lane.b32.xlu0 %v16_v4, %s38_s9 }
  0x7c   :  { %v12_v5 = vpop.permute.xlu0 %11   ;;  %v24_v6 = vpop.permute.xlu1 %23  }
  0x7d   :  { %14 = vst.msk [vmem:[#allocation0] sm:$0x1] %vm13_vm1, %v12_v5  }
  0x80   :  { %v18_v7 = vpop.permute.xlu0 %17  }
  0x81   :  { %20 = vst.msk [vmem:[#allocation0] sm:$0x1] %vm19_vm2, %v18_v7  }
  0x82   :  { %26 = vst.msk [vmem:[#allocation0] sm:$0x1] %vm25_vm3, %v24_v6  }
  0x89   :  { %v30_v8 = vld [vmem:[#allocation0] sm:$0x1] }
  0x8a   :  { %32 = vst [vmem:[%s56_s1] sm:$0x1] %v30_v8 }

// kernel: sub.26
= control target key start
LH: loop header
LB: loop body
LE: loop exit
PB: predicated region body
PF: predicated region fallthrough
CT: control target
= control target key end

     0   :  { %s29_s10 = smov 3  ;;  %s10_s11 = smov 3  ;;  %vm12_vm0 = vcmask 31744   ;;  %vm19_vm1 = vcmask 130144   ;;  %vm26_vm2 = vcmask 97344   ;;  %vm33_vm3 = vcmask 64544   ;;  %s67_s0 = inlined_call_operand.vmem [shape: s32[2,4,4], index: 0, kind: input, shape index: {}]   ;;  %s68_s1 = inlined_call_operand.vmem [shape: s32[2,16], index: 1, kind: output, shape index: {}]  }
   0x1   :  { %v41_v0 = vld [vmem:[%s67_s0 + $0x4] sm:$0xf]  ;;  %v8_v1 = vld [vmem:[%s67_s0] sm:$0xf]  ;;  %s15_s0 = smov 3  ;;  %s22_s12 = smov 3 }
   0x2   :  { %7 = vst [vmem:[#allocation1 + $0x8] sm:$0xf] %v41_v0  ;;  %9 = vst [vmem:[#allocation1] sm:$0xf] %v8_v1  ;;  %s45_s13 = smov 12   ;;  %s46_s14 = smov 4  }
   0x3   :  { %s47_s15 = smov 8  }
   0x9   :  { %v16_v2 = vld [vmem:[#allocation1 + $0x3] ss:$8 sm:%s15_s0]   ;;  %v30_v3 = vld [vmem:[#allocation1 + $0x1] ss:$8 sm:%s29_s10]   ;;  %v11_v4 = vld [vmem:[#allocation1] ss:$8 sm:%s10_s11]  }
   0xa   :  { %17 = vrot.lane.b32.xlu0 %v16_v2, %s45_s13  ;;  %31 = vrot.lane.b32.xlu1 %v30_v3, %s46_s14  ;;  %v23_v5 = vld [vmem:[#allocation1 + $0x2] ss:$8 sm:%s22_s12]   ;;  %13 = vst.msk [vmem:[#allocation0] sm:$0x3] %vm12_vm0, %v11_v4  }
   0xe   :  { %24 = vrot.lane.b32.xlu0 %v23_v5, %s47_s15 }
  0x7c   :  { %v18_v6 = vpop.permute.xlu0 %17   ;;  %v32_v7 = vpop.permute.xlu1 %31  }
  0x7d   :  { %20 = vst.msk [vmem:[#allocation0] sm:$0x3] %vm19_vm1, %v18_v6  }
  0x80   :  { %v25_v8 = vpop.permute.xlu0 %24  }
  0x81   :  { %27 = vst.msk [vmem:[#allocation0] sm:$0x3] %vm26_vm2, %v25_v8  }
  0x82   :  { %34 = vst.msk [vmem:[#allocation0] sm:$0x3] %vm33_vm3, %v32_v7  }
  0x89   :  { %v38_v9 = vld [vmem:[#allocation0] sm:$0x3] }
  0x8a   :  { %40 = vst [vmem:[%s68_s1] sm:$0x3] %v38_v9 }

// kernel: vsa_window_attention_forward.3
= control target key start
LH: loop header
LB: loop body
LE: loop exit
PB: predicated region body
PF: predicated region fallthrough
CT: control target
= control target key end

     0   :  { %vm254_vm0 = vcmask 130048   ;;  %vm896_vm1 = vcmask 388096   ;;  %s1769_s1 = inlined_call_operand.vmem [shape: bf16[16,48], index: 1, kind: input, shape index: {}]   ;;  %s1770_s0 = inlined_call_operand.vmem [shape: bf16[512,16], index: 0, kind: input, shape index: {}]   ;;  %s1771_s2 = inlined_call_operand.vmem [shape: f32[1,48], index: 2, kind: input, shape index: {}]   ;;  %s1772_s3 = inlined_call_operand.vmem [shape: bf16[512,48], index: 3, kind: output, shape index: {}]  }
   0x1   :  { %v1260_v0 = vld [vmem:[%s1769_s1] sm:$0xff]   ;;  %v1263_v3 = vld [vmem:[%s1770_s0 + $0x8] sm:$0xff]   ;;  %v1265_v5 = vld [vmem:[%s1770_s0 + $0x10] sm:$0xff]  }
   0x2   :  { %v1261_v1 = vld [vmem:[%s1770_s0] sm:$0xff]   ;;  %1192 = vmatprep.subr.bf16.mxu0 %v1260_v0  ;;  %1258 = vmatprep.subr.bf16.mxu1 %v1260_v0  ;;  %v1264_v4 = vld [vmem:[%s1770_s0 + $0x88] sm:$0xff]   ;;  %v1266_v6 = vld [vmem:[%s1770_s0 + $0x90] sm:$0xff]  }
   0x3   :  { %v1262_v2 = vld [vmem:[%s1770_s0 + $0x80] sm:$0xff]   ;;  %1193 = vmatpush3.bf16.msra.mxu0 %v1260_v0  ;;  %1259 = vmatpush3.bf16.msra.mxu1 %v1260_v0  ;;  %v1267_v7 = vld [vmem:[%s1770_s0 + $0x18] sm:$0xff]   ;;  %v1271_v11 = vld [vmem:[%s1770_s0 + $0x28] sm:$0xff]  }
   0x4   :  { %1194 = vmatprep.mubr.msk.bf16.mxu0 %vm254_vm0, %v1261_v1  ;;  %1226 = vmatprep.mubr.msk.bf16.mxu1 %vm254_vm0, %v1262_v2  ;;  %v1268_v8 = vld [vmem:[%s1770_s0 + $0x98] sm:$0xff]   ;;  %v1269_v9 = vld [vmem:[%s1770_s0 + $0x20] sm:$0xff]   ;;  %v1272_v12 = vld [vmem:[%s1770_s0 + $0xa8] sm:$0xff]  }
   0x5   :  { %v1270_v10 = vld [vmem:[%s1770_s0 + $0xa0] sm:$0xff]   ;;  %v1273_v13 = vld [vmem:[%s1770_s0 + $0x30] sm:$0xff]   ;;  %v1275_v15 = vld [vmem:[%s1770_s0 + $0x38] sm:$0xff]  }
   0x6   :  { %1195 = vmatmul.mubr.msk.bf16.vlgmr.msra.gmra.mrb[0].mxu0 %vm254_vm0, %v1263_v3  ;;  %1227 = vmatmul.mubr.msk.bf16.vlgmr.msra.gmra.mrb[0].mxu1 %vm254_vm0, %v1264_v4  ;;  %v1274_v14 = vld [vmem:[%s1770_s0 + $0xb0] sm:$0xff]   ;;  %v1276_v16 = vld [vmem:[%s1770_s0 + $0xb8] sm:$0xff]   ;;  %v1277_v17 = vld [vmem:[%s1770_s0 + $0x40] sm:$0xff]  }
   0x7   :  { %1198 = vmatprep.mubr.msk.bf16.mxu0 %vm254_vm0, %v1265_v5  ;;  %1230 = vmatprep.mubr.msk.bf16.mxu1 %vm254_vm0, %v1266_v6  ;;  %v1278_v18 = vld [vmem:[%s1770_s0 + $0xc0] sm:$0xff]   ;;  %v1279_v19 = vld [vmem:[%s1770_s0 + $0x48] sm:$0xff]   ;;  %v1281_v21 = vld [vmem:[%s1770_s0 + $0x50] sm:$0xff]  }
   0x8   :  { %v1280_v20 = vld [vmem:[%s1770_s0 + $0xc8] sm:$0xff]   ;;  %v1282_v22 = vld [vmem:[%s1770_s0 + $0xd0] sm:$0xff]   ;;  %v1283_v23 = vld [vmem:[%s1770_s0 + $0x58] sm:$0xff]  }
   0x9   :  { %v1284_v24 = vld [vmem:[%s1770_s0 + $0xd8] sm:$0xff]   ;;  %v1285_v25 = vld [vmem:[%s1770_s0 + $0x60] sm:$0xff]   ;;  %v1287_v27 = vld [vmem:[%s1770_s0 + $0x68] sm:$0xff]  }
   0xa   :  { %v1286_v26 = vld [vmem:[%s1770_s0 + $0xe0] sm:$0xff]   ;;  %v1288_v28 = vld [vmem:[%s1770_s0 + $0xe8] sm:$0xff]   ;;  %v1289_v29 = vld [vmem:[%s1770_s0 + $0x70] sm:$0xff]  }
   0xb   :  { %v1290_v30 = vld [vmem:[%s1770_s0 + $0xf0] sm:$0xff]   ;;  %v1291_v31 = vld [vmem:[%s1770_s0 + $0x78] sm:$0xff]   ;;  %v1447_v33 = vld [vmem:[%s1771_s2] ss:$0 sm:$0xff] }
   0xc   :  { %v1292_v32 = vld [vmem:[%s1770_s0 + $0xf8] sm:$0xff]  }
   0xe   :  { %1199 = vmatmul.mubr.msk.bf16.gmra.mrb[4].mxu0 %vm254_vm0, %v1267_v7  ;;  %1231 = vmatmul.mubr.msk.bf16.gmra.mrb[4].mxu1 %vm254_vm0, %v1268_v8 }
   0xf   :  { %1202 = vmatprep.mubr.msk.bf16.mxu0 %vm254_vm0, %v1269_v9  ;;  %1234 = vmatprep.mubr.msk.bf16.mxu1 %vm254_vm0, %v1270_v10 }
  0x16   :  { %1203 = vmatmul.mubr.msk.bf16.gmra.mrb[8].mxu0 %vm254_vm0, %v1271_v11  ;;  %1235 = vmatmul.mubr.msk.bf16.gmra.mrb[8].mxu1 %vm254_vm0, %v1272_v12 }
  0x17   :  { %1206 = vmatprep.mubr.msk.bf16.mxu0 %vm254_vm0, %v1273_v13  ;;  %1238 = vmatprep.mubr.msk.bf16.mxu1 %vm254_vm0, %v1274_v14 }
  0x1e   :  { %1207 = vmatmul.mubr.msk.bf16.gmra.mrb[12].mxu0 %vm254_vm0, %v1275_v15  ;;  %1239 = vmatmul.mubr.msk.bf16.gmra.mrb[12].mxu1 %vm254_vm0, %v1276_v16 }
  0x1f   :  { %1210 = vmatprep.mubr.msk.bf16.mxu0 %vm254_vm0, %v1277_v17  ;;  %1242 = vmatprep.mubr.msk.bf16.mxu1 %vm254_vm0, %v1278_v18 }
  0x26   :  { %1211 = vmatmul.mubr.msk.bf16.gmra.mrb[16].mxu0 %vm254_vm0, %v1279_v19  ;;  %1243 = vmatmul.mubr.msk.bf16.gmra.mrb[16].mxu1 %vm254_vm0, %v1280_v20 }
  0x27   :  { %1214 = vmatprep.mubr.msk.bf16.mxu0 %vm254_vm0, %v1281_v21  ;;  %1246 = vmatprep.mubr.msk.bf16.mxu1 %vm254_vm0, %v1282_v22 }
  0x2e   :  { %1215 = vmatmul.mubr.msk.bf16.gmra.mrb[20].mxu0 %vm254_vm0, %v1283_v23  ;;  %1247 = vmatmul.mubr.msk.bf16.gmra.mrb[20].mxu1 %vm254_vm0, %v1284_v24 }
  0x2f   :  { %1218 = vmatprep.mubr.msk.bf16.mxu0 %vm254_vm0, %v1285_v25  ;;  %1250 = vmatprep.mubr.msk.bf16.mxu1 %vm254_vm0, %v1286_v26 }
  0x36   :  { %1219 = vmatmul.mubr.msk.bf16.gmra.mrb[24].mxu0 %vm254_vm0, %v1287_v27  ;;  %1251 = vmatmul.mubr.msk.bf16.gmra.mrb[24].mxu1 %vm254_vm0, %v1288_v28 }
  0x37   :  { %1222 = vmatprep.mubr.msk.bf16.mxu0 %vm254_vm0, %v1289_v29  ;;  %1254 = vmatprep.mubr.msk.bf16.mxu1 %vm254_vm0, %v1290_v30 }
  0x3e   :  { %1223 = vmatmul.mubr.msk.bf16.gmra.mrb[28].mxu0 %vm254_vm0, %v1291_v31  ;;  %1255 = vmatmul.mubr.msk.bf16.gmra.mrb[28].mxu1 %vm254_vm0, %v1292_v32 }
  0xd9   :  { %v1196_v34 = vpop.f32.mrb[0].mxu0  ;;  %v1228_v35 = vpop.f32.mrb[0].mxu1 }
  0xda   :  { %v394_v36 = vadd.f32 %v1196_v34, %v1447_v33  ;;  %v522_v37 = vadd.f32 %v1228_v35, %v1447_v33  ;;  %v385_v38 = vpop.f32.mrb[1].mxu0  ;;  %v513_v39 = vpop.f32.mrb[1].mxu1 }
  0xdb   :  { %v386_v40 = vadd.f32 %v1447_v33, %v385_v38  ;;  %v514_v41 = vadd.f32 %v1447_v33, %v513_v39  ;;  %v1197_v42 = vpop.f32.mrb[2].mxu0  ;;  %v1229_v43 = vpop.f32.mrb[2].mxu1 }
  0xdc   :  { %v1097_v44 = vpack.c.bf16 %v394_v36, %v394_v36  ;;  %v1129_v45 = vpack.c.bf16 %v522_v37, %v522_v37  ;;  %v397_v46 = vadd.f32 %v1197_v42, %v1447_v33  ;;  %v525_v47 = vadd.f32 %v1229_v43, %v1447_v33  ;;  %v388_v48 = vpop.f32.mrb[3].mxu0  ;;  %v516_v49 = vpop.f32.mrb[3].mxu1 }
  0xdd   :  { %v1095_v50 = vpack.c.bf16 %v386_v40, %v386_v40  ;;  %v1127_v51 = vpack.c.bf16 %v514_v41, %v514_v41  ;;  %v389_v52 = vadd.f32 %v1447_v33, %v388_v48  ;;  %v517_v53 = vadd.f32 %v1447_v33, %v516_v49 }
  0xde   :  { %899 = vst.msk [vmem:[%s1772_s3 + $0x8] sm:$0xf] %vm896_vm1, %v1097_v44  ;;  %931 = vst.msk [vmem:[%s1772_s3 + $0x88] sm:$0xf] %vm896_vm1, %v1129_v45  ;;  %v1098_v54 = vpack.c.bf16 %v397_v46, %v397_v46  ;;  %v1130_v55 = vpack.c.bf16 %v525_v47, %v525_v47 }
  0xdf   :  { %897 = vst.msk [vmem:[%s1772_s3] sm:$0xf] %vm896_vm1, %v1095_v50  ;;  %929 = vst.msk [vmem:[%s1772_s3 + $0x80] sm:$0xf] %vm896_vm1, %v1127_v51  ;;  %v1096_v56 = vpack.c.bf16 %v389_v52, %v389_v52  ;;  %v1128_v57 = vpack.c.bf16 %v517_v53, %v517_v53 }
  0xe0   :  { %900 = vst.msk [vmem:[%s1772_s3 + $0xc] sm:$0xf] %vm896_vm1, %v1098_v54  ;;  %932 = vst.msk [vmem:[%s1772_s3 + $0x8c] sm:$0xf] %vm896_vm1, %v1130_v55 }
  0xe1   :  { %898 = vst.msk [vmem:[%s1772_s3 + $0x4] sm:$0xf] %vm896_vm1, %v1096_v56  ;;  %930 = vst.msk [vmem:[%s1772_s3 + $0x84] sm:$0xf] %vm896_vm1, %v1128_v57  ;;  %v1200_v58 = vpop.f32.mrb[4].mxu0  ;;  %v1232_v59 = vpop.f32.mrb[4].mxu1 }
  0xe2   :  { %v410_v60 = vadd.f32 %v1200_v58, %v1447_v33  ;;  %v538_v61 = vadd.f32 %v1232_v59, %v1447_v33  ;;  %v401_v62 = vpop.f32.mrb[5].mxu0  ;;  %v529_v63 = vpop.f32.mrb[5].mxu1 }
  0xe3   :  { %v402_v0 = vadd.f32 %v1447_v33, %v401_v62  ;;  %v530_v1 = vadd.f32 %v1447_v33, %v529_v63  ;;  %v1201_v2 = vpop.f32.mrb[6].mxu0  ;;  %v1233_v3 = vpop.f32.mrb[6].mxu1 }
  0xe4   :  { %v1101_v4 = vpack.c.bf16 %v410_v60, %v410_v60  ;;  %v1133_v5 = vpack.c.bf16 %v538_v61, %v538_v61  ;;  %v413_v6 = vadd.f32 %v1201_v2, %v1447_v33  ;;  %v541_v7 = vadd.f32 %v1233_v3, %v1447_v33  ;;  %v404_v8 = vpop.f32.mrb[7].mxu0  ;;  %v532_v9 = vpop.f32.mrb[7].mxu1 }
  0xe5   :  { %v1099_v10 = vpack.c.bf16 %v402_v0, %v402_v0  ;;  %v1131_v11 = vpack.c.bf16 %v530_v1, %v530_v1  ;;  %v405_v12 = vadd.f32 %v1447_v33, %v404_v8  ;;  %v533_v13 = vadd.f32 %v1447_v33, %v532_v9 }
  0xe6   :  { %903 = vst.msk [vmem:[%s1772_s3 + $0x18] sm:$0xf] %vm896_vm1, %v1101_v4  ;;  %935 = vst.msk [vmem:[%s1772_s3 + $0x98] sm:$0xf] %vm896_vm1, %v1133_v5  ;;  %v1102_v14 = vpack.c.bf16 %v413_v6, %v413_v6  ;;  %v1134_v15 = vpack.c.bf16 %v541_v7, %v541_v7 }
  0xe7   :  { %901 = vst.msk [vmem:[%s1772_s3 + $0x10] sm:$0xf] %vm896_vm1, %v1099_v10  ;;  %933 = vst.msk [vmem:[%s1772_s3 + $0x90] sm:$0xf] %vm896_vm1, %v1131_v11  ;;  %v1100_v16 = vpack.c.bf16 %v405_v12, %v405_v12  ;;  %v1132_v17 = vpack.c.bf16 %v533_v13, %v533_v13 }
  0xe8   :  { %904 = vst.msk [vmem:[%s1772_s3 + $0x1c] sm:$0xf] %vm896_vm1, %v1102_v14  ;;  %936 = vst.msk [vmem:[%s1772_s3 + $0x9c] sm:$0xf] %vm896_vm1, %v1134_v15 }
  0xe9   :  { %902 = vst.msk [vmem:[%s1772_s3 + $0x14] sm:$0xf] %vm896_vm1, %v1100_v16  ;;  %934 = vst.msk [vmem:[%s1772_s3 + $0x94] sm:$0xf] %vm896_vm1, %v1132_v17  ;;  %v1204_v18 = vpop.f32.mrb[8].mxu0  ;;  %v1236_v19 = vpop.f32.mrb[8].mxu1 }
  0xea   :  { %v426_v20 = vadd.f32 %v1204_v18, %v1447_v33  ;;  %v554_v21 = vadd.f32 %v1236_v19, %v1447_v33  ;;  %v417_v22 = vpop.f32.mrb[9].mxu0  ;;  %v545_v23 = vpop.f32.mrb[9].mxu1 }
  0xeb   :  { %v418_v24 = vadd.f32 %v1447_v33, %v417_v22  ;;  %v546_v25 = vadd.f32 %v1447_v33, %v545_v23  ;;  %v1205_v26 = vpop.f32.mrb[10].mxu0  ;;  %v1237_v27 = vpop.f32.mrb[10].mxu1 }
  0xec   :  { %v1105_v28 = vpack.c.bf16 %v426_v20, %v426_v20  ;;  %v1137_v29 = vpack.c.bf16 %v554_v21, %v554_v21  ;;  %v429_v30 = vadd.f32 %v1205_v26, %v1447_v33  ;;  %v557_v31 = vadd.f32 %v1237_v27, %v1447_v33  ;;  %v420_v32 = vpop.f32.mrb[11].mxu0  ;;  %v548_v34 = vpop.f32.mrb[11].mxu1 }
  0xed   :  { %v1103_v35 = vpack.c.bf16 %v418_v24, %v418_v24  ;;  %v1135_v36 = vpack.c.bf16 %v546_v25, %v546_v25  ;;  %v421_v37 = vadd.f32 %v1447_v33, %v420_v32  ;;  %v549_v38 = vadd.f32 %v1447_v33, %v548_v34 }
  0xee   :  { %907 = vst.msk [vmem:[%s1772_s3 + $0x28] sm:$0xf] %vm896_vm1, %v1105_v28  ;;  %939 = vst.msk [vmem:[%s1772_s3 + $0xa8] sm:$0xf] %vm896_vm1, %v1137_v29  ;;  %v1106_v39 = vpack.c.bf16 %v429_v30, %v429_v30  ;;  %v1138_v40 = vpack.c.bf16 %v557_v31, %v557_v31 }
  0xef   :  { %905 = vst.msk [vmem:[%s1772_s3 + $0x20] sm:$0xf] %vm896_vm1, %v1103_v35  ;;  %937 = vst.msk [vmem:[%s1772_s3 + $0xa0] sm:$0xf] %vm896_vm1, %v1135_v36  ;;  %v1104_v41 = vpack.c.bf16 %v421_v37, %v421_v37  ;;  %v1136_v42 = vpack.c.bf16 %v549_v38, %v549_v38 }
  0xf0   :  { %908 = vst.msk [vmem:[%s1772_s3 + $0x2c] sm:$0xf] %vm896_vm1, %v1106_v39  ;;  %940 = vst.msk [vmem:[%s1772_s3 + $0xac] sm:$0xf] %vm896_vm1, %v1138_v40 }
  0xf1   :  { %906 = vst.msk [vmem:[%s1772_s3 + $0x24] sm:$0xf] %vm896_vm1, %v1104_v41  ;;  %938 = vst.msk [vmem:[%s1772_s3 + $0xa4] sm:$0xf] %vm896_vm1, %v1136_v42  ;;  %v1208_v43 = vpop.f32.mrb[12].mxu0  ;;  %v1240_v44 = vpop.f32.mrb[12].mxu1 }
  0xf2   :  { %v442_v45 = vadd.f32 %v1208_v43, %v1447_v33  ;;  %v570_v46 = vadd.f32 %v1240_v44, %v1447_v33  ;;  %v433_v47 = vpop.f32.mrb[13].mxu0  ;;  %v561_v48 = vpop.f32.mrb[13].mxu1 }
  0xf3   :  { %v434_v49 = vadd.f32 %v1447_v33, %v433_v47  ;;  %v562_v50 = vadd.f32 %v1447_v33, %v561_v48  ;;  %v1209_v51 = vpop.f32.mrb[14].mxu0  ;;  %v1241_v52 = vpop.f32.mrb[14].mxu1 }
  0xf4   :  { %v1109_v53 = vpack.c.bf16 %v442_v45, %v442_v45  ;;  %v1141_v54 = vpack.c.bf16 %v570_v46, %v570_v46  ;;  %v445_v55 = vadd.f32 %v1209_v51, %v1447_v33  ;;  %v573_v56 = vadd.f32 %v1241_v52, %v1447_v33  ;;  %v436_v57 = vpop.f32.mrb[15].mxu0  ;;  %v564_v58 = vpop.f32.mrb[15].mxu1 }
  0xf5   :  { %v1107_v59 = vpack.c.bf16 %v434_v49, %v434_v49  ;;  %v1139_v60 = vpack.c.bf16 %v562_v50, %v562_v50  ;;  %v437_v61 = vadd.f32 %v1447_v33, %v436_v57  ;;  %v565_v62 = vadd.f32 %v1447_v33, %v564_v58 }
  0xf6   :  { %911 = vst.msk [vmem:[%s1772_s3 + $0x38] sm:$0xf] %vm896_vm1, %v1109_v53  ;;  %943 = vst.msk [vmem:[%s1772_s3 + $0xb8] sm:$0xf] %vm896_vm1, %v1141_v54  ;;  %v1110_v63 = vpack.c.bf16 %v445_v55, %v445_v55  ;;  %v1142_v0 = vpack.c.bf16 %v573_v56, %v573_v56 }
  0xf7   :  { %909 = vst.msk [vmem:[%s1772_s3 + $0x30] sm:$0xf] %vm896_vm1, %v1107_v59  ;;  %941 = vst.msk [vmem:[%s1772_s3 + $0xb0] sm:$0xf] %vm896_vm1, %v1139_v60  ;;  %v1108_v1 = vpack.c.bf16 %v437_v61, %v437_v61  ;;  %v1140_v2 = vpack.c.bf16 %v565_v62, %v565_v62 }
  0xf8   :  { %912 = vst.msk [vmem:[%s1772_s3 + $0x3c] sm:$0xf] %vm896_vm1, %v1110_v63  ;;  %944 = vst.msk [vmem:[%s1772_s3 + $0xbc] sm:$0xf] %vm896_vm1, %v1142_v0 }
  0xf9   :  { %910 = vst.msk [vmem:[%s1772_s3 + $0x34] sm:$0xf] %vm896_vm1, %v1108_v1  ;;  %942 = vst.msk [vmem:[%s1772_s3 + $0xb4] sm:$0xf] %vm896_vm1, %v1140_v2  ;;  %v1212_v3 = vpop.f32.mrb[16].mxu0  ;;  %v1244_v4 = vpop.f32.mrb[16].mxu1 }
  0xfa   :  { %v458_v5 = vadd.f32 %v1212_v3, %v1447_v33  ;;  %v586_v6 = vadd.f32 %v1244_v4, %v1447_v33  ;;  %v449_v7 = vpop.f32.mrb[17].mxu0  ;;  %v577_v8 = vpop.f32.mrb[17].mxu1 }
  0xfb   :  { %v450_v9 = vadd.f32 %v1447_v33, %v449_v7  ;;  %v578_v10 = vadd.f32 %v1447_v33, %v577_v8  ;;  %v1213_v11 = vpop.f32.mrb[18].mxu0  ;;  %v1245_v12 = vpop.f32.mrb[18].mxu1 }
  0xfc   :  { %v1113_v13 = vpack.c.bf16 %v458_v5, %v458_v5  ;;  %v1145_v14 = vpack.c.bf16 %v586_v6, %v586_v6  ;;  %v461_v15 = vadd.f32 %v1213_v11, %v1447_v33  ;;  %v589_v16 = vadd.f32 %v1245_v12, %v1447_v33  ;;  %v452_v17 = vpop.f32.mrb[19].mxu0  ;;  %v580_v18 = vpop.f32.mrb[19].mxu1 }
  0xfd   :  { %v1111_v19 = vpack.c.bf16 %v450_v9, %v450_v9  ;;  %v1143_v20 = vpack.c.bf16 %v578_v10, %v578_v10  ;;  %v453_v21 = vadd.f32 %v1447_v33, %v452_v17  ;;  %v581_v22 = vadd.f32 %v1447_v33, %v580_v18 }
  0xfe   :  { %915 = vst.msk [vmem:[%s1772_s3 + $0x48] sm:$0xf] %vm896_vm1, %v1113_v13  ;;  %947 = vst.msk [vmem:[%s1772_s3 + $0xc8] sm:$0xf] %vm896_vm1, %v1145_v14  ;;  %v1114_v23 = vpack.c.bf16 %v461_v15, %v461_v15  ;;  %v1146_v24 = vpack.c.bf16 %v589_v16, %v589_v16 }
  0xff   :  { %913 = vst.msk [vmem:[%s1772_s3 + $0x40] sm:$0xf] %vm896_vm1, %v1111_v19  ;;  %945 = vst.msk [vmem:[%s1772_s3 + $0xc0] sm:$0xf] %vm896_vm1, %v1143_v20  ;;  %v1112_v25 = vpack.c.bf16 %v453_v21, %v453_v21  ;;  %v1144_v26 = vpack.c.bf16 %v581_v22, %v581_v22 }
 0x100   :  { %916 = vst.msk [vmem:[%s1772_s3 + $0x4c] sm:$0xf] %vm896_vm1, %v1114_v23  ;;  %948 = vst.msk [vmem:[%s1772_s3 + $0xcc] sm:$0xf] %vm896_vm1, %v1146_v24 }
 0x101   :  { %914 = vst.msk [vmem:[%s1772_s3 + $0x44] sm:$0xf] %vm896_vm1, %v1112_v25  ;;  %946 = vst.msk [vmem:[%s1772_s3 + $0xc4] sm:$0xf] %vm896_vm1, %v1144_v26  ;;  %v1216_v27 = vpop.f32.mrb[20].mxu0  ;;  %v1248_v28 = vpop.f32.mrb[20].mxu1 }
 0x102   :  { %v474_v29 = vadd.f32 %v1216_v27, %v1447_v33  ;;  %v602_v30 = vadd.f32 %v1248_v28, %v1447_v33  ;;  %v465_v31 = vpop.f32.mrb[21].mxu0  ;;  %v593_v32 = vpop.f32.mrb[21].mxu1 }
 0x103   :  { %v466_v34 = vadd.f32 %v1447_v33, %v465_v31  ;;  %v594_v35 = vadd.f32 %v1447_v33, %v593_v32  ;;  %v1217_v36 = vpop.f32.mrb[22].mxu0  ;;  %v1249_v37 = vpop.f32.mrb[22].mxu1 }
 0x104   :  { %v1117_v38 = vpack.c.bf16 %v474_v29, %v474_v29  ;;  %v1149_v39 = vpack.c.bf16 %v602_v30, %v602_v30  ;;  %v477_v40 = vadd.f32 %v1217_v36, %v1447_v33  ;;  %v605_v41 = vadd.f32 %v1249_v37, %v1447_v33  ;;  %v468_v42 = vpop.f32.mrb[23].mxu0  ;;  %v596_v43 = vpop.f32.mrb[23].mxu1 }
 0x105   :  { %v1115_v44 = vpack.c.bf16 %v466_v34, %v466_v34  ;;  %v1147_v45 = vpack.c.bf16 %v594_v35, %v594_v35  ;;  %v469_v46 = vadd.f32 %v1447_v33, %v468_v42  ;;  %v597_v47 = vadd.f32 %v1447_v33, %v596_v43 }
 0x106   :  { %919 = vst.msk [vmem:[%s1772_s3 + $0x58] sm:$0xf] %vm896_vm1, %v1117_v38  ;;  %951 = vst.msk [vmem:[%s1772_s3 + $0xd8] sm:$0xf] %vm896_vm1, %v1149_v39  ;;  %v1118_v48 = vpack.c.bf16 %v477_v40, %v477_v40  ;;  %v1150_v49 = vpack.c.bf16 %v605_v41, %v605_v41 }
 0x107   :  { %917 = vst.msk [vmem:[%s1772_s3 + $0x50] sm:$0xf] %vm896_vm1, %v1115_v44  ;;  %949 = vst.msk [vmem:[%s1772_s3 + $0xd0] sm:$0xf] %vm896_vm1, %v1147_v45  ;;  %v1116_v50 = vpack.c.bf16 %v469_v46, %v469_v46  ;;  %v1148_v51 = vpack.c.bf16 %v597_v47, %v597_v47 }
 0x108   :  { %920 = vst.msk [vmem:[%s1772_s3 + $0x5c] sm:$0xf] %vm896_vm1, %v1118_v48  ;;  %952 = vst.msk [vmem:[%s1772_s3 + $0xdc] sm:$0xf] %vm896_vm1, %v1150_v49 }
 0x109   :  { %918 = vst.msk [vmem:[%s1772_s3 + $0x54] sm:$0xf] %vm896_vm1, %v1116_v50  ;;  %950 = vst.msk [vmem:[%s1772_s3 + $0xd4] sm:$0xf] %vm896_vm1, %v1148_v51  ;;  %v1220_v52 = vpop.f32.mrb[24].mxu0  ;;  %v1252_v53 = vpop.f32.mrb[24].mxu1 }
 0x10a   :  { %v490_v54 = vadd.f32 %v1220_v52, %v1447_v33  ;;  %v618_v55 = vadd.f32 %v1252_v53, %v1447_v33  ;;  %v481_v56 = vpop.f32.mrb[25].mxu0  ;;  %v609_v57 = vpop.f32.mrb[25].mxu1 }
 0x10b   :  { %v482_v58 = vadd.f32 %v1447_v33, %v481_v56  ;;  %v610_v59 = vadd.f32 %v1447_v33, %v609_v57  ;;  %v1221_v60 = vpop.f32.mrb[26].mxu0  ;;  %v1253_v61 = vpop.f32.mrb[26].mxu1 }
 0x10c   :  { %v1121_v62 = vpack.c.bf16 %v490_v54, %v490_v54  ;;  %v1153_v63 = vpack.c.bf16 %v618_v55, %v618_v55  ;;  %v493_v0 = vadd.f32 %v1221_v60, %v1447_v33  ;;  %v621_v1 = vadd.f32 %v1253_v61, %v1447_v33  ;;  %v484_v2 = vpop.f32.mrb[27].mxu0  ;;  %v612_v3 = vpop.f32.mrb[27].mxu1 }
 0x10d   :  { %v1119_v4 = vpack.c.bf16 %v482_v58, %v482_v58  ;;  %v1151_v5 = vpack.c.bf16 %v610_v59, %v610_v59  ;;  %v485_v6 = vadd.f32 %v1447_v33, %v484_v2  ;;  %v613_v7 = vadd.f32 %v1447_v33, %v612_v3 }
 0x10e   :  { %923 = vst.msk [vmem:[%s1772_s3 + $0x68] sm:$0xf] %vm896_vm1, %v1121_v62  ;;  %955 = vst.msk [vmem:[%s1772_s3 + $0xe8] sm:$0xf] %vm896_vm1, %v1153_v63  ;;  %v1122_v8 = vpack.c.bf16 %v493_v0, %v493_v0  ;;  %v1154_v9 = vpack.c.bf16 %v621_v1, %v621_v1 }
 0x10f   :  { %921 = vst.msk [vmem:[%s1772_s3 + $0x60] sm:$0xf] %vm896_vm1, %v1119_v4  ;;  %953 = vst.msk [vmem:[%s1772_s3 + $0xe0] sm:$0xf] %vm896_vm1, %v1151_v5  ;;  %v1120_v10 = vpack.c.bf16 %v485_v6, %v485_v6  ;;  %v1152_v11 = vpack.c.bf16 %v613_v7, %v613_v7 }
 0x110   :  { %924 = vst.msk [vmem:[%s1772_s3 + $0x6c] sm:$0xf] %vm896_vm1, %v1122_v8  ;;  %956 = vst.msk [vmem:[%s1772_s3 + $0xec] sm:$0xf] %vm896_vm1, %v1154_v9 }
 0x111   :  { %922 = vst.msk [vmem:[%s1772_s3 + $0x64] sm:$0xf] %vm896_vm1, %v1120_v10  ;;  %954 = vst.msk [vmem:[%s1772_s3 + $0xe4] sm:$0xf] %vm896_vm1, %v1152_v11  ;;  %v1224_v12 = vpop.f32.mrb[28].mxu0  ;;  %v1256_v13 = vpop.f32.mrb[28].mxu1 }
 0x112   :  { %v506_v14 = vadd.f32 %v1224_v12, %v1447_v33  ;;  %v634_v15 = vadd.f32 %v1256_v13, %v1447_v33  ;;  %v497_v16 = vpop.f32.mrb[29].mxu0  ;;  %v625_v17 = vpop.f32.mrb[29].mxu1 }
 0x113   :  { %v498_v18 = vadd.f32 %v1447_v33, %v497_v16  ;;  %v626_v19 = vadd.f32 %v1447_v33, %v625_v17  ;;  %v1225_v20 = vpop.f32.mrb[30].mxu0  ;;  %v1257_v21 = vpop.f32.mrb[30].mxu1 }
 0x114   :  { %v1125_v22 = vpack.c.bf16 %v506_v14, %v506_v14  ;;  %v1157_v23 = vpack.c.bf16 %v634_v15, %v634_v15  ;;  %v509_v24 = vadd.f32 %v1225_v20, %v1447_v33  ;;  %v637_v25 = vadd.f32 %v1257_v21, %v1447_v33  ;;  %v500_v26 = vpop.f32.mrb[31].mxu0  ;;  %v628_v27 = vpop.f32.mrb[31].mxu1 }
 0x115   :  { %v1123_v28 = vpack.c.bf16 %v498_v18, %v498_v18  ;;  %v1155_v29 = vpack.c.bf16 %v626_v19, %v626_v19  ;;  %v501_v30 = vadd.f32 %v1447_v33, %v500_v26  ;;  %v629_v31 = vadd.f32 %v1447_v33, %v628_v27 }
 0x116   :  { %927 = vst.msk [vmem:[%s1772_s3 + $0x78] sm:$0xf] %vm896_vm1, %v1125_v22  ;;  %959 = vst.msk [vmem:[%s1772_s3 + $0xf8] sm:$0xf] %vm896_vm1, %v1157_v23  ;;  %v1126_v32 = vpack.c.bf16 %v509_v24, %v509_v24  ;;  %v1158_v34 = vpack.c.bf16 %v637_v25, %v637_v25 }
 0x117   :  { %925 = vst.msk [vmem:[%s1772_s3 + $0x70] sm:$0xf] %vm896_vm1, %v1123_v28  ;;  %957 = vst.msk [vmem:[%s1772_s3 + $0xf0] sm:$0xf] %vm896_vm1, %v1155_v29  ;;  %v1124_v33 = vpack.c.bf16 %v501_v30, %v501_v30  ;;  %v1156_v35 = vpack.c.bf16 %v629_v31, %v629_v31 }
 0x118   :  { %928 = vst.msk [vmem:[%s1772_s3 + $0x7c] sm:$0xf] %vm896_vm1, %v1126_v32  ;;  %960 = vst.msk [vmem:[%s1772_s3 + $0xfc] sm:$0xf] %vm896_vm1, %v1158_v34 }
 0x119   :  { %926 = vst.msk [vmem:[%s1772_s3 + $0x74] sm:$0xf] %vm896_vm1, %v1124_v33  ;;  %958 = vst.msk [vmem:[%s1772_s3 + $0xf4] sm:$0xf] %vm896_vm1, %v1156_v35 }

// kernel: vsa_window_attention_forward.5
= control target key start
LH: loop header
LB: loop body
LE: loop exit
PB: predicated region body
PF: predicated region fallthrough
CT: control target
= control target key end

     0   :  { %vm254_vm0 = vcmask 130048   ;;  %s1384_s1 = inlined_call_operand.vmem [shape: bf16[16,16], index: 1, kind: input, shape index: {}]   ;;  %s1385_s0 = inlined_call_operand.vmem [shape: bf16[512,16], index: 0, kind: input, shape index: {}]   ;;  %s1386_s2 = inlined_call_operand.vmem [shape: f32[1,16], index: 2, kind: input, shape index: {}]   ;;  %s1387_s3 = inlined_call_operand.vmem [shape: f32[512,16], index: 3, kind: output, shape index: {}]  }
   0x1   :  { %v875_v0 = vld [vmem:[%s1384_s1] sm:$0xff]   ;;  %v878_v3 = vld [vmem:[%s1385_s0 + $0x8] sm:$0xff]   ;;  %v880_v5 = vld [vmem:[%s1385_s0 + $0x10] sm:$0xff]  }
   0x2   :  { %v876_v1 = vld [vmem:[%s1385_s0] sm:$0xff]   ;;  %807 = vmatprep.subr.bf16.mxu0 %v875_v0  ;;  %873 = vmatprep.subr.bf16.mxu1 %v875_v0  ;;  %v879_v4 = vld [vmem:[%s1385_s0 + $0x88] sm:$0xff]   ;;  %v881_v6 = vld [vmem:[%s1385_s0 + $0x90] sm:$0xff]  }
   0x3   :  { %v877_v2 = vld [vmem:[%s1385_s0 + $0x80] sm:$0xff]   ;;  %808 = vmatpush3.bf16.msra.mxu0 %v875_v0  ;;  %874 = vmatpush3.bf16.msra.mxu1 %v875_v0  ;;  %v882_v7 = vld [vmem:[%s1385_s0 + $0x18] sm:$0xff]   ;;  %v886_v11 = vld [vmem:[%s1385_s0 + $0x28] sm:$0xff]  }
   0x4   :  { %809 = vmatprep.mubr.msk.bf16.mxu0 %vm254_vm0, %v876_v1  ;;  %841 = vmatprep.mubr.msk.bf16.mxu1 %vm254_vm0, %v877_v2  ;;  %v883_v8 = vld [vmem:[%s1385_s0 + $0x98] sm:$0xff]   ;;  %v884_v9 = vld [vmem:[%s1385_s0 + $0x20] sm:$0xff]   ;;  %v887_v12 = vld [vmem:[%s1385_s0 + $0xa8] sm:$0xff]  }
   0x5   :  { %v885_v10 = vld [vmem:[%s1385_s0 + $0xa0] sm:$0xff]   ;;  %v888_v13 = vld [vmem:[%s1385_s0 + $0x30] sm:$0xff]   ;;  %v890_v15 = vld [vmem:[%s1385_s0 + $0x38] sm:$0xff]  }
   0x6   :  { %810 = vmatmul.mubr.msk.bf16.vlgmr.msra.gmra.mrb[0].mxu0 %vm254_vm0, %v878_v3  ;;  %842 = vmatmul.mubr.msk.bf16.vlgmr.msra.gmra.mrb[0].mxu1 %vm254_vm0, %v879_v4  ;;  %v889_v14 = vld [vmem:[%s1385_s0 + $0xb0] sm:$0xff]   ;;  %v891_v16 = vld [vmem:[%s1385_s0 + $0xb8] sm:$0xff]   ;;  %v892_v17 = vld [vmem:[%s1385_s0 + $0x40] sm:$0xff]  }
   0x7   :  { %813 = vmatprep.mubr.msk.bf16.mxu0 %vm254_vm0, %v880_v5  ;;  %845 = vmatprep.mubr.msk.bf16.mxu1 %vm254_vm0, %v881_v6  ;;  %v893_v18 = vld [vmem:[%s1385_s0 + $0xc0] sm:$0xff]   ;;  %v894_v19 = vld [vmem:[%s1385_s0 + $0x48] sm:$0xff]   ;;  %v896_v21 = vld [vmem:[%s1385_s0 + $0x50] sm:$0xff]  }
   0x8   :  { %v895_v20 = vld [vmem:[%s1385_s0 + $0xc8] sm:$0xff]   ;;  %v897_v22 = vld [vmem:[%s1385_s0 + $0xd0] sm:$0xff]   ;;  %v898_v23 = vld [vmem:[%s1385_s0 + $0x58] sm:$0xff]  }
   0x9   :  { %v899_v24 = vld [vmem:[%s1385_s0 + $0xd8] sm:$0xff]   ;;  %v900_v25 = vld [vmem:[%s1385_s0 + $0x60] sm:$0xff]   ;;  %v902_v27 = vld [vmem:[%s1385_s0 + $0x68] sm:$0xff]  }
   0xa   :  { %v901_v26 = vld [vmem:[%s1385_s0 + $0xe0] sm:$0xff]   ;;  %v903_v28 = vld [vmem:[%s1385_s0 + $0xe8] sm:$0xff]   ;;  %v904_v29 = vld [vmem:[%s1385_s0 + $0x70] sm:$0xff]  }
   0xb   :  { %v905_v30 = vld [vmem:[%s1385_s0 + $0xf0] sm:$0xff]   ;;  %v906_v31 = vld [vmem:[%s1385_s0 + $0x78] sm:$0xff]   ;;  %v1062_v33 = vld [vmem:[%s1386_s2] ss:$0 sm:$0xff] }
   0xc   :  { %v907_v32 = vld [vmem:[%s1385_s0 + $0xf8] sm:$0xff]  }
   0xe   :  { %814 = vmatmul.mubr.msk.bf16.gmra.mrb[4].mxu0 %vm254_vm0, %v882_v7  ;;  %846 = vmatmul.mubr.msk.bf16.gmra.mrb[4].mxu1 %vm254_vm0, %v883_v8 }
   0xf   :  { %817 = vmatprep.mubr.msk.bf16.mxu0 %vm254_vm0, %v884_v9  ;;  %849 = vmatprep.mubr.msk.bf16.mxu1 %vm254_vm0, %v885_v10 }
  0x16   :  { %818 = vmatmul.mubr.msk.bf16.gmra.mrb[8].mxu0 %vm254_vm0, %v886_v11  ;;  %850 = vmatmul.mubr.msk.bf16.gmra.mrb[8].mxu1 %vm254_vm0, %v887_v12 }
  0x17   :  { %821 = vmatprep.mubr.msk.bf16.mxu0 %vm254_vm0, %v888_v13  ;;  %853 = vmatprep.mubr.msk.bf16.mxu1 %vm254_vm0, %v889_v14 }
  0x1e   :  { %822 = vmatmul.mubr.msk.bf16.gmra.mrb[12].mxu0 %vm254_vm0, %v890_v15  ;;  %854 = vmatmul.mubr.msk.bf16.gmra.mrb[12].mxu1 %vm254_vm0, %v891_v16 }
  0x1f   :  { %825 = vmatprep.mubr.msk.bf16.mxu0 %vm254_vm0, %v892_v17  ;;  %857 = vmatprep.mubr.msk.bf16.mxu1 %vm254_vm0, %v893_v18 }
  0x26   :  { %826 = vmatmul.mubr.msk.bf16.gmra.mrb[16].mxu0 %vm254_vm0, %v894_v19  ;;  %858 = vmatmul.mubr.msk.bf16.gmra.mrb[16].mxu1 %vm254_vm0, %v895_v20 }
  0x27   :  { %829 = vmatprep.mubr.msk.bf16.mxu0 %vm254_vm0, %v896_v21  ;;  %861 = vmatprep.mubr.msk.bf16.mxu1 %vm254_vm0, %v897_v22 }
  0x2e   :  { %830 = vmatmul.mubr.msk.bf16.gmra.mrb[20].mxu0 %vm254_vm0, %v898_v23  ;;  %862 = vmatmul.mubr.msk.bf16.gmra.mrb[20].mxu1 %vm254_vm0, %v899_v24 }
  0x2f   :  { %833 = vmatprep.mubr.msk.bf16.mxu0 %vm254_vm0, %v900_v25  ;;  %865 = vmatprep.mubr.msk.bf16.mxu1 %vm254_vm0, %v901_v26 }
  0x36   :  { %834 = vmatmul.mubr.msk.bf16.gmra.mrb[24].mxu0 %vm254_vm0, %v902_v27  ;;  %866 = vmatmul.mubr.msk.bf16.gmra.mrb[24].mxu1 %vm254_vm0, %v903_v28 }
  0x37   :  { %837 = vmatprep.mubr.msk.bf16.mxu0 %vm254_vm0, %v904_v29  ;;  %869 = vmatprep.mubr.msk.bf16.mxu1 %vm254_vm0, %v905_v30 }
  0x3e   :  { %838 = vmatmul.mubr.msk.bf16.gmra.mrb[28].mxu0 %vm254_vm0, %v906_v31  ;;  %870 = vmatmul.mubr.msk.bf16.gmra.mrb[28].mxu1 %vm254_vm0, %v907_v32 }
  0xd9   :  { %v811_v34 = vpop.f32.mrb[0].mxu0  ;;  %v843_v35 = vpop.f32.mrb[0].mxu1 }
  0xda   :  { %v394_v36 = vadd.f32 %v811_v34, %v1062_v33  ;;  %v522_v37 = vadd.f32 %v843_v35, %v1062_v33  ;;  %v385_v38 = vpop.f32.mrb[1].mxu0  ;;  %v513_v39 = vpop.f32.mrb[1].mxu1 }
  0xdb   :  { %v386_v40 = vadd.f32 %v1062_v33, %v385_v38  ;;  %v514_v41 = vadd.f32 %v1062_v33, %v513_v39  ;;  %v812_v42 = vpop.f32.mrb[2].mxu0  ;;  %v844_v43 = vpop.f32.mrb[2].mxu1 }
  0xdc   :  { %642 = vst.msk [vmem:[%s1387_s3 + $0x10] sm:$0xff] %vm254_vm0, %v394_v36  ;;  %674 = vst.msk [vmem:[%s1387_s3 + $0x110] sm:$0xff] %vm254_vm0, %v522_v37  ;;  %v397_v44 = vadd.f32 %v812_v42, %v1062_v33  ;;  %v525_v45 = vadd.f32 %v844_v43, %v1062_v33  ;;  %v388_v46 = vpop.f32.mrb[3].mxu0  ;;  %v516_v47 = vpop.f32.mrb[3].mxu1 }
  0xdd   :  { %640 = vst.msk [vmem:[%s1387_s3] sm:$0xff] %vm254_vm0, %v386_v40  ;;  %672 = vst.msk [vmem:[%s1387_s3 + $0x100] sm:$0xff] %vm254_vm0, %v514_v41  ;;  %v389_v48 = vadd.f32 %v1062_v33, %v388_v46  ;;  %v517_v49 = vadd.f32 %v1062_v33, %v516_v47 }
  0xde   :  { %643 = vst.msk [vmem:[%s1387_s3 + $0x18] sm:$0xff] %vm254_vm0, %v397_v44  ;;  %675 = vst.msk [vmem:[%s1387_s3 + $0x118] sm:$0xff] %vm254_vm0, %v525_v45 }
  0xdf   :  { %641 = vst.msk [vmem:[%s1387_s3 + $0x8] sm:$0xff] %vm254_vm0, %v389_v48  ;;  %673 = vst.msk [vmem:[%s1387_s3 + $0x108] sm:$0xff] %vm254_vm0, %v517_v49 }
  0xe1   :  { %v815_v50 = vpop.f32.mrb[4].mxu0  ;;  %v847_v51 = vpop.f32.mrb[4].mxu1 }
  0xe2   :  { %v410_v52 = vadd.f32 %v815_v50, %v1062_v33  ;;  %v538_v53 = vadd.f32 %v847_v51, %v1062_v33  ;;  %v401_v54 = vpop.f32.mrb[5].mxu0  ;;  %v529_v55 = vpop.f32.mrb[5].mxu1 }
  0xe3   :  { %v402_v56 = vadd.f32 %v1062_v33, %v401_v54  ;;  %v530_v57 = vadd.f32 %v1062_v33, %v529_v55  ;;  %v816_v58 = vpop.f32.mrb[6].mxu0  ;;  %v848_v59 = vpop.f32.mrb[6].mxu1 }
  0xe4   :  { %646 = vst.msk [vmem:[%s1387_s3 + $0x30] sm:$0xff] %vm254_vm0, %v410_v52  ;;  %678 = vst.msk [vmem:[%s1387_s3 + $0x130] sm:$0xff] %vm254_vm0, %v538_v53  ;;  %v413_v60 = vadd.f32 %v816_v58, %v1062_v33  ;;  %v541_v61 = vadd.f32 %v848_v59, %v1062_v33  ;;  %v404_v62 = vpop.f32.mrb[7].mxu0  ;;  %v532_v63 = vpop.f32.mrb[7].mxu1 }
  0xe5   :  { %644 = vst.msk [vmem:[%s1387_s3 + $0x20] sm:$0xff] %vm254_vm0, %v402_v56  ;;  %676 = vst.msk [vmem:[%s1387_s3 + $0x120] sm:$0xff] %vm254_vm0, %v530_v57  ;;  %v405_v0 = vadd.f32 %v1062_v33, %v404_v62  ;;  %v533_v1 = vadd.f32 %v1062_v33, %v532_v63 }
  0xe6   :  { %647 = vst.msk [vmem:[%s1387_s3 + $0x38] sm:$0xff] %vm254_vm0, %v413_v60  ;;  %679 = vst.msk [vmem:[%s1387_s3 + $0x138] sm:$0xff] %vm254_vm0, %v541_v61 }
  0xe7   :  { %645 = vst.msk [vmem:[%s1387_s3 + $0x28] sm:$0xff] %vm254_vm0, %v405_v0  ;;  %677 = vst.msk [vmem:[%s1387_s3 + $0x128] sm:$0xff] %vm254_vm0, %v533_v1 }
  0xe9   :  { %v819_v2 = vpop.f32.mrb[8].mxu0  ;;  %v851_v3 = vpop.f32.mrb[8].mxu1 }
  0xea   :  { %v426_v4 = vadd.f32 %v819_v2, %v1062_v33  ;;  %v554_v5 = vadd.f32 %v851_v3, %v1062_v33  ;;  %v417_v6 = vpop.f32.mrb[9].mxu0  ;;  %v545_v7 = vpop.f32.mrb[9].mxu1 }
  0xeb   :  { %v418_v8 = vadd.f32 %v1062_v33, %v417_v6  ;;  %v546_v9 = vadd.f32 %v1062_v33, %v545_v7  ;;  %v820_v10 = vpop.f32.mrb[10].mxu0  ;;  %v852_v11 = vpop.f32.mrb[10].mxu1 }
  0xec   :  { %650 = vst.msk [vmem:[%s1387_s3 + $0x50] sm:$0xff] %vm254_vm0, %v426_v4  ;;  %682 = vst.msk [vmem:[%s1387_s3 + $0x150] sm:$0xff] %vm254_vm0, %v554_v5  ;;  %v429_v12 = vadd.f32 %v820_v10, %v1062_v33  ;;  %v557_v13 = vadd.f32 %v852_v11, %v1062_v33  ;;  %v420_v14 = vpop.f32.mrb[11].mxu0  ;;  %v548_v15 = vpop.f32.mrb[11].mxu1 }
  0xed   :  { %648 = vst.msk [vmem:[%s1387_s3 + $0x40] sm:$0xff] %vm254_vm0, %v418_v8  ;;  %680 = vst.msk [vmem:[%s1387_s3 + $0x140] sm:$0xff] %vm254_vm0, %v546_v9  ;;  %v421_v16 = vadd.f32 %v1062_v33, %v420_v14  ;;  %v549_v17 = vadd.f32 %v1062_v33, %v548_v15 }
  0xee   :  { %651 = vst.msk [vmem:[%s1387_s3 + $0x58] sm:$0xff] %vm254_vm0, %v429_v12  ;;  %683 = vst.msk [vmem:[%s1387_s3 + $0x158] sm:$0xff] %vm254_vm0, %v557_v13 }
  0xef   :  { %649 = vst.msk [vmem:[%s1387_s3 + $0x48] sm:$0xff] %vm254_vm0, %v421_v16  ;;  %681 = vst.msk [vmem:[%s1387_s3 + $0x148] sm:$0xff] %vm254_vm0, %v549_v17 }
  0xf1   :  { %v823_v18 = vpop.f32.mrb[12].mxu0  ;;  %v855_v19 = vpop.f32.mrb[12].mxu1 }
  0xf2   :  { %v442_v20 = vadd.f32 %v823_v18, %v1062_v33  ;;  %v570_v21 = vadd.f32 %v855_v19, %v1062_v33  ;;  %v433_v22 = vpop.f32.mrb[13].mxu0  ;;  %v561_v23 = vpop.f32.mrb[13].mxu1 }
  0xf3   :  { %v434_v24 = vadd.f32 %v1062_v33, %v433_v22  ;;  %v562_v25 = vadd.f32 %v1062_v33, %v561_v23  ;;  %v824_v26 = vpop.f32.mrb[14].mxu0  ;;  %v856_v27 = vpop.f32.mrb[14].mxu1 }
  0xf4   :  { %654 = vst.msk [vmem:[%s1387_s3 + $0x70] sm:$0xff] %vm254_vm0, %v442_v20  ;;  %686 = vst.msk [vmem:[%s1387_s3 + $0x170] sm:$0xff] %vm254_vm0, %v570_v21  ;;  %v445_v28 = vadd.f32 %v824_v26, %v1062_v33  ;;  %v573_v29 = vadd.f32 %v856_v27, %v1062_v33  ;;  %v436_v30 = vpop.f32.mrb[15].mxu0  ;;  %v564_v31 = vpop.f32.mrb[15].mxu1 }
  0xf5   :  { %652 = vst.msk [vmem:[%s1387_s3 + $0x60] sm:$0xff] %vm254_vm0, %v434_v24  ;;  %684 = vst.msk [vmem:[%s1387_s3 + $0x160] sm:$0xff] %vm254_vm0, %v562_v25  ;;  %v437_v32 = vadd.f32 %v1062_v33, %v436_v30  ;;  %v565_v34 = vadd.f32 %v1062_v33, %v564_v31 }
  0xf6   :  { %655 = vst.msk [vmem:[%s1387_s3 + $0x78] sm:$0xff] %vm254_vm0, %v445_v28  ;;  %687 = vst.msk [vmem:[%s1387_s3 + $0x178] sm:$0xff] %vm254_vm0, %v573_v29 }
  0xf7   :  { %653 = vst.msk [vmem:[%s1387_s3 + $0x68] sm:$0xff] %vm254_vm0, %v437_v32  ;;  %685 = vst.msk [vmem:[%s1387_s3 + $0x168] sm:$0xff] %vm254_vm0, %v565_v34 }
  0xf9   :  { %v827_v35 = vpop.f32.mrb[16].mxu0  ;;  %v859_v36 = vpop.f32.mrb[16].mxu1 }
  0xfa   :  { %v458_v37 = vadd.f32 %v827_v35, %v1062_v33  ;;  %v586_v38 = vadd.f32 %v859_v36, %v1062_v33  ;;  %v449_v39 = vpop.f32.mrb[17].mxu0  ;;  %v577_v40 = vpop.f32.mrb[17].mxu1 }
  0xfb   :  { %v450_v41 = vadd.f32 %v1062_v33, %v449_v39  ;;  %v578_v42 = vadd.f32 %v1062_v33, %v577_v40  ;;  %v828_v43 = vpop.f32.mrb[18].mxu0  ;;  %v860_v44 = vpop.f32.mrb[18].mxu1 }
  0xfc   :  { %658 = vst.msk [vmem:[%s1387_s3 + $0x90] sm:$0xff] %vm254_vm0, %v458_v37  ;;  %690 = vst.msk [vmem:[%s1387_s3 + $0x190] sm:$0xff] %vm254_vm0, %v586_v38  ;;  %v461_v45 = vadd.f32 %v828_v43, %v1062_v33  ;;  %v589_v46 = vadd.f32 %v860_v44, %v1062_v33  ;;  %v452_v47 = vpop.f32.mrb[19].mxu0  ;;  %v580_v48 = vpop.f32.mrb[19].mxu1 }
  0xfd   :  { %656 = vst.msk [vmem:[%s1387_s3 + $0x80] sm:$0xff] %vm254_vm0, %v450_v41  ;;  %688 = vst.msk [vmem:[%s1387_s3 + $0x180] sm:$0xff] %vm254_vm0, %v578_v42  ;;  %v453_v49 = vadd.f32 %v1062_v33, %v452_v47  ;;  %v581_v50 = vadd.f32 %v1062_v33, %v580_v48 }
  0xfe   :  { %659 = vst.msk [vmem:[%s1387_s3 + $0x98] sm:$0xff] %vm254_vm0, %v461_v45  ;;  %691 = vst.msk [vmem:[%s1387_s3 + $0x198] sm:$0xff] %vm254_vm0, %v589_v46 }
  0xff   :  { %657 = vst.msk [vmem:[%s1387_s3 + $0x88] sm:$0xff] %vm254_vm0, %v453_v49  ;;  %689 = vst.msk [vmem:[%s1387_s3 + $0x188] sm:$0xff] %vm254_vm0, %v581_v50 }
 0x101   :  { %v831_v51 = vpop.f32.mrb[20].mxu0  ;;  %v863_v52 = vpop.f32.mrb[20].mxu1 }
 0x102   :  { %v474_v53 = vadd.f32 %v831_v51, %v1062_v33  ;;  %v602_v54 = vadd.f32 %v863_v52, %v1062_v33  ;;  %v465_v55 = vpop.f32.mrb[21].mxu0  ;;  %v593_v56 = vpop.f32.mrb[21].mxu1 }
 0x103   :  { %v466_v57 = vadd.f32 %v1062_v33, %v465_v55  ;;  %v594_v58 = vadd.f32 %v1062_v33, %v593_v56  ;;  %v832_v59 = vpop.f32.mrb[22].mxu0  ;;  %v864_v60 = vpop.f32.mrb[22].mxu1 }
 0x104   :  { %662 = vst.msk [vmem:[%s1387_s3 + $0xb0] sm:$0xff] %vm254_vm0, %v474_v53  ;;  %694 = vst.msk [vmem:[%s1387_s3 + $0x1b0] sm:$0xff] %vm254_vm0, %v602_v54  ;;  %v477_v61 = vadd.f32 %v832_v59, %v1062_v33  ;;  %v605_v62 = vadd.f32 %v864_v60, %v1062_v33  ;;  %v468_v63 = vpop.f32.mrb[23].mxu0  ;;  %v596_v0 = vpop.f32.mrb[23].mxu1 }
 0x105   :  { %660 = vst.msk [vmem:[%s1387_s3 + $0xa0] sm:$0xff] %vm254_vm0, %v466_v57  ;;  %692 = vst.msk [vmem:[%s1387_s3 + $0x1a0] sm:$0xff] %vm254_vm0, %v594_v58  ;;  %v469_v1 = vadd.f32 %v1062_v33, %v468_v63  ;;  %v597_v2 = vadd.f32 %v1062_v33, %v596_v0 }
 0x106   :  { %663 = vst.msk [vmem:[%s1387_s3 + $0xb8] sm:$0xff] %vm254_vm0, %v477_v61  ;;  %695 = vst.msk [vmem:[%s1387_s3 + $0x1b8] sm:$0xff] %vm254_vm0, %v605_v62 }
 0x107   :  { %661 = vst.msk [vmem:[%s1387_s3 + $0xa8] sm:$0xff] %vm254_vm0, %v469_v1  ;;  %693 = vst.msk [vmem:[%s1387_s3 + $0x1a8] sm:$0xff] %vm254_vm0, %v597_v2 }
 0x109   :  { %v835_v3 = vpop.f32.mrb[24].mxu0  ;;  %v867_v4 = vpop.f32.mrb[24].mxu1 }
 0x10a   :  { %v490_v5 = vadd.f32 %v835_v3, %v1062_v33  ;;  %v618_v6 = vadd.f32 %v867_v4, %v1062_v33  ;;  %v481_v7 = vpop.f32.mrb[25].mxu0  ;;  %v609_v8 = vpop.f32.mrb[25].mxu1 }
 0x10b   :  { %v482_v9 = vadd.f32 %v1062_v33, %v481_v7  ;;  %v610_v10 = vadd.f32 %v1062_v33, %v609_v8  ;;  %v836_v11 = vpop.f32.mrb[26].mxu0  ;;  %v868_v12 = vpop.f32.mrb[26].mxu1 }
 0x10c   :  { %666 = vst.msk [vmem:[%s1387_s3 + $0xd0] sm:$0xff] %vm254_vm0, %v490_v5  ;;  %698 = vst.msk [vmem:[%s1387_s3 + $0x1d0] sm:$0xff] %vm254_vm0, %v618_v6  ;;  %v493_v13 = vadd.f32 %v836_v11, %v1062_v33  ;;  %v621_v14 = vadd.f32 %v868_v12, %v1062_v33  ;;  %v484_v15 = vpop.f32.mrb[27].mxu0  ;;  %v612_v16 = vpop.f32.mrb[27].mxu1 }
 0x10d   :  { %664 = vst.msk [vmem:[%s1387_s3 + $0xc0] sm:$0xff] %vm254_vm0, %v482_v9  ;;  %696 = vst.msk [vmem:[%s1387_s3 + $0x1c0] sm:$0xff] %vm254_vm0, %v610_v10  ;;  %v485_v17 = vadd.f32 %v1062_v33, %v484_v15  ;;  %v613_v18 = vadd.f32 %v1062_v33, %v612_v16 }
 0x10e   :  { %667 = vst.msk [vmem:[%s1387_s3 + $0xd8] sm:$0xff] %vm254_vm0, %v493_v13  ;;  %699 = vst.msk [vmem:[%s1387_s3 + $0x1d8] sm:$0xff] %vm254_vm0, %v621_v14 }
 0x10f   :  { %665 = vst.msk [vmem:[%s1387_s3 + $0xc8] sm:$0xff] %vm254_vm0, %v485_v17  ;;  %697 = vst.msk [vmem:[%s1387_s3 + $0x1c8] sm:$0xff] %vm254_vm0, %v613_v18 }
 0x111   :  { %v839_v19 = vpop.f32.mrb[28].mxu0  ;;  %v871_v20 = vpop.f32.mrb[28].mxu1 }
 0x112   :  { %v506_v21 = vadd.f32 %v839_v19, %v1062_v33  ;;  %v634_v22 = vadd.f32 %v871_v20, %v1062_v33  ;;  %v497_v23 = vpop.f32.mrb[29].mxu0  ;;  %v625_v24 = vpop.f32.mrb[29].mxu1 }
 0x113   :  { %v498_v25 = vadd.f32 %v1062_v33, %v497_v23  ;;  %v626_v26 = vadd.f32 %v1062_v33, %v625_v24  ;;  %v840_v27 = vpop.f32.mrb[30].mxu0  ;;  %v872_v28 = vpop.f32.mrb[30].mxu1 }
 0x114   :  { %670 = vst.msk [vmem:[%s1387_s3 + $0xf0] sm:$0xff] %vm254_vm0, %v506_v21  ;;  %702 = vst.msk [vmem:[%s1387_s3 + $0x1f0] sm:$0xff] %vm254_vm0, %v634_v22  ;;  %v509_v29 = vadd.f32 %v840_v27, %v1062_v33  ;;  %v637_v30 = vadd.f32 %v872_v28, %v1062_v33  ;;  %v500_v31 = vpop.f32.mrb[31].mxu0  ;;  %v628_v32 = vpop.f32.mrb[31].mxu1 }
 0x115   :  { %668 = vst.msk [vmem:[%s1387_s3 + $0xe0] sm:$0xff] %vm254_vm0, %v498_v25  ;;  %700 = vst.msk [vmem:[%s1387_s3 + $0x1e0] sm:$0xff] %vm254_vm0, %v626_v26  ;;  %v501_v34 = vadd.f32 %v1062_v33, %v500_v31  ;;  %v629_v35 = vadd.f32 %v1062_v33, %v628_v32 }
 0x116   :  { %671 = vst.msk [vmem:[%s1387_s3 + $0xf8] sm:$0xff] %vm254_vm0, %v509_v29  ;;  %703 = vst.msk [vmem:[%s1387_s3 + $0x1f8] sm:$0xff] %vm254_vm0, %v637_v30 }
 0x117   :  { %669 = vst.msk [vmem:[%s1387_s3 + $0xe8] sm:$0xff] %vm254_vm0, %v501_v34  ;;  %701 = vst.msk [vmem:[%s1387_s3 + $0x1e8] sm:$0xff] %vm254_vm0, %v629_v35 }

// kernel: vsa_window_attention_forward.4
= control target key start
LH: loop header
LB: loop body
LE: loop exit
PB: predicated region body
PF: predicated region fallthrough
CT: control target
= control target key end

     0   :  { %s6366_s15 = smov 0   ;;  %s7639_s0 = inlined_call_operand.vmem [shape: bf16[32,2,16,8], index: 0, kind: input, shape index: {}]   ;;  %s7640_s1 = inlined_call_operand.vmem [shape: bf16[32,2,16,8], index: 1, kind: input, shape index: {}]   ;;  %s7641_s2 = inlined_call_operand.vmem [shape: bf16[32,2,16,8], index: 2, kind: input, shape index: {}]   ;;  %s7642_s3 = inlined_call_operand.vmem [shape: f32[2,16,16], index: 3, kind: input, shape index: {}]   ;;  %s7643_s4 = inlined_call_operand.vmem [shape: bf16[32,2,16,8], index: 4, kind: output, shape index: {}]  }
   0x1 LB: > { %s5146_s16 = sadd.s32 4294967295, %s6337_s15   ;;  %p5150_p0 = scmp.ge.s32.totalorder %s6337_s15, 1  ;;  %s6337_s15 = sphi %s6366_s15, %s14_s15  }
   0x2   : > { %p188_p1 = scmp.lt.s32.totalorder %s6337_s15, 3 }
   0x4   : > { %p189_p2 = pnand %p5150_p0, %p188_p1 }
   0x6   : > { %192 = sbr.rel (%p189_p2) target bundleno = 905 (0x389), region = 36 }
   0xd   : > { %s5151_s17 = sshll.u32 %s5146_s16, 4  ;;  %v7644_v0 = vmov 0.0   ;;  %vm6340_vm0 = vmmov 0   ;;  %vm459_vm1 = vcmask 64512   ;;  %vm2406_vm2 = vcmask 130048  }
   0xe   : > { %5585 = vmatprep.subr.bf16.mxu0 %v7644_v0  ;;  %5591 = vmatprep.subr.bf16.mxu1 %v7644_v0  ;;  %p229_p3 = scmp.lt.s32.totalorder %s5151_s17, 31  ;;  %vm4999_vm3 = vcmask 60416  }
   0xf   : > { %5587 = vmatprep.mubr.msk.bf16.mxu0 %vm6340_vm0, %v7644_v0  ;;  %5593 = vmatprep.mubr.msk.bf16.mxu1 %vm6340_vm0, %v7644_v0 }
  0x10   : > { %s7741_s17 = smov (!%p229_p3, %s5151_s17), 31 }
  0x11   : > { %s6380_s18 = sshll.u32 %s7741_s17, 4 }
  0x12   : > { %s6386_s21 = scalar_lea.vmem %s7640_s1, %s6380_s18  ;;  %s6394_s24 = scalar_lea.vmem %s7639_s0, %s6380_s18 }
  0x13   : > { %v5979_v1 = vld [vmem:[%s6386_s21] sm:$0xff]   ;;  %v5980_v2 = vld [vmem:[%s6386_s21 + $0x8] sm:$0xff]   ;;  %v5983_v5 = vld [vmem:[%s6386_s21 + $0x10] sm:$0xff]   ;;  %s7047_s9 = scalar_lea.vmem %s7641_s2, %s6380_s18  ;;  %s7506_s12 = scalar_lea.vmem %s7643_s4, %s6380_s18 }
  0x14   : > { %v464_v3 = vsel %vm459_vm1, %v5979_v1, 0  ;;  %v521_v4 = vsel %vm459_vm1, %v5980_v2, 0  ;;  %v5984_v6 = vld [vmem:[%s6386_s21 + $0x18] sm:$0xff]   ;;  %v5981_v7 = vld [vmem:[%s6394_s24] sm:$0xff]   ;;  %v5982_v8 = vld [vmem:[%s6394_s24 + $0x8] sm:$0xff]   ;;  %v578_v9 = vsel %vm459_vm1, %v5983_v5, 0 }
  0x15   : > { %5586 = vmatpush3.bf16.xpose.msra.mxu0 %v464_v3  ;;  %5592 = vmatpush3.bf16.xpose.msra.mxu1 %v521_v4  ;;  %v635_v10 = vsel %vm459_vm1, %v5984_v6, 0  ;;  %v5986_v11 = vld [vmem:[%s6386_s21 + $0x20] sm:$0xff]   ;;  %v5988_v12 = vld [vmem:[%s6386_s21 + $0x28] sm:$0xff]   ;;  %v5985_v13 = vld [vmem:[%s6394_s24 + $0x10] sm:$0xff]  }
  0x16   : > { %5597 = vmatprep.subr.bf16.mxu0 %v7644_v0  ;;  %5603 = vmatprep.subr.bf16.mxu1 %v7644_v0  ;;  %v5987_v14 = vld [vmem:[%s6394_s24 + $0x18] sm:$0xff]   ;;  %v692_v15 = vsel %vm459_vm1, %v5986_v11, 0  ;;  %v749_v16 = vsel %vm459_vm1, %v5988_v12, 0  ;;  %v5990_v17 = vld [vmem:[%s6386_s21 + $0x30] sm:$0xff]   ;;  %v5989_v19 = vld [vmem:[%s6394_s24 + $0x20] sm:$0xff]  }
  0x17   : > { %v5992_v18 = vld [vmem:[%s6386_s21 + $0x38] sm:$0xff]   ;;  %v5991_v20 = vld [vmem:[%s6394_s24 + $0x28] sm:$0xff]   ;;  %v806_v21 = vsel %vm459_vm1, %v5990_v17, 0  ;;  %v5994_v23 = vld [vmem:[%s6386_s21 + $0x40] sm:$0xff]  }
  0x18   : > { %v863_v22 = vsel %vm459_vm1, %v5992_v18, 0  ;;  %v5996_v24 = vld [vmem:[%s6386_s21 + $0x48] sm:$0xff]   ;;  %v5993_v25 = vld [vmem:[%s6394_s24 + $0x30] sm:$0xff]   ;;  %v5995_v26 = vld [vmem:[%s6394_s24 + $0x38] sm:$0xff]   ;;  %v920_v27 = vsel %vm459_vm1, %v5994_v23, 0 }
  0x19   : > { %v977_v28 = vsel %vm459_vm1, %v5996_v24, 0  ;;  %v5998_v29 = vld [vmem:[%s6386_s21 + $0x50] sm:$0xff]   ;;  %v6000_v30 = vld [vmem:[%s6386_s21 + $0x58] sm:$0xff]   ;;  %v5997_v31 = vld [vmem:[%s6394_s24 + $0x40] sm:$0xff]  }
  0x1a   : > { %v5999_v32 = vld [vmem:[%s6394_s24 + $0x48] sm:$0xff]   ;;  %v1034_v33 = vsel %vm459_vm1, %v5998_v29, 0  ;;  %v1091_v34 = vsel %vm459_vm1, %v6000_v30, 0  ;;  %v6002_v35 = vld [vmem:[%s6386_s21 + $0x60] sm:$0xff]   ;;  %v6001_v37 = vld [vmem:[%s6394_s24 + $0x50] sm:$0xff]  }
  0x1b   : > { %v6004_v36 = vld [vmem:[%s6386_s21 + $0x68] sm:$0xff]   ;;  %v6003_v38 = vld [vmem:[%s6394_s24 + $0x58] sm:$0xff]   ;;  %v1148_v39 = vsel %vm459_vm1, %v6002_v35, 0  ;;  %v6006_v41 = vld [vmem:[%s6386_s21 + $0x70] sm:$0xff]  }
  0x1c   : > { %5588 = vmatmul.mubr.msk.bf16.vlgmr.msra.gmra.mrb[0].mxu0 %vm459_vm1, %v5981_v7  ;;  %5594 = vmatmul.mubr.msk.bf16.vlgmr.msra.gmra.mrb[0].mxu1 %vm459_vm1, %v5982_v8  ;;  %v1205_v40 = vsel %vm459_vm1, %v6004_v36, 0  ;;  %v6008_v42 = vld [vmem:[%s6386_s21 + $0x78] sm:$0xff]   ;;  %v6005_v43 = vld [vmem:[%s6394_s24 + $0x60] sm:$0xff]   ;;  %v6007_v44 = vld [vmem:[%s6394_s24 + $0x68] sm:$0xff]   ;;  %v1262_v45 = vsel %vm459_vm1, %v6006_v41, 0 }
  0x1d   : > { %5598 = vmatpush3.bf16.xpose.msra.mxu0 %v578_v9  ;;  %5604 = vmatpush3.bf16.xpose.msra.mxu1 %v635_v10  ;;  %v1319_v46 = vsel %vm459_vm1, %v6008_v42, 0  ;;  %v6010_v47 = vld [vmem:[%s6386_s21 + $0x80] sm:$0xff]   ;;  %v6012_v48 = vld [vmem:[%s6386_s21 + $0x88] sm:$0xff]   ;;  %v6009_v49 = vld [vmem:[%s6394_s24 + $0x70] sm:$0xff]  }
  0x1e   : > { %5599 = vmatprep.mubr.msk.bf16.mxu0 %vm6340_vm0, %v7644_v0  ;;  %5609 = vmatprep.subr.bf16.mxu0 %v7644_v0  ;;  %v6011_v50 = vld [vmem:[%s6394_s24 + $0x78] sm:$0xff]   ;;  %v1376_v51 = vsel %vm459_vm1, %v6010_v47, 0  ;;  %v1433_v52 = vsel %vm459_vm1, %v6012_v48, 0  ;;  %v6014_v53 = vld [vmem:[%s6386_s21 + $0x90] sm:$0xff]   ;;  %v6013_v55 = vld [vmem:[%s6394_s24 + $0x80] sm:$0xff]  }
  0x1f   : > { %5605 = vmatprep.mubr.msk.bf16.mxu1 %vm6340_vm0, %v7644_v0  ;;  %5615 = vmatprep.subr.bf16.mxu1 %v7644_v0  ;;  %v6016_v54 = vld [vmem:[%s6386_s21 + $0x98] sm:$0xff]   ;;  %v6015_v56 = vld [vmem:[%s6394_s24 + $0x88] sm:$0xff]   ;;  %v1490_v57 = vsel %vm459_vm1, %v6014_v53, 0  ;;  %v6018_v59 = vld [vmem:[%s6386_s21 + $0xa0] sm:$0xff]  }
  0x20   : > { %v1547_v58 = vsel %vm459_vm1, %v6016_v54, 0  ;;  %v6020_v60 = vld [vmem:[%s6386_s21 + $0xa8] sm:$0xff]   ;;  %v6017_v61 = vld [vmem:[%s6394_s24 + $0x90] sm:$0xff]   ;;  %v6019_v62 = vld [vmem:[%s6394_s24 + $0x98] sm:$0xff]   ;;  %v1604_v63 = vsel %vm459_vm1, %v6018_v59, 0 }
  0x21   : > { %v1661_v1 = vsel %vm459_vm1, %v6020_v60, 0  ;;  %v6022_v2 = vld [vmem:[%s6386_s21 + $0xb0] sm:$0xff]   ;;  %v6024_v3 = vld [vmem:[%s6386_s21 + $0xb8] sm:$0xff]   ;;  %v6021_v4 = vld [vmem:[%s6394_s24 + $0xa0] sm:$0xff]  }
  0x22   : > { %v6023_v5 = vld [vmem:[%s6394_s24 + $0xa8] sm:$0xff]   ;;  %v1718_v6 = vsel %vm459_vm1, %v6022_v2, 0  ;;  %v1775_v7 = vsel %vm459_vm1, %v6024_v3, 0  ;;  %v6026_v8 = vld [vmem:[%s6386_s21 + $0xc0] sm:$0xff]   ;;  %v6025_v10 = vld [vmem:[%s6394_s24 + $0xb0] sm:$0xff]  }
  0x23   : > { %v6028_v9 = vld [vmem:[%s6386_s21 + $0xc8] sm:$0xff]   ;;  %v6027_v11 = vld [vmem:[%s6394_s24 + $0xb8] sm:$0xff]   ;;  %v1832_v12 = vsel %vm459_vm1, %v6026_v8, 0  ;;  %v6621_v35 = vld [vmem:[%s7642_s3] sm:$0xff] }
  0x24   : > { %5600 = vmatmul.mubr.msk.bf16.vlgmr.msra.gmra.mrb[4].mxu0 %vm459_vm1, %v5985_v13  ;;  %5606 = vmatmul.mubr.msk.bf16.vlgmr.msra.gmra.mrb[4].mxu1 %vm459_vm1, %v5987_v14  ;;  %v1889_v13 = vsel %vm459_vm1, %v6028_v9, 0  ;;  %v6030_v14 = vld [vmem:[%s6386_s21 + $0xd0] sm:$0xff]   ;;  %v6031_v17 = vld [vmem:[%s6394_s24 + $0xc8] sm:$0xff]   ;;  %v6035_v23 = vld [vmem:[%s6394_s24 + $0xd8] sm:$0xff]  }
  0x25   : > { %5610 = vmatpush3.bf16.xpose.msra.mxu0 %v692_v15  ;;  %5616 = vmatpush3.bf16.xpose.msra.mxu1 %v749_v16  ;;  %v6032_v15 = vld [vmem:[%s6386_s21 + $0xd8] sm:$0xff]   ;;  %v6029_v16 = vld [vmem:[%s6394_s24 + $0xc0] sm:$0xff]   ;;  %v1946_v18 = vsel %vm459_vm1, %v6030_v14, 0  ;;  %v6039_v29 = vld [vmem:[%s6394_s24 + $0xe8] sm:$0xff]  }
  0x26   : > { %5611 = vmatprep.mubr.msk.bf16.mxu0 %vm6340_vm0, %v7644_v0  ;;  %5621 = vmatprep.subr.bf16.mxu0 %v7644_v0  ;;  %v6639_v48 = vld [vmem:[%s7642_s3 + $0x18] sm:$0xff] }
  0x27   : > { %5617 = vmatprep.mubr.msk.bf16.mxu1 %vm6340_vm0, %v7644_v0  ;;  %5627 = vmatprep.subr.bf16.mxu1 %v7644_v0 }
  0x2c   : > { %5612 = vmatmul.mubr.msk.bf16.vlgmr.msra.gmra.mrb[8].mxu0 %vm459_vm1, %v5989_v19  ;;  %5618 = vmatmul.mubr.msk.bf16.vlgmr.msra.gmra.mrb[8].mxu1 %vm459_vm1, %v5991_v20  ;;  %v2003_v19 = vsel %vm459_vm1, %v6032_v15, 0  ;;  %v6034_v20 = vld [vmem:[%s6386_s21 + $0xe0] sm:$0xff]  }
  0x2d   : > { %5622 = vmatpush3.bf16.xpose.msra.mxu0 %v806_v21  ;;  %5628 = vmatpush3.bf16.xpose.msra.mxu1 %v863_v22  ;;  %v6036_v21 = vld [vmem:[%s6386_s21 + $0xe8] sm:$0xff]   ;;  %v6033_v22 = vld [vmem:[%s6394_s24 + $0xd0] sm:$0xff]   ;;  %v2060_v24 = vsel %vm459_vm1, %v6034_v20, 0 }
  0x2e   : > { %5623 = vmatprep.mubr.msk.bf16.mxu0 %vm6340_vm0, %v7644_v0  ;;  %5633 = vmatprep.subr.bf16.mxu0 %v7644_v0 }
  0x2f   : > { %5629 = vmatprep.mubr.msk.bf16.mxu1 %vm6340_vm0, %v7644_v0  ;;  %5639 = vmatprep.subr.bf16.mxu1 %v7644_v0 }
  0x34   : > { %5624 = vmatmul.mubr.msk.bf16.vlgmr.msra.gmra.mrb[12].mxu0 %vm459_vm1, %v5993_v25  ;;  %5630 = vmatmul.mubr.msk.bf16.vlgmr.msra.gmra.mrb[12].mxu1 %vm459_vm1, %v5995_v26  ;;  %v2117_v25 = vsel %vm459_vm1, %v6036_v21, 0  ;;  %v6038_v26 = vld [vmem:[%s6386_s21 + $0xf0] sm:$0xff]  }
  0x35   : > { %5634 = vmatpush3.bf16.xpose.msra.mxu0 %v920_v27  ;;  %5640 = vmatpush3.bf16.xpose.msra.mxu1 %v977_v28  ;;  %v6040_v27 = vld [vmem:[%s6386_s21 + $0xf8] sm:$0xff]   ;;  %v6037_v28 = vld [vmem:[%s6394_s24 + $0xe0] sm:$0xff]   ;;  %v2174_v30 = vsel %vm459_vm1, %v6038_v26, 0 }
  0x36   : > { %5635 = vmatprep.mubr.msk.bf16.mxu0 %vm6340_vm0, %v7644_v0  ;;  %5645 = vmatprep.subr.bf16.mxu0 %v7644_v0 }
  0x37   : > { %5641 = vmatprep.mubr.msk.bf16.mxu1 %vm6340_vm0, %v7644_v0  ;;  %5651 = vmatprep.subr.bf16.mxu1 %v7644_v0 }
  0x3c   : > { %5636 = vmatmul.mubr.msk.bf16.vlgmr.msra.gmra.mrb[16].mxu0 %vm459_vm1, %v5997_v31  ;;  %5642 = vmatmul.mubr.msk.bf16.vlgmr.msra.gmra.mrb[16].mxu1 %vm459_vm1, %v5999_v32  ;;  %v2231_v31 = vsel %vm459_vm1, %v6040_v27, 0  ;;  %v6041_v32 = vld [vmem:[%s6394_s24 + $0xf0] sm:$0xff]  }
  0x3d   : > { %5646 = vmatpush3.bf16.xpose.msra.mxu0 %v1034_v33  ;;  %5652 = vmatpush3.bf16.xpose.msra.mxu1 %v1091_v34  ;;  %v6042_v33 = vld [vmem:[%s6394_s24 + $0xf8] sm:$0xff]  }
  0x3e   : > { %5647 = vmatprep.mubr.msk.bf16.mxu0 %vm6340_vm0, %v7644_v0  ;;  %5657 = vmatprep.subr.bf16.mxu0 %v7644_v0 }
  0x3f   : > { %5653 = vmatprep.mubr.msk.bf16.mxu1 %vm6340_vm0, %v7644_v0  ;;  %5663 = vmatprep.subr.bf16.mxu1 %v7644_v0 }
  0x44   : > { %5648 = vmatmul.mubr.msk.bf16.vlgmr.msra.gmra.mrb[20].mxu0 %vm459_vm1, %v6001_v37  ;;  %5654 = vmatmul.mubr.msk.bf16.vlgmr.msra.gmra.mrb[20].mxu1 %vm459_vm1, %v6003_v38 }
  0x45   : > { %5658 = vmatpush3.bf16.xpose.msra.mxu0 %v1148_v39  ;;  %5664 = vmatpush3.bf16.xpose.msra.mxu1 %v1205_v40  ;;  %v6626_v39 = vld [vmem:[%s7642_s3 + $0x10] sm:$0xff] }
  0x46   : > { %5659 = vmatprep.mubr.msk.bf16.mxu0 %vm6340_vm0, %v7644_v0  ;;  %5669 = vmatprep.subr.bf16.mxu0 %v7644_v0 }
  0x47   : > { %5665 = vmatprep.mubr.msk.bf16.mxu1 %vm6340_vm0, %v7644_v0  ;;  %5675 = vmatprep.subr.bf16.mxu1 %v7644_v0 }
  0x4c   : > { %5660 = vmatmul.mubr.msk.bf16.vlgmr.msra.gmra.mrb[24].mxu0 %vm459_vm1, %v6005_v43  ;;  %5666 = vmatmul.mubr.msk.bf16.vlgmr.msra.gmra.mrb[24].mxu1 %vm459_vm1, %v6007_v44  ;;  %v6631_v43 = vld [vmem:[%s7642_s3 + $0x8] sm:$0xff] }
  0x4d   : > { %5670 = vmatpush3.bf16.xpose.msra.mxu0 %v1262_v45  ;;  %5676 = vmatpush3.bf16.xpose.msra.mxu1 %v1319_v46 }
  0x4e   : > { %5671 = vmatprep.mubr.msk.bf16.mxu0 %vm6340_vm0, %v7644_v0  ;;  %5681 = vmatprep.subr.bf16.mxu0 %v7644_v0 }
  0x4f   : > { %5677 = vmatprep.mubr.msk.bf16.mxu1 %vm6340_vm0, %v7644_v0  ;;  %5687 = vmatprep.subr.bf16.mxu1 %v7644_v0 }
  0x54   : > { %5672 = vmatmul.mubr.msk.bf16.vlgmr.msra.gmra.mrb[28].mxu0 %vm459_vm1, %v6009_v49  ;;  %5678 = vmatmul.mubr.msk.bf16.vlgmr.msra.gmra.mrb[28].mxu1 %vm459_vm1, %v6011_v50 }
  0x55   : > { %5682 = vmatpush3.bf16.xpose.msra.mxu0 %v1376_v51  ;;  %5688 = vmatpush3.bf16.xpose.msra.mxu1 %v1433_v52 }
  0x56   : > { %5683 = vmatprep.mubr.msk.bf16.mxu0 %vm6340_vm0, %v7644_v0  ;;  %5693 = vmatprep.subr.bf16.mxu0 %v7644_v0 }
  0x57   : > { %5689 = vmatprep.mubr.msk.bf16.mxu1 %vm6340_vm0, %v7644_v0  ;;  %5699 = vmatprep.subr.bf16.mxu1 %v7644_v0 }
  0x5c   : > { %5684 = vmatmul.mubr.msk.bf16.vlgmr.msra.gmra.mrb[32].mxu0 %vm459_vm1, %v6013_v55  ;;  %5690 = vmatmul.mubr.msk.bf16.vlgmr.msra.gmra.mrb[32].mxu1 %vm459_vm1, %v6015_v56 }
  0x5d   : > { %5694 = vmatpush3.bf16.xpose.msra.mxu0 %v1490_v57  ;;  %5700 = vmatpush3.bf16.xpose.msra.mxu1 %v1547_v58 }
  0x5e   : > { %5695 = vmatprep.mubr.msk.bf16.mxu0 %vm6340_vm0, %v7644_v0  ;;  %5705 = vmatprep.subr.bf16.mxu0 %v7644_v0 }
  0x5f   : > { %5701 = vmatprep.mubr.msk.bf16.mxu1 %vm6340_vm0, %v7644_v0  ;;  %5711 = vmatprep.subr.bf16.mxu1 %v7644_v0 }
  0x64   : > { %5696 = vmatmul.mubr.msk.bf16.vlgmr.msra.gmra.mrb[36].mxu0 %vm459_vm1, %v6017_v61  ;;  %5702 = vmatmul.mubr.msk.bf16.vlgmr.msra.gmra.mrb[36].mxu1 %vm459_vm1, %v6019_v62 }
  0x65   : > { %5706 = vmatpush3.bf16.xpose.msra.mxu0 %v1604_v63  ;;  %5712 = vmatpush3.bf16.xpose.msra.mxu1 %v1661_v1 }
  0x66   : > { %5707 = vmatprep.mubr.msk.bf16.mxu0 %vm6340_vm0, %v7644_v0  ;;  %5717 = vmatprep.subr.bf16.mxu0 %v7644_v0 }
  0x67   : > { %5713 = vmatprep.mubr.msk.bf16.mxu1 %vm6340_vm0, %v7644_v0  ;;  %5723 = vmatprep.subr.bf16.mxu1 %v7644_v0 }
  0x6c   : > { %5708 = vmatmul.mubr.msk.bf16.vlgmr.msra.gmra.mrb[40].mxu0 %vm459_vm1, %v6021_v4  ;;  %5714 = vmatmul.mubr.msk.bf16.vlgmr.msra.gmra.mrb[40].mxu1 %vm459_vm1, %v6023_v5 }
  0x6d   : > { %5718 = vmatpush3.bf16.xpose.msra.mxu0 %v1718_v6  ;;  %5724 = vmatpush3.bf16.xpose.msra.mxu1 %v1775_v7 }
  0x6e   : > { %5719 = vmatprep.mubr.msk.bf16.mxu0 %vm6340_vm0, %v7644_v0  ;;  %5729 = vmatprep.subr.bf16.mxu0 %v7644_v0 }
  0x6f   : > { %5725 = vmatprep.mubr.msk.bf16.mxu1 %vm6340_vm0, %v7644_v0  ;;  %5735 = vmatprep.subr.bf16.mxu1 %v7644_v0 }
  0x74   : > { %5720 = vmatmul.mubr.msk.bf16.vlgmr.msra.gmra.mrb[44].mxu0 %vm459_vm1, %v6025_v10  ;;  %5726 = vmatmul.mubr.msk.bf16.vlgmr.msra.gmra.mrb[44].mxu1 %vm459_vm1, %v6027_v11 }
  0x75   : > { %5730 = vmatpush3.bf16.xpose.msra.mxu0 %v1832_v12  ;;  %5736 = vmatpush3.bf16.xpose.msra.mxu1 %v1889_v13 }
  0x76   : > { %5731 = vmatprep.mubr.msk.bf16.mxu0 %vm6340_vm0, %v7644_v0  ;;  %5741 = vmatprep.subr.bf16.mxu0 %v7644_v0 }
  0x77   : > { %5737 = vmatprep.mubr.msk.bf16.mxu1 %vm6340_vm0, %v7644_v0  ;;  %5747 = vmatprep.subr.bf16.mxu1 %v7644_v0 }
  0x7c   : > { %5732 = vmatmul.mubr.msk.bf16.vlgmr.msra.gmra.mrb[48].mxu0 %vm459_vm1, %v6029_v16  ;;  %5738 = vmatmul.mubr.msk.bf16.vlgmr.msra.gmra.mrb[48].mxu1 %vm459_vm1, %v6031_v17 }
  0x7d   : > { %5742 = vmatpush3.bf16.xpose.msra.mxu0 %v1946_v18  ;;  %5748 = vmatpush3.bf16.xpose.msra.mxu1 %v2003_v19 }
  0x7e   : > { %5743 = vmatprep.mubr.msk.bf16.mxu0 %vm6340_vm0, %v7644_v0  ;;  %5753 = vmatprep.subr.bf16.mxu0 %v7644_v0 }
  0x7f   : > { %5749 = vmatprep.mubr.msk.bf16.mxu1 %vm6340_vm0, %v7644_v0  ;;  %5759 = vmatprep.subr.bf16.mxu1 %v7644_v0 }
  0x84   : > { %5744 = vmatmul.mubr.msk.bf16.vlgmr.msra.gmra.mrb[52].mxu0 %vm459_vm1, %v6033_v22  ;;  %5750 = vmatmul.mubr.msk.bf16.vlgmr.msra.gmra.mrb[52].mxu1 %vm459_vm1, %v6035_v23 }
  0x85   : > { %5754 = vmatpush3.bf16.xpose.msra.mxu0 %v2060_v24  ;;  %5760 = vmatpush3.bf16.xpose.msra.mxu1 %v2117_v25 }
  0x86   : > { %5755 = vmatprep.mubr.msk.bf16.mxu0 %vm6340_vm0, %v7644_v0  ;;  %5765 = vmatprep.subr.bf16.mxu0 %v7644_v0 }
  0x87   : > { %5761 = vmatprep.mubr.msk.bf16.mxu1 %vm6340_vm0, %v7644_v0  ;;  %5771 = vmatprep.subr.bf16.mxu1 %v7644_v0 }
  0x8c   : > { %5756 = vmatmul.mubr.msk.bf16.vlgmr.msra.gmra.mrb[56].mxu0 %vm459_vm1, %v6037_v28  ;;  %5762 = vmatmul.mubr.msk.bf16.vlgmr.msra.gmra.mrb[56].mxu1 %vm459_vm1, %v6039_v29 }
  0x8d   : > { %5766 = vmatpush3.bf16.xpose.msra.mxu0 %v2174_v30  ;;  %5772 = vmatpush3.bf16.xpose.msra.mxu1 %v2231_v31 }
  0x8e   : > { %5767 = vmatprep.mubr.msk.bf16.mxu0 %vm6340_vm0, %v7644_v0  ;;  %5773 = vmatprep.mubr.msk.bf16.mxu1 %vm6340_vm0, %v7644_v0 }
  0x8f   : > { %5777 = vmatprep.subr.bf16.mxu0 %v7644_v0  ;;  %5783 = vmatprep.subr.bf16.mxu1 %v7644_v0 }
  0x94   : > { %5768 = vmatmul.mubr.msk.bf16.vlgmr.msra.gmra.mrb[60].mxu0 %vm459_vm1, %v6041_v32  ;;  %5774 = vmatmul.mubr.msk.bf16.vlgmr.msra.gmra.mrb[60].mxu1 %vm459_vm1, %v6042_v33 }
  0x95   : > { %5779 = vmatprep.mubr.msk.bf16.mxu0 %vm6340_vm0, %v7644_v0  ;;  %5785 = vmatprep.mubr.msk.bf16.mxu1 %vm6340_vm0, %v7644_v0 }
  0xef   : > { %v500_v34 = vpop.f32.mrb[0].mxu0  ;;  %v557_v37 = vpop.f32.mrb[0].mxu1 }
  0xf0   : > { %v2274_v36 = vmul.f32 0.35355338, %v500_v34  ;;  %v5589_v38 = vpop.f32.mrb[1].mxu0  ;;  %v2276_v40 = vmul.f32 0.35355338, %v557_v37  ;;  %v5595_v42 = vpop.f32.mrb[1].mxu1 }
  0xf1   : > { %v503_v41 = vpop.f32.mrb[2].mxu0  ;;  %v560_v46 = vpop.f32.mrb[2].mxu1 }
  0xf2   : > { %v2275_v44 = vmul.f32 0.35355338, %v503_v41  ;;  %v5590_v45 = vpop.f32.mrb[3].mxu0  ;;  %v6634_v47 = vadd.f32 %v6621_v35, %v2274_v36  ;;  %v2277_v49 = vmul.f32 0.35355338, %v560_v46  ;;  %v5596_v50 = vpop.f32.mrb[3].mxu1  ;;  %v6642_v51 = vadd.f32 %v6626_v39, %v2276_v40 }
  0xf4   : > { %v2407_v52 = vsel %vm2406_vm2, %v6634_v47, -inf  ;;  %v6647_v53 = vadd.f32 %v6631_v43, %v2275_v44  ;;  %v2413_v54 = vsel %vm2406_vm2, %v6642_v51, -inf  ;;  %v6652_v55 = vadd.f32 %v6639_v48, %v2277_v49 }
  0xf5   : > { %2408 = vmax.xlane.f32.xlu0 %v2407_v52  ;;  %2414 = vmax.xlane.f32.xlu1 %v2413_v54 }
  0xf6   : > { %v2416_v57 = vsel %vm2406_vm2, %v6652_v55, -inf  ;;  %v2410_v60 = vsel %vm2406_vm2, %v6647_v53, -inf }
  0xf7   : > { %v614_v56 = vpop.f32.mrb[4].mxu0  ;;  %v671_v61 = vpop.f32.mrb[4].mxu1 }
  0xf8   : > { %v2278_v58 = vmul.f32 0.35355338, %v614_v56  ;;  %v5601_v59 = vpop.f32.mrb[5].mxu0  ;;  %v2280_v63 = vmul.f32 0.35355338, %v671_v61  ;;  %v5607_v1 = vpop.f32.mrb[5].mxu1 }
  0xf9   : > { %2411 = vmax.xlane.f32.xlu0 %v2410_v60  ;;  %v617_v62 = vpop.f32.mrb[6].mxu0  ;;  %2417 = vmax.xlane.f32.xlu1 %v2416_v57  ;;  %v674_v4 = vpop.f32.mrb[6].mxu1 }
  0xfa   : > { %v2279_v2 = vmul.f32 0.35355338, %v617_v62  ;;  %v5602_v3 = vpop.f32.mrb[7].mxu0  ;;  %v6659_v5 = vadd.f32 %v6621_v35, %v2278_v58  ;;  %v2281_v6 = vmul.f32 0.35355338, %v674_v4  ;;  %v5608_v7 = vpop.f32.mrb[7].mxu1  ;;  %v6662_v8 = vadd.f32 %v6626_v39, %v2280_v63 }
  0xfc   : > { %v2419_v9 = vsel %vm2406_vm2, %v6659_v5, -inf  ;;  %v6667_v10 = vadd.f32 %v6631_v43, %v2279_v2  ;;  %v6670_v11 = vadd.f32 %v6639_v48, %v2281_v6  ;;  %v2425_v13 = vsel %vm2406_vm2, %v6662_v8, -inf }
  0xfd   : > { %2420 = vmax.xlane.f32.xlu0 %v2419_v9 }
  0xfe   : > { %v2422_v12 = vsel %vm2406_vm2, %v6667_v10, -inf  ;;  %v2428_v18 = vsel %vm2406_vm2, %v6670_v11, -inf }
  0xff   : > { %2423 = vmax.xlane.f32.xlu1 %v2422_v12  ;;  %v728_v14 = vpop.f32.mrb[8].mxu0  ;;  %v785_v17 = vpop.f32.mrb[8].mxu1 }
 0x100   : > { %v2282_v15 = vmul.f32 0.35355338, %v728_v14  ;;  %v5613_v16 = vpop.f32.mrb[9].mxu0  ;;  %v2284_v20 = vmul.f32 0.35355338, %v785_v17  ;;  %v5619_v21 = vpop.f32.mrb[9].mxu1 }
 0x101   : > { %2426 = vmax.xlane.f32.xlu0 %v2425_v13  ;;  %v731_v19 = vpop.f32.mrb[10].mxu0  ;;  %v788_v24 = vpop.f32.mrb[10].mxu1 }
 0x102   : > { %v2283_v22 = vmul.f32 0.35355338, %v731_v19  ;;  %v5614_v23 = vpop.f32.mrb[11].mxu0  ;;  %v6679_v25 = vadd.f32 %v6621_v35, %v2282_v15  ;;  %v2285_v26 = vmul.f32 0.35355338, %v788_v24  ;;  %v5620_v27 = vpop.f32.mrb[11].mxu1  ;;  %v6682_v28 = vadd.f32 %v6626_v39, %v2284_v20 }
 0x103   : > { %2429 = vmax.xlane.f32.xlu1 %v2428_v18 }
 0x104   : > { %v2431_v29 = vsel %vm2406_vm2, %v6679_v25, -inf  ;;  %v6687_v30 = vadd.f32 %v6631_v43, %v2283_v22  ;;  %v6690_v31 = vadd.f32 %v6639_v48, %v2285_v26  ;;  %v2437_v33 = vsel %vm2406_vm2, %v6682_v28, -inf }
 0x105   : > { %2432 = vmax.xlane.f32.xlu0 %v2431_v29 }
 0x106   : > { %v2434_v32 = vsel %vm2406_vm2, %v6687_v30, -inf  ;;  %v2440_v40 = vsel %vm2406_vm2, %v6690_v31, -inf }
 0x107   : > { %2435 = vmax.xlane.f32.xlu1 %v2434_v32  ;;  %v842_v34 = vpop.f32.mrb[12].mxu0  ;;  %v899_v38 = vpop.f32.mrb[12].mxu1 }
 0x108   : > { %v2286_v36 = vmul.f32 0.35355338, %v842_v34  ;;  %v5625_v37 = vpop.f32.mrb[13].mxu0  ;;  %v2288_v42 = vmul.f32 0.35355338, %v899_v38  ;;  %v5631_v44 = vpop.f32.mrb[13].mxu1 }
 0x109   : > { %2438 = vmax.xlane.f32.xlu0 %v2437_v33  ;;  %v845_v41 = vpop.f32.mrb[14].mxu0  ;;  %v902_v49 = vpop.f32.mrb[14].mxu1 }
 0x10a   : > { %v2287_v45 = vmul.f32 0.35355338, %v845_v41  ;;  %v5626_v46 = vpop.f32.mrb[15].mxu0  ;;  %v6699_v50 = vadd.f32 %v6621_v35, %v2286_v36  ;;  %v2289_v52 = vmul.f32 0.35355338, %v902_v49  ;;  %v5632_v54 = vpop.f32.mrb[15].mxu1  ;;  %v6702_v56 = vadd.f32 %v6626_v39, %v2288_v42 }
 0x10b   : > { %2441 = vmax.xlane.f32.xlu1 %v2440_v40 }
 0x10c   : > { %v2443_v57 = vsel %vm2406_vm2, %v6699_v50, -inf  ;;  %v6707_v58 = vadd.f32 %v6631_v43, %v2287_v45  ;;  %v6710_v59 = vadd.f32 %v6639_v48, %v2289_v52  ;;  %v2449_v61 = vsel %vm2406_vm2, %v6702_v56, -inf }
 0x10d   : > { %2444 = vmax.xlane.f32.xlu0 %v2443_v57 }
 0x10e   : > { %v2446_v60 = vsel %vm2406_vm2, %v6707_v58, -inf  ;;  %v2452_v3 = vsel %vm2406_vm2, %v6710_v59, -inf }
 0x10f   : > { %2447 = vmax.xlane.f32.xlu1 %v2446_v60  ;;  %v956_v62 = vpop.f32.mrb[16].mxu0  ;;  %v1013_v2 = vpop.f32.mrb[16].mxu1 }
 0x110   : > { %v2290_v63 = vmul.f32 0.35355338, %v956_v62  ;;  %v5637_v1 = vpop.f32.mrb[17].mxu0  ;;  %v2292_v6 = vmul.f32 0.35355338, %v1013_v2  ;;  %v5643_v7 = vpop.f32.mrb[17].mxu1 }
 0x111   : > { %2450 = vmax.xlane.f32.xlu0 %v2449_v61  ;;  %v959_v4 = vpop.f32.mrb[18].mxu0  ;;  %v1016_v13 = vpop.f32.mrb[18].mxu1 }
 0x112   : > { %v2291_v9 = vmul.f32 0.35355338, %v959_v4  ;;  %v5638_v12 = vpop.f32.mrb[19].mxu0  ;;  %v6719_v14 = vadd.f32 %v6621_v35, %v2290_v63  ;;  %v2293_v15 = vmul.f32 0.35355338, %v1016_v13  ;;  %v5644_v16 = vpop.f32.mrb[19].mxu1  ;;  %v6722_v17 = vadd.f32 %v6626_v39, %v2292_v6 }
 0x113   : > { %2453 = vmax.xlane.f32.xlu1 %v2452_v3 }
 0x114   : > { %v2455_v18 = vsel %vm2406_vm2, %v6719_v14, -inf  ;;  %v6727_v19 = vadd.f32 %v6631_v43, %v2291_v9  ;;  %v6730_v20 = vadd.f32 %v6639_v48, %v2293_v15  ;;  %v2461_v22 = vsel %vm2406_vm2, %v6722_v17, -inf }
 0x115   : > { %2456 = vmax.xlane.f32.xlu0 %v2455_v18 }
 0x116   : > { %v2458_v21 = vsel %vm2406_vm2, %v6727_v19, -inf  ;;  %v2464_v29 = vsel %vm2406_vm2, %v6730_v20, -inf }
 0x117   : > { %2459 = vmax.xlane.f32.xlu1 %v2458_v21  ;;  %v1070_v23 = vpop.f32.mrb[20].mxu0  ;;  %v1127_v27 = vpop.f32.mrb[20].mxu1 }
 0x118   : > { %v2294_v24 = vmul.f32 0.35355338, %v1070_v23  ;;  %v5649_v26 = vpop.f32.mrb[21].mxu0  ;;  %v2296_v33 = vmul.f32 0.35355338, %v1127_v27  ;;  %v5655_v34 = vpop.f32.mrb[21].mxu1 }
 0x119   : > { %2462 = vmax.xlane.f32.xlu0 %v2461_v22  ;;  %v1073_v32 = vpop.f32.mrb[22].mxu0  ;;  %v1130_v38 = vpop.f32.mrb[22].mxu1 }
 0x11a   : > { %v2295_v36 = vmul.f32 0.35355338, %v1073_v32  ;;  %v5650_v37 = vpop.f32.mrb[23].mxu0  ;;  %v6739_v40 = vadd.f32 %v6621_v35, %v2294_v24  ;;  %v2297_v41 = vmul.f32 0.35355338, %v1130_v38  ;;  %v5656_v42 = vpop.f32.mrb[23].mxu1  ;;  %v6742_v44 = vadd.f32 %v6626_v39, %v2296_v33 }
 0x11b   : > { %2465 = vmax.xlane.f32.xlu1 %v2464_v29 }
 0x11c   : > { %v2467_v45 = vsel %vm2406_vm2, %v6739_v40, -inf  ;;  %v6747_v46 = vadd.f32 %v6631_v43, %v2295_v36  ;;  %v6750_v49 = vadd.f32 %v6639_v48, %v2297_v41  ;;  %v2473_v54 = vsel %vm2406_vm2, %v6742_v44, -inf }
 0x11d   : > { %2468 = vmax.xlane.f32.xlu0 %v2467_v45 }
 0x11e   : > { %v2470_v52 = vsel %vm2406_vm2, %v6747_v46, -inf  ;;  %v2476_v63 = vsel %vm2406_vm2, %v6750_v49, -inf }
 0x11f   : > { %2471 = vmax.xlane.f32.xlu1 %v2470_v52  ;;  %v1184_v57 = vpop.f32.mrb[24].mxu0  ;;  %v1241_v62 = vpop.f32.mrb[24].mxu1 }
 0x120   : > { %v2298_v60 = vmul.f32 0.35355338, %v1184_v57  ;;  %v5661_v61 = vpop.f32.mrb[25].mxu0  ;;  %v2300_v2 = vmul.f32 0.35355338, %v1241_v62  ;;  %v5667_v3 = vpop.f32.mrb[25].mxu1 }
 0x121   : > { %2474 = vmax.xlane.f32.xlu0 %v2473_v54  ;;  %v1187_v1 = vpop.f32.mrb[26].mxu0  ;;  %v1244_v7 = vpop.f32.mrb[26].mxu1 }
 0x122   : > { %v2299_v4 = vmul.f32 0.35355338, %v1187_v1  ;;  %v5662_v6 = vpop.f32.mrb[27].mxu0  ;;  %v6759_v9 = vadd.f32 %v6621_v35, %v2298_v60  ;;  %v2301_v12 = vmul.f32 0.35355338, %v1244_v7  ;;  %v5668_v13 = vpop.f32.mrb[27].mxu1  ;;  %v6762_v15 = vadd.f32 %v6626_v39, %v2300_v2 }
 0x123   : > { %2477 = vmax.xlane.f32.xlu1 %v2476_v63 }
 0x124   : > { %v2479_v16 = vsel %vm2406_vm2, %v6759_v9, -inf  ;;  %v6767_v18 = vadd.f32 %v6631_v43, %v2299_v4  ;;  %v6770_v21 = vadd.f32 %v6639_v48, %v2301_v12  ;;  %v2485_v23 = vsel %vm2406_vm2, %v6762_v15, -inf }
 0x125   : > { %2480 = vmax.xlane.f32.xlu0 %v2479_v16 }
 0x126   : > { %v2482_v22 = vsel %vm2406_vm2, %v6767_v18, -inf  ;;  %v2488_v32 = vsel %vm2406_vm2, %v6770_v21, -inf }
 0x127   : > { %2483 = vmax.xlane.f32.xlu1 %v2482_v22  ;;  %v1298_v24 = vpop.f32.mrb[28].mxu0  ;;  %v1355_v29 = vpop.f32.mrb[28].mxu1 }
 0x128   : > { %v2302_v26 = vmul.f32 0.35355338, %v1298_v24  ;;  %v5673_v27 = vpop.f32.mrb[29].mxu0  ;;  %v2304_v34 = vmul.f32 0.35355338, %v1355_v29  ;;  %v5679_v36 = vpop.f32.mrb[29].mxu1 }
 0x129   : > { %2486 = vmax.xlane.f32.xlu0 %v2485_v23  ;;  %v1301_v33 = vpop.f32.mrb[30].mxu0  ;;  %v1358_v41 = vpop.f32.mrb[30].mxu1 }
 0x12a   : > { %v2303_v37 = vmul.f32 0.35355338, %v1301_v33  ;;  %v5674_v38 = vpop.f32.mrb[31].mxu0  ;;  %v6779_v42 = vadd.f32 %v6621_v35, %v2302_v26  ;;  %v2305_v45 = vmul.f32 0.35355338, %v1358_v41  ;;  %v5680_v52 = vpop.f32.mrb[31].mxu1  ;;  %v6782_v54 = vadd.f32 %v6626_v39, %v2304_v34 }
 0x12b   : > { %2489 = vmax.xlane.f32.xlu1 %v2488_v32 }
 0x12c   : > { %v2491_v57 = vsel %vm2406_vm2, %v6779_v42, -inf  ;;  %v6787_v60 = vadd.f32 %v6631_v43, %v2303_v37  ;;  %v6790_v61 = vadd.f32 %v6639_v48, %v2305_v45  ;;  %v2497_v63 = vsel %vm2406_vm2, %v6782_v54, -inf }
 0x12d   : > { %2492 = vmax.xlane.f32.xlu0 %v2491_v57 }
 0x12e   : > { %v2494_v62 = vsel %vm2406_vm2, %v6787_v60, -inf  ;;  %v2500_v6 = vsel %vm2406_vm2, %v6790_v61, -inf }
 0x12f   : > { %2495 = vmax.xlane.f32.xlu1 %v2494_v62  ;;  %v1412_v1 = vpop.f32.mrb[32].mxu0  ;;  %v1469_v4 = vpop.f32.mrb[32].mxu1 }
 0x130   : > { %v2306_v2 = vmul.f32 0.35355338, %v1412_v1  ;;  %v5685_v3 = vpop.f32.mrb[33].mxu0  ;;  %v2308_v12 = vmul.f32 0.35355338, %v1469_v4  ;;  %v5691_v13 = vpop.f32.mrb[33].mxu1 }
 0x131   : > { %2498 = vmax.xlane.f32.xlu0 %v2497_v63  ;;  %v1415_v7 = vpop.f32.mrb[34].mxu0  ;;  %v1472_v23 = vpop.f32.mrb[34].mxu1 }
 0x132   : > { %v2307_v16 = vmul.f32 0.35355338, %v1415_v7  ;;  %v5686_v22 = vpop.f32.mrb[35].mxu0  ;;  %v6799_v24 = vadd.f32 %v6621_v35, %v2306_v2  ;;  %v2309_v26 = vmul.f32 0.35355338, %v1472_v23  ;;  %v5692_v27 = vpop.f32.mrb[35].mxu1  ;;  %v6802_v29 = vadd.f32 %v6626_v39, %v2308_v12 }
 0x133   : > { %2501 = vmax.xlane.f32.xlu1 %v2500_v6 }
 0x134   : > { %v2503_v32 = vsel %vm2406_vm2, %v6799_v24, -inf  ;;  %v6807_v33 = vadd.f32 %v6631_v43, %v2307_v16  ;;  %v6810_v34 = vadd.f32 %v6639_v48, %v2309_v26  ;;  %v2509_v37 = vsel %vm2406_vm2, %v6802_v29, -inf }
 0x135   : > { %2504 = vmax.xlane.f32.xlu0 %v2503_v32 }
 0x136   : > { %v2506_v36 = vsel %vm2406_vm2, %v6807_v33, -inf  ;;  %v2512_v57 = vsel %vm2406_vm2, %v6810_v34, -inf }
 0x137   : > { %2507 = vmax.xlane.f32.xlu1 %v2506_v36  ;;  %v1526_v38 = vpop.f32.mrb[36].mxu0  ;;  %v1583_v52 = vpop.f32.mrb[36].mxu1 }
 0x138   : > { %v2310_v41 = vmul.f32 0.35355338, %v1526_v38  ;;  %v5697_v45 = vpop.f32.mrb[37].mxu0  ;;  %v2312_v63 = vmul.f32 0.35355338, %v1583_v52  ;;  %v5703_v1 = vpop.f32.mrb[37].mxu1 }
 0x139   : > { %2510 = vmax.xlane.f32.xlu0 %v2509_v37  ;;  %v1529_v62 = vpop.f32.mrb[38].mxu0  ;;  %v1586_v4 = vpop.f32.mrb[38].mxu1 }
 0x13a   : > { %v2311_v2 = vmul.f32 0.35355338, %v1529_v62  ;;  %v5698_v3 = vpop.f32.mrb[39].mxu0  ;;  %v6819_v6 = vadd.f32 %v6621_v35, %v2310_v41  ;;  %v2313_v7 = vmul.f32 0.35355338, %v1586_v4  ;;  %v5704_v12 = vpop.f32.mrb[39].mxu1  ;;  %v6822_v13 = vadd.f32 %v6626_v39, %v2312_v63 }
 0x13b   : > { %2513 = vmax.xlane.f32.xlu1 %v2512_v57 }
 0x13c   : > { %v2515_v16 = vsel %vm2406_vm2, %v6819_v6, -inf  ;;  %v6827_v22 = vadd.f32 %v6631_v43, %v2311_v2  ;;  %v6830_v23 = vadd.f32 %v6639_v48, %v2313_v7  ;;  %v2521_v27 = vsel %vm2406_vm2, %v6822_v13, -inf }
 0x13d   : > { %2516 = vmax.xlane.f32.xlu0 %v2515_v16 }
 0x13e   : > { %v2518_v26 = vsel %vm2406_vm2, %v6827_v22, -inf  ;;  %v2524_v41 = vsel %vm2406_vm2, %v6830_v23, -inf }
 0x13f   : > { %2519 = vmax.xlane.f32.xlu1 %v2518_v26  ;;  %v1640_v32 = vpop.f32.mrb[40].mxu0  ;;  %v1697_v38 = vpop.f32.mrb[40].mxu1 }
 0x140   : > { %v2314_v36 = vmul.f32 0.35355338, %v1640_v32  ;;  %v5709_v37 = vpop.f32.mrb[41].mxu0  ;;  %v2316_v52 = vmul.f32 0.35355338, %v1697_v38  ;;  %v5715_v57 = vpop.f32.mrb[41].mxu1 }
 0x141   : > { %2522 = vmax.xlane.f32.xlu0 %v2521_v27  ;;  %v1643_v45 = vpop.f32.mrb[42].mxu0  ;;  %v1700_v1 = vpop.f32.mrb[42].mxu1 }
 0x142   : > { %v2315_v62 = vmul.f32 0.35355338, %v1643_v45  ;;  %v5710_v63 = vpop.f32.mrb[43].mxu0  ;;  %v6839_v2 = vadd.f32 %v6621_v35, %v2314_v36  ;;  %v2317_v3 = vmul.f32 0.35355338, %v1700_v1  ;;  %v5716_v4 = vpop.f32.mrb[43].mxu1  ;;  %v6842_v7 = vadd.f32 %v6626_v39, %v2316_v52 }
 0x143   : > { %2525 = vmax.xlane.f32.xlu1 %v2524_v41 }
 0x144   : > { %v2527_v12 = vsel %vm2406_vm2, %v6839_v2, -inf  ;;  %v6847_v16 = vadd.f32 %v6631_v43, %v2315_v62  ;;  %v6850_v26 = vadd.f32 %v6639_v48, %v2317_v3  ;;  %v2533_v32 = vsel %vm2406_vm2, %v6842_v7, -inf }
 0x145   : > { %2528 = vmax.xlane.f32.xlu0 %v2527_v12 }
 0x146   : > { %v2530_v27 = vsel %vm2406_vm2, %v6847_v16, -inf  ;;  %v2536_v45 = vsel %vm2406_vm2, %v6850_v26, -inf }
 0x147   : > { %2531 = vmax.xlane.f32.xlu1 %v2530_v27  ;;  %v1754_v36 = vpop.f32.mrb[44].mxu0  ;;  %v1811_v41 = vpop.f32.mrb[44].mxu1 }
 0x148   : > { %v2318_v37 = vmul.f32 0.35355338, %v1754_v36  ;;  %v5721_v38 = vpop.f32.mrb[45].mxu0  ;;  %v2320_v57 = vmul.f32 0.35355338, %v1811_v41  ;;  %v5727_v62 = vpop.f32.mrb[45].mxu1 }
 0x149   : > { %2534 = vmax.xlane.f32.xlu0 %v2533_v32  ;;  %v1757_v52 = vpop.f32.mrb[46].mxu0  ;;  %v1814_v3 = vpop.f32.mrb[46].mxu1 }
 0x14a   : > { %v2319_v63 = vmul.f32 0.35355338, %v1757_v52  ;;  %v5722_v1 = vpop.f32.mrb[47].mxu0  ;;  %v6859_v4 = vadd.f32 %v6621_v35, %v2318_v37  ;;  %v2321_v12 = vmul.f32 0.35355338, %v1814_v3  ;;  %v5728_v27 = vpop.f32.mrb[47].mxu1  ;;  %v6862_v36 = vadd.f32 %v6626_v39, %v2320_v57 }
 0x14b   : > { %2537 = vmax.xlane.f32.xlu1 %v2536_v45 }
 0x14c   : > { %7677 = vst [vmem:[#allocation2_spill] sm:$0xff] %v6859_v4  ;;  %7678 = vst [vmem:[#allocation3_spill] sm:$0xff] %v6862_v36  ;;  %v2539_v38 = vsel %vm2406_vm2, %v6859_v4, -inf  ;;  %v6867_v32 = vadd.f32 %v6631_v43, %v2319_v63  ;;  %v6870_v41 = vadd.f32 %v6639_v48, %v2321_v12  ;;  %v2545_v45 = vsel %vm2406_vm2, %v6862_v36, -inf }
 0x14d   : > { %2540 = vmax.xlane.f32.xlu0 %v2539_v38 }
 0x14e   : > { %7679 = vst [vmem:[#allocation4_spill] sm:$0xff] %v6867_v32  ;;  %7680 = vst [vmem:[#allocation5_spill] sm:$0xff] %v6870_v41  ;;  %v2542_v37 = vsel %vm2406_vm2, %v6867_v32, -inf  ;;  %v2548_v3 = vsel %vm2406_vm2, %v6870_v41, -inf }
 0x14f   : > { %2543 = vmax.xlane.f32.xlu1 %v2542_v37  ;;  %v1868_v52 = vpop.f32.mrb[48].mxu0  ;;  %v1925_v1 = vpop.f32.mrb[48].mxu1 }
 0x150   : > { %v2322_v57 = vmul.f32 0.35355338, %v1868_v52  ;;  %v5733_v62 = vpop.f32.mrb[49].mxu0  ;;  %v2324_v27 = vmul.f32 0.35355338, %v1925_v1  ;;  %v5739_v38 = vpop.f32.mrb[49].mxu1 }
 0x151   : > { %2546 = vmax.xlane.f32.xlu0 %v2545_v45  ;;  %v1871_v63 = vpop.f32.mrb[50].mxu0  ;;  %v1928_v4 = vpop.f32.mrb[50].mxu1 }
 0x152   : > { %v2323_v12 = vmul.f32 0.35355338, %v1871_v63  ;;  %v5734_v0 = vpop.f32.mrb[51].mxu0  ;;  %v6879_v32 = vadd.f32 %v6621_v35, %v2322_v57  ;;  %v2325_v36 = vmul.f32 0.35355338, %v1928_v4  ;;  %v5740_v37 = vpop.f32.mrb[51].mxu1  ;;  %v6882_v52 = vadd.f32 %v6626_v39, %v2324_v27 }
 0x153   : > { %2549 = vmax.xlane.f32.xlu1 %v2548_v3 }
 0x154   : > { %7681 = vst [vmem:[#allocation6_spill] sm:$0xff] %v6879_v32  ;;  %7682 = vst [vmem:[#allocation7_spill] sm:$0xff] %v6882_v52  ;;  %v2551_v62 = vsel %vm2406_vm2, %v6879_v32, -inf  ;;  %v6887_v45 = vadd.f32 %v6631_v43, %v2323_v12  ;;  %v6890_v1 = vadd.f32 %v6639_v48, %v2325_v36  ;;  %v2557_v4 = vsel %vm2406_vm2, %v6882_v52, -inf }
 0x155   : > { %2552 = vmax.xlane.f32.xlu0 %v2551_v62 }
 0x156   : > { %7683 = vst [vmem:[#allocation8_spill] sm:$0xff] %v6887_v45  ;;  %7684 = vst [vmem:[#allocation9_spill] sm:$0xff] %v6890_v1  ;;  %v2554_v0 = vsel %vm2406_vm2, %v6887_v45, -inf  ;;  %v2560_v38 = vsel %vm2406_vm2, %v6890_v1, -inf }
 0x157   : > { %2555 = vmax.xlane.f32.xlu1 %v2554_v0  ;;  %v1982_v57 = vpop.f32.mrb[52].mxu0  ;;  %v2039_v27 = vpop.f32.mrb[52].mxu1 }
 0x158   : > { %v2326_v3 = vmul.f32 0.35355338, %v1982_v57  ;;  %v5745_v63 = vpop.f32.mrb[53].mxu0  ;;  %v2328_v37 = vmul.f32 0.35355338, %v2039_v27  ;;  %v5751_v62 = vpop.f32.mrb[53].mxu1 }
 0x159   : > { %2558 = vmax.xlane.f32.xlu0 %v2557_v4  ;;  %v1985_v12 = vpop.f32.mrb[54].mxu0  ;;  %v2042_v41 = vpop.f32.mrb[54].mxu1 }
 0x15a   : > { %v2327_v36 = vmul.f32 0.35355338, %v1985_v12  ;;  %v5746_v32 = vpop.f32.mrb[55].mxu0  ;;  %v6899_v45 = vadd.f32 %v6621_v35, %v2326_v3  ;;  %v2329_v52 = vmul.f32 0.35355338, %v2042_v41  ;;  %v5752_v0 = vpop.f32.mrb[55].mxu1  ;;  %v6902_v57 = vadd.f32 %v6626_v39, %v2328_v37 }
 0x15b   : > { %2561 = vmax.xlane.f32.xlu1 %v2560_v38 }
 0x15c   : > { %7685 = vst [vmem:[#allocation10_spill] sm:$0xff] %v6899_v45  ;;  %7686 = vst [vmem:[#allocation11_spill] sm:$0xff] %v6902_v57  ;;  %v2563_v63 = vsel %vm2406_vm2, %v6899_v45, -inf  ;;  %v6907_v4 = vadd.f32 %v6631_v43, %v2327_v36  ;;  %v6910_v27 = vadd.f32 %v6639_v48, %v2329_v52  ;;  %v2569_v41 = vsel %vm2406_vm2, %v6902_v57, -inf }
 0x15d   : > { %2564 = vmax.xlane.f32.xlu0 %v2563_v63 }
 0x15e   : > { %7687 = vst [vmem:[#allocation12_spill] sm:$0xff] %v6907_v4  ;;  %7688 = vst [vmem:[#allocation13_spill] sm:$0xff] %v6910_v27  ;;  %v2566_v32 = vsel %vm2406_vm2, %v6907_v4, -inf  ;;  %v2572_v62 = vsel %vm2406_vm2, %v6910_v27, -inf }
 0x15f   : > { %2567 = vmax.xlane.f32.xlu1 %v2566_v32  ;;  %v2096_v3 = vpop.f32.mrb[56].mxu0  ;;  %v2153_v37 = vpop.f32.mrb[56].mxu1 }
 0x160   : > { %v2330_v38 = vmul.f32 0.35355338, %v2096_v3  ;;  %v5757_v12 = vpop.f32.mrb[57].mxu0  ;;  %v2332_v0 = vmul.f32 0.35355338, %v2153_v37  ;;  %v5763_v63 = vpop.f32.mrb[57].mxu1 }
 0x161   : > { %2570 = vmax.xlane.f32.xlu0 %v2569_v41  ;;  %v2099_v36 = vpop.f32.mrb[58].mxu0  ;;  %v2156_v1 = vpop.f32.mrb[58].mxu1 }
 0x162   : > { %v2331_v52 = vmul.f32 0.35355338, %v2099_v36  ;;  %v5758_v45 = vpop.f32.mrb[59].mxu0  ;;  %v6919_v4 = vadd.f32 %v6621_v35, %v2330_v38  ;;  %v2333_v57 = vmul.f32 0.35355338, %v2156_v1  ;;  %v5764_v32 = vpop.f32.mrb[59].mxu1  ;;  %v6922_v3 = vadd.f32 %v6626_v39, %v2332_v0 }
 0x163   : > { %2573 = vmax.xlane.f32.xlu1 %v2572_v62 }
 0x164   : > { %7689 = vst [vmem:[#allocation14_spill] sm:$0xff] %v6919_v4  ;;  %7690 = vst [vmem:[#allocation15_spill] sm:$0xff] %v6922_v3  ;;  %v2575_v12 = vsel %vm2406_vm2, %v6919_v4, -inf  ;;  %v6927_v41 = vadd.f32 %v6631_v43, %v2331_v52  ;;  %v6930_v37 = vadd.f32 %v6639_v48, %v2333_v57  ;;  %v2581_v1 = vsel %vm2406_vm2, %v6922_v3, -inf }
 0x165   : > { %2576 = vmax.xlane.f32.xlu0 %v2575_v12 }
 0x166   : > { %7691 = vst [vmem:[#allocation16_spill] sm:$0xff] %v6927_v41  ;;  %v2578_v45 = vsel %vm2406_vm2, %v6927_v41, -inf  ;;  %v2584_v63 = vsel %vm2406_vm2, %v6930_v37, -inf }
 0x167   : > { %2579 = vmax.xlane.f32.xlu1 %v2578_v45  ;;  %v2210_v38 = vpop.f32.mrb[60].mxu0  ;;  %v2267_v0 = vpop.f32.mrb[60].mxu1 }
 0x168   : > { %v2334_v62 = vmul.f32 0.35355338, %v2210_v38  ;;  %v5769_v36 = vpop.f32.mrb[61].mxu0  ;;  %v2336_v32 = vmul.f32 0.35355338, %v2267_v0  ;;  %v5775_v12 = vpop.f32.mrb[61].mxu1 }
 0x169   : > { %2582 = vmax.xlane.f32.xlu0 %v2581_v1  ;;  %v2213_v52 = vpop.f32.mrb[62].mxu0  ;;  %v2270_v27 = vpop.f32.mrb[62].mxu1 }
 0x16a   : > { %v2335_v57 = vmul.f32 0.35355338, %v2213_v52  ;;  %v5770_v4 = vpop.f32.mrb[63].mxu0  ;;  %v6939_v41 = vadd.f32 %v6621_v35, %v2334_v62  ;;  %v2337_v3 = vmul.f32 0.35355338, %v2270_v27  ;;  %v5776_v45 = vpop.f32.mrb[63].mxu1  ;;  %v6942_v38 = vadd.f32 %v6626_v39, %v2336_v32 }
 0x16b   : > { %2585 = vmax.xlane.f32.xlu1 %v2584_v63 }
 0x16c   : > { %v2587_v36 = vsel %vm2406_vm2, %v6939_v41, -inf  ;;  %v6947_v1 = vadd.f32 %v6631_v43, %v2335_v57  ;;  %v6950_v0 = vadd.f32 %v6639_v48, %v2337_v3  ;;  %v2593_v4 = vsel %vm2406_vm2, %v6942_v38, -inf }
 0x16d   : > { %2588 = vmax.xlane.f32.xlu0 %v2587_v36 }
 0x16e   : > { %v2590_v35 = vsel %vm2406_vm2, %v6947_v1, -inf  ;;  %v2596_v39 = vsel %vm2406_vm2, %v6950_v0, -inf }
 0x16f   : > { %2591 = vmax.xlane.f32.xlu1 %v2590_v35 }
 0x171   : > { %2594 = vmax.xlane.f32.xlu0 %v2593_v4 }
 0x173   : > { %2597 = vmax.xlane.f32.xlu1 %v2596_v39 }
 0x182   : > { %v2409_v27 = vpop.xlane.xlu0 %2408  ;;  %v2415_v62 = vpop.xlane.xlu1 %2414 }
 0x183   : > { %v2599_v43 = vsub.f32 %v6634_v47, %v2409_v27  ;;  %v2601_v63 = vsub.f32 %v6642_v51, %v2415_v62 }
 0x185   : > { %v2663_v48 = vmul.f32 1.442695, %v2599_v43  ;;  %v2667_v3 = vmul.f32 1.442695, %v2601_v63 }
 0x186   : > { %v2412_v52 = vpop.xlane.xlu0 %2411  ;;  %v2418_v32 = vpop.xlane.xlu1 %2417 }
 0x187   : > { %6075 = vpow2.f32 %v2663_v48  ;;  %v2600_v12 = vsub.f32 %v6647_v53, %v2412_v52  ;;  %v2602_v57 = vsub.f32 %v6652_v55, %v2418_v32 }
 0x188   : > { %6077 = vpow2.f32 %v2667_v3 }
 0x189   : > { %v2665_v45 = vmul.f32 1.442695, %v2600_v12  ;;  %v2669_v36 = vmul.f32 1.442695, %v2602_v57 }
 0x18a   : > { %v2421_v35 = vpop.xlane.xlu0 %2420 }
 0x18b   : > { %6079 = vpow2.f32 %v2665_v45  ;;  %v2603_v4 = vsub.f32 %v6659_v5, %v2421_v35 }
 0x18c   : > { %v2424_v39 = vpop.xlane.xlu1 %2423  ;;  %6081 = vpow2.f32 %v2669_v36 }
 0x18d   : > { %v2671_v47 = vmul.f32 1.442695, %v2603_v4  ;;  %v2604_v51 = vsub.f32 %v6667_v10, %v2424_v39 }
 0x18e   : > { %v2427_v27 = vpop.xlane.xlu0 %2426 }
 0x18f   : > { %6083 = vpow2.f32 %v2671_v47  ;;  %v2673_v62 = vmul.f32 1.442695, %v2604_v51  ;;  %v2605_v43 = vsub.f32 %v6662_v8, %v2427_v27 }
 0x190   : > { %v2430_v53 = vpop.xlane.xlu1 %2429 }
 0x191   : > { %v6965_v63 = vpop.eup %6075  ;;  %6085 = vpow2.f32 %v2673_v62  ;;  %v2675_v55 = vmul.f32 1.442695, %v2605_v43  ;;  %v2606_v48 = vsub.f32 %v6670_v11, %v2430_v53 }
 0x192   : > { %v2433_v3 = vpop.xlane.xlu0 %2432  ;;  %v2791_v5 = vsel %vm2406_vm2, %v6965_v63, 0.0  ;;  %v6970_v52 = vpop.eup %6077 }
 0x193   : > { %6087 = vpow2.f32 %v2675_v55  ;;  %v2677_v10 = vmul.f32 1.442695, %v2606_v48  ;;  %v2607_v32 = vsub.f32 %v6679_v25, %v2433_v3  ;;  %2792 = vadd.xlane.f32.xlu0 %v2791_v5  ;;  %v2797_v11 = vsel %vm2406_vm2, %v6970_v52, 0.0 }
 0x194   : > { %v2436_v12 = vpop.xlane.xlu1 %2435 }
 0x195   : > { %v6973_v8 = vpop.eup %6079  ;;  %6089 = vpow2.f32 %v2677_v10  ;;  %v2679_v57 = vmul.f32 1.442695, %v2607_v32  ;;  %v2608_v45 = vsub.f32 %v6687_v30, %v2436_v12 }
 0x196   : > { %v2439_v36 = vpop.xlane.xlu0 %2438  ;;  %v2794_v35 = vsel %vm2406_vm2, %v6973_v8, 0.0  ;;  %v6980_v4 = vpop.eup %6081 }
 0x197   : > { %6091 = vpow2.f32 %v2679_v57  ;;  %v2681_v39 = vmul.f32 1.442695, %v2608_v45  ;;  %v2609_v25 = vsub.f32 %v6682_v28, %v2439_v36  ;;  %2798 = vadd.xlane.f32.xlu0 %v2797_v11  ;;  %2795 = vadd.xlane.f32.xlu1 %v2794_v35  ;;  %v2800_v53 = vsel %vm2406_vm2, %v6980_v4, 0.0 }
 0x198   : > { %v2442_v47 = vpop.xlane.xlu1 %2441 }
 0x199   : > { %v6983_v51 = vpop.eup %6083  ;;  %6093 = vpow2.f32 %v2681_v39  ;;  %v2683_v30 = vmul.f32 1.442695, %v2609_v25  ;;  %v2610_v27 = vsub.f32 %v6690_v31, %v2442_v47 }
 0x19a   : > { %v2445_v62 = vpop.xlane.xlu0 %2444  ;;  %v2803_v43 = vsel %vm2406_vm2, %v6983_v51, 0.0 }
 0x19b   : > { %v6990_v55 = vpop.eup %6085  ;;  %6095 = vpow2.f32 %v2683_v30  ;;  %v2685_v28 = vmul.f32 1.442695, %v2610_v27  ;;  %v2611_v48 = vsub.f32 %v6699_v50, %v2445_v62  ;;  %2804 = vadd.xlane.f32.xlu0 %v2803_v43  ;;  %2801 = vadd.xlane.f32.xlu1 %v2800_v53 }
 0x19c   : > { %v2448_v3 = vpop.xlane.xlu1 %2447  ;;  %v2806_v57 = vsel %vm2406_vm2, %v6990_v55, 0.0 }
 0x19d   : > { %v6993_v5 = vpop.eup %6087  ;;  %6097 = vpow2.f32 %v2685_v28  ;;  %v2687_v31 = vmul.f32 1.442695, %v2611_v48  ;;  %v2612_v10 = vsub.f32 %v6707_v58, %v2448_v3 }
 0x19e   : > { %v2451_v32 = vpop.xlane.xlu0 %2450  ;;  %v2809_v12 = vsel %vm2406_vm2, %v6993_v5, 0.0 }
 0x19f   : > { %v7000_v45 = vpop.eup %6089  ;;  %6099 = vpow2.f32 %v2687_v31  ;;  %v2689_v50 = vmul.f32 1.442695, %v2612_v10  ;;  %v2613_v36 = vsub.f32 %v6702_v56, %v2451_v32  ;;  %2810 = vadd.xlane.f32.xlu0 %v2809_v12  ;;  %2807 = vadd.xlane.f32.xlu1 %v2806_v57 }
 0x1a0   : > { %v2454_v11 = vpop.xlane.xlu1 %2453  ;;  %v2812_v30 = vsel %vm2406_vm2, %v7000_v45, 0.0 }
 0x1a1   : > { %v7003_v35 = vpop.eup %6091  ;;  %6101 = vpow2.f32 %v2689_v50  ;;  %v2691_v58 = vmul.f32 1.442695, %v2613_v36  ;;  %v2614_v39 = vsub.f32 %v6710_v59, %v2454_v11 }
 0x1a2   : > { %v2457_v25 = vpop.xlane.xlu0 %2456  ;;  %v2815_v47 = vsel %vm2406_vm2, %v7003_v35, 0.0 }
 0x1a3   : > { %v7010_v27 = vpop.eup %6093  ;;  %6103 = vpow2.f32 %v2691_v58  ;;  %v2693_v56 = vmul.f32 1.442695, %v2614_v39  ;;  %v2615_v62 = vsub.f32 %v6719_v14, %v2457_v25  ;;  %2816 = vadd.xlane.f32.xlu0 %v2815_v47  ;;  %2813 = vadd.xlane.f32.xlu1 %v2812_v30 }
 0x1a4   : > { %v2460_v43 = vpop.xlane.xlu1 %2459  ;;  %v2818_v31 = vsel %vm2406_vm2, %v7010_v27, 0.0 }
 0x1a5   : > { %v7013_v53 = vpop.eup %6095  ;;  %6105 = vpow2.f32 %v2693_v56  ;;  %v2695_v59 = vmul.f32 1.442695, %v2615_v62  ;;  %v2616_v28 = vsub.f32 %v6727_v19, %v2460_v43 }
 0x1a6   : > { %v2463_v48 = vpop.xlane.xlu0 %2462  ;;  %v2821_v3 = vsel %vm2406_vm2, %v7013_v53, 0.0 }
 0x1a7   : > { %v7020_v10 = vpop.eup %6097  ;;  %6107 = vpow2.f32 %v2695_v59  ;;  %v2697_v14 = vmul.f32 1.442695, %v2616_v28  ;;  %v2617_v32 = vsub.f32 %v6722_v17, %v2463_v48  ;;  %2822 = vadd.xlane.f32.xlu0 %v2821_v3  ;;  %2819 = vadd.xlane.f32.xlu1 %v2818_v31  ;;  %v6043_v3 = vld [vmem:[%s7047_s9] sm:$0xff]  }
 0x1a8   : > { %v2466_v12 = vpop.xlane.xlu1 %2465  ;;  %v2824_v58 = vsel %vm2406_vm2, %v7020_v10, 0.0  ;;  %5778 = vmatpush3.bf16.msra.mxu0 %v6043_v3 }
 0x1a9   : > { %v7023_v57 = vpop.eup %6099  ;;  %6109 = vpow2.f32 %v2697_v14  ;;  %v2699_v19 = vmul.f32 1.442695, %v2617_v32  ;;  %v2618_v50 = vsub.f32 %v6730_v20, %v2466_v12 }
 0x1aa   : > { %v2469_v36 = vpop.xlane.xlu0 %2468  ;;  %v2827_v11 = vsel %vm2406_vm2, %v7023_v57, 0.0 }
 0x1ab   : > { %v7030_v39 = vpop.eup %6101  ;;  %6111 = vpow2.f32 %v2699_v19  ;;  %v2701_v17 = vmul.f32 1.442695, %v2618_v50  ;;  %v2619_v25 = vsub.f32 %v6739_v40, %v2469_v36  ;;  %2828 = vadd.xlane.f32.xlu0 %v2827_v11  ;;  %2825 = vadd.xlane.f32.xlu1 %v2824_v58 }
 0x1ac   : > { %v2472_v47 = vpop.xlane.xlu1 %2471  ;;  %v2830_v59 = vsel %vm2406_vm2, %v7030_v39, 0.0 }
 0x1ad   : > { %v7033_v30 = vpop.eup %6103  ;;  %6113 = vpow2.f32 %v2701_v17  ;;  %v2703_v20 = vmul.f32 1.442695, %v2619_v25  ;;  %v2620_v56 = vsub.f32 %v6747_v46, %v2472_v47  ;;  %v6044_v17 = vld [vmem:[%s7047_s9 + $0x8] sm:$0xff]   ;;  %v7692_v25 = vmov 0.0  }
 0x1ae   : > { %v2475_v62 = vpop.xlane.xlu0 %2474  ;;  %v2833_v43 = vsel %vm2406_vm2, %v7033_v30, 0.0  ;;  %5789 = vmatprep.subr.bf16.mxu0 %v7692_v25  ;;  %5784 = vmatpush3.bf16.msra.mxu1 %v6044_v17 }
 0x1af   : > { %v7040_v28 = vpop.eup %6105  ;;  %6115 = vpow2.f32 %v2703_v20  ;;  %v2705_v40 = vmul.f32 1.442695, %v2620_v56  ;;  %v2621_v48 = vsub.f32 %v6742_v44, %v2475_v62  ;;  %2834 = vadd.xlane.f32.xlu0 %v2833_v43  ;;  %2831 = vadd.xlane.f32.xlu1 %v2830_v59 }
 0x1b0   : > { %v2478_v46 = vpop.xlane.xlu1 %2477  ;;  %v2836_v19 = vsel %vm2406_vm2, %v7040_v28, 0.0  ;;  %5795 = vmatprep.subr.bf16.mxu1 %v7692_v25 }
 0x1b1   : > { %v7050_v31 = vpop.eup %6107  ;;  %6117 = vpow2.f32 %v2705_v40  ;;  %v2707_v14 = vmul.f32 1.442695, %v2621_v48  ;;  %v2622_v32 = vsub.f32 %v6750_v49, %v2478_v46 }
 0x1b2   : > { %v2481_v12 = vpop.xlane.xlu0 %2480  ;;  %v2839_v44 = vsel %vm2406_vm2, %v7050_v31, 0.0 }
 0x1b3   : > { %v7057_v50 = vpop.eup %6109  ;;  %6119 = vpow2.f32 %v2707_v14  ;;  %v2709_v36 = vmul.f32 1.442695, %v2622_v32  ;;  %v2623_v11 = vsub.f32 %v6759_v9, %v2481_v12  ;;  %2840 = vadd.xlane.f32.xlu0 %v2839_v44  ;;  %2837 = vadd.xlane.f32.xlu1 %v2836_v19 }
 0x1b4   : > { %v2484_v58 = vpop.xlane.xlu1 %2483  ;;  %v2842_v43 = vsel %vm2406_vm2, %v7057_v50, 0.0 }
 0x1b5   : > { %v7062_v49 = vpop.eup %6111  ;;  %6121 = vpow2.f32 %v2709_v36  ;;  %v2711_v47 = vmul.f32 1.442695, %v2623_v11  ;;  %v2624_v20 = vsub.f32 %v6767_v18, %v2484_v58 }
 0x1b6   : > { %v2487_v56 = vpop.xlane.xlu0 %2486  ;;  %v2845_v62 = vsel %vm2406_vm2, %v7062_v49, 0.0 }
 0x1b7   : > { %v7069_v9 = vpop.eup %6113  ;;  %6123 = vpow2.f32 %v2711_v47  ;;  %v2713_v59 = vmul.f32 1.442695, %v2624_v20  ;;  %v2625_v40 = vsub.f32 %v6762_v15, %v2487_v56  ;;  %2846 = vadd.xlane.f32.xlu0 %v2845_v62  ;;  %2843 = vadd.xlane.f32.xlu1 %v2842_v43 }
 0x1b8   : > { %v2490_v48 = vpop.xlane.xlu1 %2489  ;;  %v2848_v12 = vsel %vm2406_vm2, %v7069_v9, 0.0 }
 0x1b9   : > { %v7073_v18 = vpop.eup %6115  ;;  %6125 = vpow2.f32 %v2713_v59  ;;  %v2715_v46 = vmul.f32 1.442695, %v2625_v40  ;;  %v2626_v3 = vsub.f32 %v6770_v21, %v2490_v48 }
 0x1ba   : > { %v2493_v14 = vpop.xlane.xlu0 %2492  ;;  %v2851_v32 = vsel %vm2406_vm2, %v7073_v18, 0.0 }
 0x1bb   : > { %v7080_v44 = vpop.eup %6117  ;;  %6127 = vpow2.f32 %v2715_v46  ;;  %v2717_v15 = vmul.f32 1.442695, %v2626_v3  ;;  %v2627_v19 = vsub.f32 %v6779_v42, %v2493_v14  ;;  %2852 = vadd.xlane.f32.xlu0 %v2851_v32  ;;  %2849 = vadd.xlane.f32.xlu1 %v2848_v12 }
 0x1bc   : > { %v2496_v36 = vpop.xlane.xlu1 %2495  ;;  %v2854_v20 = vsel %vm2406_vm2, %v7080_v44, 0.0 }
 0x1bd   : > { %v7083_v11 = vpop.eup %6119  ;;  %6129 = vpow2.f32 %v2717_v15  ;;  %v2719_v21 = vmul.f32 1.442695, %v2627_v19  ;;  %v2628_v58 = vsub.f32 %v6787_v60, %v2496_v36 }
 0x1be   : > { %v2499_v17 = vpop.xlane.xlu0 %2498  ;;  %v2857_v47 = vsel %vm2406_vm2, %v7083_v11, 0.0 }
 0x1bf   : > { %v7090_v56 = vpop.eup %6121  ;;  %6131 = vpow2.f32 %v2719_v21  ;;  %v2721_v42 = vmul.f32 1.442695, %v2628_v58  ;;  %v2629_v62 = vsub.f32 %v6782_v54, %v2499_v17  ;;  %2858 = vadd.xlane.f32.xlu0 %v2857_v47  ;;  %2855 = vadd.xlane.f32.xlu1 %v2854_v20 }
 0x1c0   : > { %v2502_v43 = vpop.xlane.xlu1 %2501  ;;  %v2860_v3 = vsel %vm2406_vm2, %v7090_v56, 0.0 }
 0x1c1   : > { %v7093_v59 = vpop.eup %6123  ;;  %6133 = vpow2.f32 %v2721_v42  ;;  %v2723_v60 = vmul.f32 1.442695, %v2629_v62  ;;  %v2630_v40 = vsub.f32 %v6790_v61, %v2502_v43 }
 0x1c2   : > { %v2505_v48 = vpop.xlane.xlu0 %2504  ;;  %v2863_v46 = vsel %vm2406_vm2, %v7093_v59, 0.0 }
 0x1c3   : > { %v7100_v14 = vpop.eup %6125  ;;  %6135 = vpow2.f32 %v2723_v60  ;;  %v2725_v54 = vmul.f32 1.442695, %v2630_v40  ;;  %v2631_v32 = vsub.f32 %v6799_v24, %v2505_v48  ;;  %2864 = vadd.xlane.f32.xlu0 %v2863_v46  ;;  %2861 = vadd.xlane.f32.xlu1 %v2860_v3 }
 0x1c4   : > { %v2508_v12 = vpop.xlane.xlu1 %2507  ;;  %v2866_v58 = vsel %vm2406_vm2, %v7100_v14, 0.0 }
 0x1c5   : > { %v7103_v15 = vpop.eup %6127  ;;  %6137 = vpow2.f32 %v2725_v54  ;;  %v2727_v61 = vmul.f32 1.442695, %v2631_v32  ;;  %v2632_v19 = vsub.f32 %v6807_v33, %v2508_v12 }
 0x1c6   : > { %v2511_v36 = vpop.xlane.xlu0 %2510  ;;  %v2869_v21 = vsel %vm2406_vm2, %v7103_v15, 0.0 }
 0x1c7   : > { %v7110_v17 = vpop.eup %6129  ;;  %6139 = vpow2.f32 %v2727_v61  ;;  %v2729_v24 = vmul.f32 1.442695, %v2632_v19  ;;  %v2633_v47 = vsub.f32 %v6802_v29, %v2511_v36  ;;  %2870 = vadd.xlane.f32.xlu0 %v2869_v21  ;;  %2867 = vadd.xlane.f32.xlu1 %v2866_v58 }
 0x1c8   : > { %v2514_v20 = vpop.xlane.xlu1 %2513  ;;  %v2872_v40 = vsel %vm2406_vm2, %v7110_v17, 0.0 }
 0x1c9   : > { %v7113_v42 = vpop.eup %6131  ;;  %6141 = vpow2.f32 %v2729_v24  ;;  %v2731_v33 = vmul.f32 1.442695, %v2633_v47  ;;  %v2634_v62 = vsub.f32 %v6810_v34, %v2514_v20 }
 0x1ca   : > { %v2517_v43 = vpop.xlane.xlu0 %2516  ;;  %v2875_v60 = vsel %vm2406_vm2, %v7113_v42, 0.0 }
 0x1cb   : > { %v7120_v48 = vpop.eup %6133  ;;  %6143 = vpow2.f32 %v2731_v33  ;;  %v2733_v29 = vmul.f32 1.442695, %v2634_v62  ;;  %v2635_v46 = vsub.f32 %v6819_v6, %v2517_v43  ;;  %2876 = vadd.xlane.f32.xlu0 %v2875_v60  ;;  %2873 = vadd.xlane.f32.xlu1 %v2872_v40 }
 0x1cc   : > { %v2520_v3 = vpop.xlane.xlu1 %2519  ;;  %v2878_v19 = vsel %vm2406_vm2, %v7120_v48, 0.0 }
 0x1cd   : > { %v7123_v54 = vpop.eup %6135  ;;  %6145 = vpow2.f32 %v2733_v29  ;;  %v2735_v34 = vmul.f32 1.442695, %v2635_v46  ;;  %v2636_v32 = vsub.f32 %v6827_v22, %v2520_v3 }
 0x1ce   : > { %v2523_v12 = vpop.xlane.xlu0 %2522  ;;  %v2881_v61 = vsel %vm2406_vm2, %v7123_v54, 0.0 }
 0x1cf   : > { %v7130_v36 = vpop.eup %6137  ;;  %6147 = vpow2.f32 %v2735_v34  ;;  %v2737_v6 = vmul.f32 1.442695, %v2636_v32  ;;  %v2637_v21 = vsub.f32 %v6822_v13, %v2523_v12  ;;  %2882 = vadd.xlane.f32.xlu0 %v2881_v61  ;;  %2879 = vadd.xlane.f32.xlu1 %v2878_v19 }
 0x1d0   : > { %v2526_v58 = vpop.xlane.xlu1 %2525  ;;  %v2884_v62 = vsel %vm2406_vm2, %v7130_v36, 0.0 }
 0x1d1   : > { %v7133_v24 = vpop.eup %6139  ;;  %6149 = vpow2.f32 %v2737_v6  ;;  %v2739_v22 = vmul.f32 1.442695, %v2637_v21  ;;  %v2638_v47 = vsub.f32 %v6830_v23, %v2526_v58 }
 0x1d2   : > { %v2529_v20 = vpop.xlane.xlu0 %2528  ;;  %v2887_v33 = vsel %vm2406_vm2, %v7133_v24, 0.0 }
 0x1d3   : > { %v7140_v43 = vpop.eup %6141  ;;  %6151 = vpow2.f32 %v2739_v22  ;;  %v2741_v13 = vmul.f32 1.442695, %v2638_v47  ;;  %v2639_v60 = vsub.f32 %v6839_v2, %v2529_v20  ;;  %2888 = vadd.xlane.f32.xlu0 %v2887_v33  ;;  %2885 = vadd.xlane.f32.xlu1 %v2884_v62  ;;  %v7693_v33 = vld [vmem:[#allocation2_spill] sm:$0xff] }
 0x1d4   : > { %v2532_v40 = vpop.xlane.xlu1 %2531  ;;  %v2890_v32 = vsel %vm2406_vm2, %v7140_v43, 0.0 }
 0x1d5   : > { %v7143_v29 = vpop.eup %6143  ;;  %6153 = vpow2.f32 %v2741_v13  ;;  %v2743_v23 = vmul.f32 1.442695, %v2639_v60  ;;  %v2640_v46 = vsub.f32 %v6847_v16, %v2532_v40  ;;  %v7694_v40 = vld [vmem:[#allocation4_spill] sm:$0xff] }
 0x1d6   : > { %v2535_v3 = vpop.xlane.xlu0 %2534  ;;  %v2893_v34 = vsel %vm2406_vm2, %v7143_v29, 0.0 }
 0x1d7   : > { %v7150_v12 = vpop.eup %6145  ;;  %6155 = vpow2.f32 %v2743_v23  ;;  %v2745_v2 = vmul.f32 1.442695, %v2640_v46  ;;  %v2641_v61 = vsub.f32 %v6842_v7, %v2535_v3  ;;  %2894 = vadd.xlane.f32.xlu0 %v2893_v34  ;;  %2891 = vadd.xlane.f32.xlu1 %v2890_v32 }
 0x1d8   : > { %v2538_v19 = vpop.xlane.xlu1 %2537  ;;  %v2896_v47 = vsel %vm2406_vm2, %v7150_v12, 0.0 }
 0x1d9   : > { %v7153_v6 = vpop.eup %6147  ;;  %6157 = vpow2.f32 %v2745_v2  ;;  %v2747_v16 = vmul.f32 1.442695, %v2641_v61  ;;  %v2642_v21 = vsub.f32 %v6850_v26, %v2538_v19  ;;  %v7695_v61 = vld [vmem:[#allocation3_spill] sm:$0xff] }
 0x1da   : > { %v2541_v58 = vpop.xlane.xlu0 %2540  ;;  %v2899_v22 = vsel %vm2406_vm2, %v7153_v6, 0.0 }
 0x1db   : > { %v7160_v20 = vpop.eup %6149  ;;  %6159 = vpow2.f32 %v2747_v16  ;;  %v2749_v7 = vmul.f32 1.442695, %v2642_v21  ;;  %v2643_v62 = vsub.f32 %v7693_v33, %v2541_v58  ;;  %2900 = vadd.xlane.f32.xlu0 %v2899_v22  ;;  %2897 = vadd.xlane.f32.xlu1 %v2896_v47  ;;  %v7696_v22 = vld [vmem:[#allocation5_spill] sm:$0xff] }
 0x1dc   : > { %v2544_v13 = vpop.xlane.xlu1 %2543  ;;  %v2902_v34 = vsel %vm2406_vm2, %v7160_v20, 0.0 }
 0x1dd   : > { %v7163_v60 = vpop.eup %6151  ;;  %6161 = vpow2.f32 %v2749_v7  ;;  %v2751_v26 = vmul.f32 1.442695, %v2643_v62  ;;  %v2644_v23 = vsub.f32 %v7694_v40, %v2544_v13  ;;  %v7698_v40 = vld [vmem:[#allocation6_spill] sm:$0xff] }
 0x1de   : > { %v2547_v46 = vpop.xlane.xlu0 %2546  ;;  %v2905_v3 = vsel %vm2406_vm2, %v7163_v60, 0.0 }
 0x1df   : > { %v7170_v32 = vpop.eup %6153  ;;  %6163 = vpow2.f32 %v2751_v26  ;;  %v2753_v2 = vmul.f32 1.442695, %v2644_v23  ;;  %v2645_v19 = vsub.f32 %v7695_v61, %v2547_v46  ;;  %2906 = vadd.xlane.f32.xlu0 %v2905_v3  ;;  %2903 = vadd.xlane.f32.xlu1 %v2902_v34 }
 0x1e0   : > { %v2550_v16 = vpop.xlane.xlu1 %2549  ;;  %v2908_v62 = vsel %vm2406_vm2, %v7170_v32, 0.0 }
 0x1e1   : > { %v7173_v21 = vpop.eup %6155  ;;  %6165 = vpow2.f32 %v2753_v2  ;;  %v2755_v58 = vmul.f32 1.442695, %v2645_v19  ;;  %v2646_v47 = vsub.f32 %v7696_v22, %v2550_v16  ;;  %v7700_v2 = vld [vmem:[#allocation8_spill] sm:$0xff] }
 0x1e2   : > { %v2553_v7 = vpop.xlane.xlu0 %2552  ;;  %v2911_v33 = vsel %vm2406_vm2, %v7173_v21, 0.0 }
 0x1e3   : > { %v7180_v13 = vpop.eup %6157  ;;  %6167 = vpow2.f32 %v2755_v58  ;;  %v2757_v26 = vmul.f32 1.442695, %v2646_v47  ;;  %v2647_v23 = vsub.f32 %v7698_v40, %v2553_v7  ;;  %2912 = vadd.xlane.f32.xlu0 %v2911_v33  ;;  %2909 = vadd.xlane.f32.xlu1 %v2908_v62  ;;  %v7702_v7 = vld [vmem:[#allocation7_spill] sm:$0xff] }
 0x1e4   : > { %7697 = vst [vmem:[#allocation2_spill] sm:$0xff] %v7180_v13  ;;  %v2556_v46 = vpop.xlane.xlu1 %2555  ;;  %v2914_v22 = vsel %vm2406_vm2, %v7180_v13, 0.0 }
 0x1e5   : > { %v7183_v3 = vpop.eup %6159  ;;  %6169 = vpow2.f32 %v2757_v26  ;;  %v2759_v34 = vmul.f32 1.442695, %v2647_v23  ;;  %v2648_v61 = vsub.f32 %v7700_v2, %v2556_v46  ;;  %v7704_v23 = vld [vmem:[#allocation9_spill] sm:$0xff] }
 0x1e6   : > { %7699 = vst [vmem:[#allocation4_spill] sm:$0xff] %v7183_v3  ;;  %v2559_v19 = vpop.xlane.xlu0 %2558  ;;  %v2917_v16 = vsel %vm2406_vm2, %v7183_v3, 0.0 }
 0x1e7   : > { %v7190_v58 = vpop.eup %6161  ;;  %6171 = vpow2.f32 %v2759_v34  ;;  %v2761_v47 = vmul.f32 1.442695, %v2648_v61  ;;  %v2649_v33 = vsub.f32 %v7702_v7, %v2559_v19  ;;  %2918 = vadd.xlane.f32.xlu0 %v2917_v16  ;;  %2915 = vadd.xlane.f32.xlu1 %v2914_v22  ;;  %v7706_v19 = vld [vmem:[#allocation10_spill] sm:$0xff] }
 0x1e8   : > { %7701 = vst [vmem:[#allocation3_spill] sm:$0xff] %v7190_v58  ;;  %v2562_v62 = vpop.xlane.xlu1 %2561  ;;  %v2920_v13 = vsel %vm2406_vm2, %v7190_v58, 0.0 }
 0x1e9   : > { %v7193_v26 = vpop.eup %6163  ;;  %6173 = vpow2.f32 %v2761_v47  ;;  %v2763_v40 = vmul.f32 1.442695, %v2649_v33  ;;  %v2650_v46 = vsub.f32 %v7704_v23, %v2562_v62  ;;  %v7708_v33 = vld [vmem:[#allocation12_spill] sm:$0xff] }
 0x1ea   : > { %7703 = vst [vmem:[#allocation5_spill] sm:$0xff] %v7193_v26  ;;  %v2565_v2 = vpop.xlane.xlu0 %2564  ;;  %v2923_v3 = vsel %vm2406_vm2, %v7193_v26, 0.0 }
 0x1eb   : > { %v7200_v34 = vpop.eup %6165  ;;  %6175 = vpow2.f32 %v2763_v40  ;;  %v2765_v61 = vmul.f32 1.442695, %v2650_v46  ;;  %v2651_v16 = vsub.f32 %v7706_v19, %v2565_v2  ;;  %2924 = vadd.xlane.f32.xlu0 %v2923_v3  ;;  %2921 = vadd.xlane.f32.xlu1 %v2920_v13  ;;  %v7710_v3 = vld [vmem:[#allocation11_spill] sm:$0xff] }
 0x1ec   : > { %7705 = vst [vmem:[#allocation6_spill] sm:$0xff] %v7200_v34  ;;  %v2568_v22 = vpop.xlane.xlu1 %2567  ;;  %v2926_v58 = vsel %vm2406_vm2, %v7200_v34, 0.0 }
 0x1ed   : > { %v7203_v47 = vpop.eup %6167  ;;  %6177 = vpow2.f32 %v2765_v61  ;;  %v2767_v7 = vmul.f32 1.442695, %v2651_v16  ;;  %v2652_v62 = vsub.f32 %v7708_v33, %v2568_v22  ;;  %v7712_v16 = vld [vmem:[#allocation13_spill] sm:$0xff] }
 0x1ee   : > { %7707 = vst [vmem:[#allocation8_spill] sm:$0xff] %v7203_v47  ;;  %v2571_v23 = vpop.xlane.xlu0 %2570  ;;  %v2929_v26 = vsel %vm2406_vm2, %v7203_v47, 0.0 }
 0x1ef   : > { %v7210_v40 = vpop.eup %6169  ;;  %6179 = vpow2.f32 %v2767_v7  ;;  %v2769_v46 = vmul.f32 1.442695, %v2652_v62  ;;  %v2653_v13 = vsub.f32 %v7710_v3, %v2571_v23  ;;  %2930 = vadd.xlane.f32.xlu0 %v2929_v26  ;;  %2927 = vadd.xlane.f32.xlu1 %v2926_v58  ;;  %v7713_v26 = vld [vmem:[#allocation14_spill] sm:$0xff] }
 0x1f0   : > { %7709 = vst [vmem:[#allocation7_spill] sm:$0xff] %v7210_v40  ;;  %v2574_v2 = vpop.xlane.xlu1 %2573  ;;  %v2932_v34 = vsel %vm2406_vm2, %v7210_v40, 0.0 }
 0x1f1   : > { %v7213_v61 = vpop.eup %6171  ;;  %6181 = vpow2.f32 %v2769_v46  ;;  %v2771_v19 = vmul.f32 1.442695, %v2653_v13  ;;  %v2654_v22 = vsub.f32 %v7712_v16, %v2574_v2  ;;  %v7715_v13 = vld [vmem:[#allocation16_spill] sm:$0xff] }
 0x1f2   : > { %7711 = vst [vmem:[#allocation9_spill] sm:$0xff] %v7213_v61  ;;  %v2577_v33 = vpop.xlane.xlu0 %2576  ;;  %v2935_v47 = vsel %vm2406_vm2, %v7213_v61, 0.0 }
 0x1f3   : > { %v7220_v7 = vpop.eup %6173  ;;  %6183 = vpow2.f32 %v2771_v19  ;;  %v2773_v62 = vmul.f32 1.442695, %v2654_v22  ;;  %v2655_v58 = vsub.f32 %v7713_v26, %v2577_v33  ;;  %2936 = vadd.xlane.f32.xlu0 %v2935_v47  ;;  %2933 = vadd.xlane.f32.xlu1 %v2932_v34  ;;  %v7716_v47 = vld [vmem:[#allocation15_spill] sm:$0xff] }
 0x1f4   : > { %v2580_v23 = vpop.xlane.xlu1 %2579  ;;  %v2938_v40 = vsel %vm2406_vm2, %v7220_v7, 0.0 }
 0x1f5   : > { %v7223_v46 = vpop.eup %6175  ;;  %6185 = vpow2.f32 %v2773_v62  ;;  %v2775_v3 = vmul.f32 1.442695, %v2655_v58  ;;  %v2656_v2 = vsub.f32 %v7715_v13, %v2580_v23 }
 0x1f6   : > { %7714 = vst [vmem:[#allocation10_spill] sm:$0xff] %v7223_v46  ;;  %v2583_v16 = vpop.xlane.xlu0 %2582  ;;  %v2941_v61 = vsel %vm2406_vm2, %v7223_v46, 0.0 }
 0x1f7   : > { %v7230_v19 = vpop.eup %6177  ;;  %6187 = vpow2.f32 %v2775_v3  ;;  %v2777_v22 = vmul.f32 1.442695, %v2656_v2  ;;  %v2657_v34 = vsub.f32 %v7716_v47, %v2583_v16  ;;  %2942 = vadd.xlane.f32.xlu0 %v2941_v61  ;;  %2939 = vadd.xlane.f32.xlu1 %v2938_v40 }
 0x1f8   : > { %v2586_v33 = vpop.xlane.xlu1 %2585  ;;  %v2944_v46 = vsel %vm2406_vm2, %v7230_v19, 0.0 }
 0x1f9   : > { %v7233_v62 = vpop.eup %6179  ;;  %6189 = vpow2.f32 %v2777_v22  ;;  %v2779_v26 = vmul.f32 1.442695, %v2657_v34  ;;  %v2658_v58 = vsub.f32 %v6930_v37, %v2586_v33 }
 0x1fa   : > { %v2589_v23 = vpop.xlane.xlu0 %2588  ;;  %v2947_v13 = vsel %vm2406_vm2, %v7233_v62, 0.0 }
 0x1fb   : > { %v7240_v3 = vpop.eup %6181  ;;  %6191 = vpow2.f32 %v2779_v26  ;;  %v2781_v2 = vmul.f32 1.442695, %v2658_v58  ;;  %v2659_v40 = vsub.f32 %v6939_v41, %v2589_v23  ;;  %2948 = vadd.xlane.f32.xlu0 %v2947_v13  ;;  %2945 = vadd.xlane.f32.xlu1 %v2944_v46 }
 0x1fc   : > { %v2592_v61 = vpop.xlane.xlu1 %2591  ;;  %v2950_v33 = vsel %vm2406_vm2, %v7240_v3, 0.0 }
 0x1fd   : > { %v7243_v16 = vpop.eup %6183  ;;  %6193 = vpow2.f32 %v2781_v2  ;;  %v2783_v37 = vmul.f32 1.442695, %v2659_v40  ;;  %v2660_v22 = vsub.f32 %v6947_v1, %v2592_v61 }
 0x1fe   : > { %v2595_v47 = vpop.xlane.xlu0 %2594  ;;  %v2953_v34 = vsel %vm2406_vm2, %v7243_v16, 0.0 }
 0x1ff   : > { %v7250_v26 = vpop.eup %6185  ;;  %6195 = vpow2.f32 %v2783_v37  ;;  %v2785_v41 = vmul.f32 1.442695, %v2660_v22  ;;  %v2661_v46 = vsub.f32 %v6942_v38, %v2595_v47  ;;  %2954 = vadd.xlane.f32.xlu0 %v2953_v34  ;;  %2951 = vadd.xlane.f32.xlu1 %v2950_v33 }
 0x200   : > { %v2598_v58 = vpop.xlane.xlu1 %2597  ;;  %v2956_v40 = vsel %vm2406_vm2, %v7250_v26, 0.0 }
 0x201   : > { %v7253_v23 = vpop.eup %6187  ;;  %6197 = vpow2.f32 %v2785_v41  ;;  %v2787_v1 = vmul.f32 1.442695, %v2661_v46  ;;  %v2662_v13 = vsub.f32 %v6950_v0, %v2598_v58 }
 0x202   : > { %v2959_v2 = vsel %vm2406_vm2, %v7253_v23, 0.0 }
 0x203   : > { %v7260_v61 = vpop.eup %6189  ;;  %6199 = vpow2.f32 %v2787_v1  ;;  %v2789_v37 = vmul.f32 1.442695, %v2662_v13  ;;  %2960 = vadd.xlane.f32.xlu0 %v2959_v2  ;;  %2957 = vadd.xlane.f32.xlu1 %v2956_v40 }
 0x204   : > { %7717 = vst [vmem:[#allocation12_spill] sm:$0xff] %v7260_v61  ;;  %v2962_v0 = vsel %vm2406_vm2, %v7260_v61, 0.0 }
 0x205   : > { %v7262_v38 = vpop.eup %6191  ;;  %6201 = vpow2.f32 %v2789_v37 }
 0x206   : > { %7718 = vst [vmem:[#allocation11_spill] sm:$0xff] %v7262_v38  ;;  %v2965_v22 = vsel %vm2406_vm2, %v7262_v38, 0.0 }
 0x207   : > { %v7268_v47 = vpop.eup %6193  ;;  %2966 = vadd.xlane.f32.xlu0 %v2965_v22  ;;  %2963 = vadd.xlane.f32.xlu1 %v2962_v0 }
 0x208   : > { %7719 = vst [vmem:[#allocation13_spill] sm:$0xff] %v7268_v47  ;;  %v2968_v41 = vsel %vm2406_vm2, %v7268_v47, 0.0 }
 0x209   : > { %v7270_v34 = vpop.eup %6195 }
 0x20a   : > { %7720 = vst [vmem:[#allocation14_spill] sm:$0xff] %v7270_v34  ;;  %v2971_v33 = vsel %vm2406_vm2, %v7270_v34, 0.0 }
 0x20b   : > { %v7276_v46 = vpop.eup %6197  ;;  %2972 = vadd.xlane.f32.xlu0 %v2971_v33  ;;  %2969 = vadd.xlane.f32.xlu1 %v2968_v41 }
 0x20c   : > { %7721 = vst [vmem:[#allocation16_spill] sm:$0xff] %v7276_v46  ;;  %v2974_v13 = vsel %vm2406_vm2, %v7276_v46, 0.0 }
 0x20d   : > { %v7278_v58 = vpop.eup %6199 }
 0x20e   : > { %7722 = vst [vmem:[#allocation15_spill] sm:$0xff] %v7278_v58  ;;  %v2977_v1 = vsel %vm2406_vm2, %v7278_v58, 0.0 }
 0x20f   : > { %v7284_v2 = vpop.eup %6201  ;;  %2978 = vadd.xlane.f32.xlu0 %v2977_v1  ;;  %2975 = vadd.xlane.f32.xlu1 %v2974_v13 }
 0x210   : > { %7723 = vst [vmem:[#allocation17_spill] sm:$0xff] %v7284_v2  ;;  %v2980_v40 = vsel %vm2406_vm2, %v7284_v2, 0.0 }
 0x213   : > { %2981 = vadd.xlane.f32.xlu1 %v2980_v40 }
 0x220   : > { %v2793_v37 = vpop.xlane.xlu0 %2792 }
 0x221   : > { %6203 = vrcp.f32 %v2793_v37 }
 0x224   : > { %v2799_v22 = vpop.xlane.xlu0 %2798  ;;  %v2796_v0 = vpop.xlane.xlu1 %2795 }
 0x225   : > { %6205 = vrcp.f32 %v2796_v0 }
 0x226   : > { %6207 = vrcp.f32 %v2799_v22  ;;  %v6045_v22 = vld [vmem:[%s7047_s9 + $0x10] sm:$0xff]  }
 0x228   : > { %v2805_v33 = vpop.xlane.xlu0 %2804  ;;  %v2802_v41 = vpop.xlane.xlu1 %2801 }
 0x229   : > { %6209 = vrcp.f32 %v2802_v41 }
 0x22a   : > { %6211 = vrcp.f32 %v2805_v33 }
 0x22b   : > { %v6204_v34 = vpop.eup %6203 }
 0x22c   : > { %v2811_v58 = vpop.xlane.xlu0 %2810  ;;  %v2808_v46 = vpop.xlane.xlu1 %2807  ;;  %v2984_v40 = vmul.f32 %v6204_v34, %v6965_v63  ;;  %v6046_v63 = vld [vmem:[%s7047_s9 + $0x18] sm:$0xff]  }
 0x22d   : > { %6213 = vrcp.f32 %v2808_v46 }
 0x22e   : > { %6215 = vrcp.f32 %v2811_v58 }
 0x22f   : > { %v6206_v1 = vpop.eup %6205 }
 0x230   : > { %v2817_v13 = vpop.xlane.xlu0 %2816  ;;  %v2814_v2 = vpop.xlane.xlu1 %2813  ;;  %v2986_v37 = vmul.f32 %v6206_v1, %v6973_v8 }
 0x231   : > { %v6208_v0 = vpop.eup %6207  ;;  %6217 = vrcp.f32 %v2814_v2 }
 0x232   : > { %v3111_v47 = vpack.c.bf16 %v2986_v37, %v2984_v40  ;;  %6219 = vrcp.f32 %v2817_v13  ;;  %v2988_v61 = vmul.f32 %v6208_v0, %v6970_v52 }
 0x233   : > { %v6210_v38 = vpop.eup %6209 }
 0x234   : > { %v2823_v33 = vpop.xlane.xlu0 %2822  ;;  %v2820_v41 = vpop.xlane.xlu1 %2819  ;;  %v2990_v46 = vmul.f32 %v6210_v38, %v6980_v4  ;;  %5780 = vmatmul.mubr.msk.bf16.vlgmr.msra.gmra.mrb[64].mxu0 %vm2406_vm2, %v3111_v47 }
 0x235   : > { %v6212_v58 = vpop.eup %6211  ;;  %6221 = vrcp.f32 %v2820_v41  ;;  %5790 = vmatpush3.bf16.msra.mxu0 %v6045_v22  ;;  %5791 = vmatprep.mubr.msk.bf16.mxu0 %vm6340_vm0, %v7692_v25  ;;  %v6048_v22 = vld [vmem:[%s7047_s9 + $0x28] sm:$0xff]  }
 0x236   : > { %v3112_v8 = vpack.c.bf16 %v2990_v46, %v2988_v61  ;;  %5801 = vmatprep.subr.bf16.mxu0 %v7692_v25  ;;  %6223 = vrcp.f32 %v2823_v33  ;;  %v2992_v52 = vmul.f32 %v6212_v58, %v6983_v51  ;;  %v6047_v61 = vld [vmem:[%s7047_s9 + $0x20] sm:$0xff]  }
 0x237   : > { %v6214_v34 = vpop.eup %6213 }
 0x238   : > { %v2829_v2 = vpop.xlane.xlu0 %2828  ;;  %v2826_v1 = vpop.xlane.xlu1 %2825  ;;  %v2994_v4 = vmul.f32 %v6214_v34, %v6990_v55  ;;  %5786 = vmatmul.mubr.msk.bf16.vlgmr.msra.gmra.mrb[64].mxu1 %vm2406_vm2, %v3112_v8  ;;  %v6049_v8 = vld [vmem:[%s7047_s9 + $0x30] sm:$0xff]  }
 0x239   : > { %v6216_v38 = vpop.eup %6215  ;;  %5796 = vmatpush3.bf16.msra.mxu1 %v6046_v63  ;;  %6225 = vrcp.f32 %v2826_v1  ;;  %5797 = vmatprep.mubr.msk.bf16.mxu1 %vm6340_vm0, %v7692_v25 }
 0x23a   : > { %v3113_v47 = vpack.c.bf16 %v2994_v4, %v2992_v52  ;;  %5807 = vmatprep.subr.bf16.mxu1 %v7692_v25  ;;  %6227 = vrcp.f32 %v2829_v2  ;;  %v2996_v51 = vmul.f32 %v6216_v38, %v6993_v5  ;;  %v6050_v38 = vld [vmem:[%s7047_s9 + $0x38] sm:$0xff]  }
 0x23b   : > { %v6218_v13 = vpop.eup %6217 }
 0x23c   : > { %v2835_v40 = vpop.xlane.xlu0 %2834  ;;  %v2832_v37 = vpop.xlane.xlu1 %2831  ;;  %v2998_v55 = vmul.f32 %v6218_v13, %v7000_v45  ;;  %5792 = vmatmul.mubr.msk.bf16.vlgmr.msra.gmra.mrb[68].mxu0 %vm2406_vm2, %v3113_v47 }
 0x23d   : > { %v6220_v0 = vpop.eup %6219  ;;  %6229 = vrcp.f32 %v2832_v37  ;;  %5802 = vmatpush3.bf16.msra.mxu0 %v6047_v61  ;;  %5803 = vmatprep.mubr.msk.bf16.mxu0 %vm6340_vm0, %v7692_v25 }
 0x23e   : > { %v3114_v33 = vpack.c.bf16 %v2998_v55, %v2996_v51  ;;  %5813 = vmatprep.subr.bf16.mxu0 %v7692_v25  ;;  %6231 = vrcp.f32 %v2835_v40  ;;  %v3000_v5 = vmul.f32 %v6220_v0, %v7003_v35  ;;  %v6051_v51 = vld [vmem:[%s7047_s9 + $0x40] sm:$0xff]  }
 0x23f   : > { %v6222_v41 = vpop.eup %6221 }
 0x240   : > { %v2841_v46 = vpop.xlane.xlu0 %2840  ;;  %v2838_v58 = vpop.xlane.xlu1 %2837  ;;  %v3002_v45 = vmul.f32 %v6222_v41, %v7010_v27  ;;  %5798 = vmatmul.mubr.msk.bf16.vlgmr.msra.gmra.mrb[68].mxu1 %vm2406_vm2, %v3114_v33 }
 0x241   : > { %v6224_v63 = vpop.eup %6223  ;;  %5808 = vmatpush3.bf16.msra.mxu1 %v6048_v22  ;;  %6233 = vrcp.f32 %v2838_v58  ;;  %5809 = vmatprep.mubr.msk.bf16.mxu1 %vm6340_vm0, %v7692_v25 }
 0x242   : > { %v3115_v34 = vpack.c.bf16 %v3002_v45, %v3000_v5  ;;  %5819 = vmatprep.subr.bf16.mxu1 %v7692_v25  ;;  %6235 = vrcp.f32 %v2841_v46  ;;  %v3004_v35 = vmul.f32 %v6224_v63, %v7013_v53  ;;  %v6052_v46 = vld [vmem:[%s7047_s9 + $0x48] sm:$0xff]  }
 0x243   : > { %v6226_v2 = vpop.eup %6225 }
 0x244   : > { %v2847_v1 = vpop.xlane.xlu0 %2846  ;;  %v2844_v52 = vpop.xlane.xlu1 %2843  ;;  %v3006_v27 = vmul.f32 %v6226_v2, %v7020_v10  ;;  %5804 = vmatmul.mubr.msk.bf16.vlgmr.msra.gmra.mrb[72].mxu0 %vm2406_vm2, %v3115_v34  ;;  %v6053_v34 = vld [vmem:[%s7047_s9 + $0x50] sm:$0xff]  }
 0x245   : > { %v6228_v4 = vpop.eup %6227  ;;  %6237 = vrcp.f32 %v2844_v52  ;;  %5814 = vmatpush3.bf16.msra.mxu0 %v6049_v8  ;;  %5815 = vmatprep.mubr.msk.bf16.mxu0 %vm6340_vm0, %v7692_v25 }
 0x246   : > { %v3116_v61 = vpack.c.bf16 %v3006_v27, %v3004_v35  ;;  %5825 = vmatprep.subr.bf16.mxu0 %v7692_v25  ;;  %6239 = vrcp.f32 %v2847_v1  ;;  %v3008_v53 = vmul.f32 %v6228_v4, %v7023_v57  ;;  %v6054_v4 = vld [vmem:[%s7047_s9 + $0x58] sm:$0xff]  }
 0x247   : > { %v6230_v47 = vpop.eup %6229 }
 0x248   : > { %v2853_v13 = vpop.xlane.xlu0 %2852  ;;  %v2850_v40 = vpop.xlane.xlu1 %2849  ;;  %v3010_v10 = vmul.f32 %v6230_v47, %v7030_v39  ;;  %5810 = vmatmul.mubr.msk.bf16.vlgmr.msra.gmra.mrb[72].mxu1 %vm2406_vm2, %v3116_v61 }
 0x249   : > { %v6232_v37 = vpop.eup %6231  ;;  %5820 = vmatpush3.bf16.msra.mxu1 %v6050_v38  ;;  %6241 = vrcp.f32 %v2850_v40  ;;  %5821 = vmatprep.mubr.msk.bf16.mxu1 %vm6340_vm0, %v7692_v25 }
 0x24a   : > { %v3117_v55 = vpack.c.bf16 %v3010_v10, %v3008_v53  ;;  %5831 = vmatprep.subr.bf16.mxu1 %v7692_v25  ;;  %6243 = vrcp.f32 %v2853_v13  ;;  %v3012_v57 = vmul.f32 %v6232_v37, %v7033_v30  ;;  %v6055_v53 = vld [vmem:[%s7047_s9 + $0x60] sm:$0xff]  }
 0x24b   : > { %v6234_v0 = vpop.eup %6233 }
 0x24c   : > { %v2859_v22 = vpop.xlane.xlu0 %2858  ;;  %v2856_v33 = vpop.xlane.xlu1 %2855  ;;  %v3014_v39 = vmul.f32 %v6234_v0, %v7040_v28  ;;  %5816 = vmatmul.mubr.msk.bf16.vlgmr.msra.gmra.mrb[76].mxu0 %vm2406_vm2, %v3117_v55 }
 0x24d   : > { %v6236_v41 = vpop.eup %6235  ;;  %6245 = vrcp.f32 %v2856_v33  ;;  %5826 = vmatpush3.bf16.msra.mxu0 %v6051_v51  ;;  %5827 = vmatprep.mubr.msk.bf16.mxu0 %vm6340_vm0, %v7692_v25 }
 0x24e   : > { %v3118_v58 = vpack.c.bf16 %v3014_v39, %v3012_v57  ;;  %5837 = vmatprep.subr.bf16.mxu0 %v7692_v25  ;;  %6247 = vrcp.f32 %v2859_v22  ;;  %v3016_v30 = vmul.f32 %v6236_v41, %v7050_v31  ;;  %v6056_v22 = vld [vmem:[%s7047_s9 + $0x68] sm:$0xff]  }
 0x24f   : > { %v6238_v5 = vpop.eup %6237 }
 0x250   : > { %v2865_v45 = vpop.xlane.xlu0 %2864  ;;  %v2862_v63 = vpop.xlane.xlu1 %2861  ;;  %v3018_v28 = vmul.f32 %v6238_v5, %v7057_v50  ;;  %5822 = vmatmul.mubr.msk.bf16.vlgmr.msra.gmra.mrb[76].mxu1 %vm2406_vm2, %v3118_v58  ;;  %v6057_v58 = vld [vmem:[%s7047_s9 + $0x70] sm:$0xff]  }
 0x251   : > { %v6240_v8 = vpop.eup %6239  ;;  %5832 = vmatpush3.bf16.msra.mxu1 %v6052_v46  ;;  %6249 = vrcp.f32 %v2862_v63  ;;  %5833 = vmatprep.mubr.msk.bf16.mxu1 %vm6340_vm0, %v7692_v25 }
 0x252   : > { %v3119_v2 = vpack.c.bf16 %v3018_v28, %v3016_v30  ;;  %5843 = vmatprep.subr.bf16.mxu1 %v7692_v25  ;;  %6251 = vrcp.f32 %v2865_v45  ;;  %v3020_v31 = vmul.f32 %v6240_v8, %v7062_v49  ;;  %v6058_v8 = vld [vmem:[%s7047_s9 + $0x78] sm:$0xff]  }
 0x253   : > { %v6242_v1 = vpop.eup %6241 }
 0x254   : > { %v2871_v52 = vpop.xlane.xlu0 %2870  ;;  %v2868_v35 = vpop.xlane.xlu1 %2867  ;;  %v3022_v50 = vmul.f32 %v6242_v1, %v7069_v9  ;;  %5828 = vmatmul.mubr.msk.bf16.vlgmr.msra.gmra.mrb[80].mxu0 %vm2406_vm2, %v3119_v2 }
 0x255   : > { %v6244_v27 = vpop.eup %6243  ;;  %6253 = vrcp.f32 %v2868_v35  ;;  %5838 = vmatpush3.bf16.msra.mxu0 %v6053_v34  ;;  %5839 = vmatprep.mubr.msk.bf16.mxu0 %vm6340_vm0, %v7692_v25 }
 0x256   : > { %v3120_v38 = vpack.c.bf16 %v3022_v50, %v3020_v31  ;;  %5849 = vmatprep.subr.bf16.mxu0 %v7692_v25  ;;  %6255 = vrcp.f32 %v2871_v52  ;;  %v3024_v49 = vmul.f32 %v6244_v27, %v7073_v18  ;;  %v6059_v31 = vld [vmem:[%s7047_s9 + $0x80] sm:$0xff]  }
 0x257   : > { %v6246_v61 = vpop.eup %6245 }
 0x258   : > { %v2877_v47 = vpop.xlane.xlu0 %2876  ;;  %v2874_v13 = vpop.xlane.xlu1 %2873  ;;  %v3026_v9 = vmul.f32 %v6246_v61, %v7080_v44  ;;  %5834 = vmatmul.mubr.msk.bf16.vlgmr.msra.gmra.mrb[80].mxu1 %vm2406_vm2, %v3120_v38 }
 0x259   : > { %v6248_v40 = vpop.eup %6247  ;;  %5844 = vmatpush3.bf16.msra.mxu1 %v6054_v4  ;;  %6257 = vrcp.f32 %v2874_v13  ;;  %5845 = vmatprep.mubr.msk.bf16.mxu1 %vm6340_vm0, %v7692_v25 }
 0x25a   : > { %v3121_v10 = vpack.c.bf16 %v3026_v9, %v3024_v49  ;;  %5855 = vmatprep.subr.bf16.mxu1 %v7692_v25  ;;  %6259 = vrcp.f32 %v2877_v47  ;;  %v3028_v18 = vmul.f32 %v6248_v40, %v7083_v11  ;;  %v6060_v47 = vld [vmem:[%s7047_s9 + $0x88] sm:$0xff]  }
 0x25b   : > { %v6250_v37 = vpop.eup %6249 }
 0x25c   : > { %v2883_v51 = vpop.xlane.xlu0 %2882  ;;  %v2880_v55 = vpop.xlane.xlu1 %2879  ;;  %v3030_v44 = vmul.f32 %v6250_v37, %v7090_v56  ;;  %5840 = vmatmul.mubr.msk.bf16.vlgmr.msra.gmra.mrb[84].mxu0 %vm2406_vm2, %v3121_v10  ;;  %v6061_v10 = vld [vmem:[%s7047_s9 + $0x90] sm:$0xff]  }
 0x25d   : > { %v6252_v0 = vpop.eup %6251  ;;  %6261 = vrcp.f32 %v2880_v55  ;;  %5850 = vmatpush3.bf16.msra.mxu0 %v6055_v53  ;;  %5851 = vmatprep.mubr.msk.bf16.mxu0 %vm6340_vm0, %v7692_v25 }
 0x25e   : > { %v3122_v33 = vpack.c.bf16 %v3030_v44, %v3028_v18  ;;  %5861 = vmatprep.subr.bf16.mxu0 %v7692_v25  ;;  %6263 = vrcp.f32 %v2883_v51  ;;  %v3032_v11 = vmul.f32 %v6252_v0, %v7093_v59  ;;  %v6062_v0 = vld [vmem:[%s7047_s9 + $0x98] sm:$0xff]  }
 0x25f   : > { %v6254_v57 = vpop.eup %6253 }
 0x260   : > { %v2889_v39 = vpop.xlane.xlu0 %2888  ;;  %v2886_v41 = vpop.xlane.xlu1 %2885  ;;  %v3034_v56 = vmul.f32 %v6254_v57, %v7100_v14  ;;  %5846 = vmatmul.mubr.msk.bf16.vlgmr.msra.gmra.mrb[84].mxu1 %vm2406_vm2, %v3122_v33 }
 0x261   : > { %v6256_v46 = vpop.eup %6255  ;;  %5856 = vmatpush3.bf16.msra.mxu1 %v6056_v22  ;;  %6265 = vrcp.f32 %v2886_v41  ;;  %5857 = vmatprep.mubr.msk.bf16.mxu1 %vm6340_vm0, %v7692_v25 }
 0x262   : > { %v3123_v5 = vpack.c.bf16 %v3034_v56, %v3032_v11  ;;  %5867 = vmatprep.subr.bf16.mxu1 %v7692_v25  ;;  %6267 = vrcp.f32 %v2889_v39  ;;  %v3036_v59 = vmul.f32 %v6256_v46, %v7103_v15  ;;  %v6063_v11 = vld [vmem:[%s7047_s9 + $0xa0] sm:$0xff]  }
 0x263   : > { %v6258_v45 = vpop.eup %6257 }
 0x264   : > { %v2895_v63 = vpop.xlane.xlu0 %2894  ;;  %v2892_v30 = vpop.xlane.xlu1 %2891  ;;  %v3038_v14 = vmul.f32 %v6258_v45, %v7110_v17  ;;  %5852 = vmatmul.mubr.msk.bf16.vlgmr.msra.gmra.mrb[88].mxu0 %vm2406_vm2, %v3123_v5 }
 0x265   : > { %v6260_v28 = vpop.eup %6259  ;;  %6269 = vrcp.f32 %v2892_v30  ;;  %5862 = vmatpush3.bf16.msra.mxu0 %v6057_v58  ;;  %5863 = vmatprep.mubr.msk.bf16.mxu0 %vm6340_vm0, %v7692_v25 }
 0x266   : > { %v3124_v34 = vpack.c.bf16 %v3038_v14, %v3036_v59  ;;  %5873 = vmatprep.subr.bf16.mxu0 %v7692_v25  ;;  %6271 = vrcp.f32 %v2895_v63  ;;  %v3040_v15 = vmul.f32 %v6260_v28, %v7113_v42  ;;  %v6064_v63 = vld [vmem:[%s7047_s9 + $0xa8] sm:$0xff]  }
 0x267   : > { %v6262_v2 = vpop.eup %6261 }
 0x268   : > { %v2901_v1 = vpop.xlane.xlu0 %2900  ;;  %v2898_v52 = vpop.xlane.xlu1 %2897  ;;  %v3042_v17 = vmul.f32 %v6262_v2, %v7120_v48  ;;  %5858 = vmatmul.mubr.msk.bf16.vlgmr.msra.gmra.mrb[88].mxu1 %vm2406_vm2, %v3124_v34  ;;  %v6065_v2 = vld [vmem:[%s7047_s9 + $0xb0] sm:$0xff]  }
 0x269   : > { %v6264_v35 = vpop.eup %6263  ;;  %5868 = vmatpush3.bf16.msra.mxu1 %v6058_v8  ;;  %6273 = vrcp.f32 %v2898_v52  ;;  %5869 = vmatprep.mubr.msk.bf16.mxu1 %vm6340_vm0, %v7692_v25 }
 0x26a   : > { %v3125_v50 = vpack.c.bf16 %v3042_v17, %v3040_v15  ;;  %5879 = vmatprep.subr.bf16.mxu1 %v7692_v25  ;;  %6275 = vrcp.f32 %v2901_v1  ;;  %v3044_v42 = vmul.f32 %v6264_v35, %v7123_v54 }
 0x26b   : > { %v6266_v27 = vpop.eup %6265 }
 0x26c   : > { %v2907_v4 = vpop.xlane.xlu0 %2906  ;;  %v2904_v38 = vpop.xlane.xlu1 %2903  ;;  %v3046_v48 = vmul.f32 %v6266_v27, %v7130_v36  ;;  %5864 = vmatmul.mubr.msk.bf16.vlgmr.msra.gmra.mrb[92].mxu0 %vm2406_vm2, %v3125_v50 }
 0x26d   : > { %v6268_v61 = vpop.eup %6267  ;;  %6277 = vrcp.f32 %v2904_v38  ;;  %5874 = vmatpush3.bf16.msra.mxu0 %v6059_v31  ;;  %5875 = vmatprep.mubr.msk.bf16.mxu0 %vm6340_vm0, %v7692_v25  ;;  %v7726_v31 = vld [vmem:[#allocation3_spill] sm:$0xff] }
 0x26e   : > { %v3126_v13 = vpack.c.bf16 %v3046_v48, %v3044_v42  ;;  %5885 = vmatprep.subr.bf16.mxu0 %v7692_v25  ;;  %6279 = vrcp.f32 %v2907_v4  ;;  %v3048_v54 = vmul.f32 %v6268_v61, %v7133_v24  ;;  %v6066_v4 = vld [vmem:[%s7047_s9 + $0xb8] sm:$0xff]  }
 0x26f   : > { %v6270_v49 = vpop.eup %6269 }
 0x270   : > { %v2913_v9 = vpop.xlane.xlu0 %2912  ;;  %v2910_v40 = vpop.xlane.xlu1 %2909  ;;  %v3050_v36 = vmul.f32 %v6270_v49, %v7140_v43  ;;  %5870 = vmatmul.mubr.msk.bf16.vlgmr.msra.gmra.mrb[92].mxu1 %vm2406_vm2, %v3126_v13  ;;  %v7728_v49 = vld [vmem:[#allocation6_spill] sm:$0xff] }
 0x271   : > { %v6272_v53 = vpop.eup %6271  ;;  %5880 = vmatpush3.bf16.msra.mxu1 %v6060_v47  ;;  %6281 = vrcp.f32 %v2910_v40  ;;  %5881 = vmatprep.mubr.msk.bf16.mxu1 %vm6340_vm0, %v7692_v25  ;;  %v7727_v47 = vld [vmem:[#allocation5_spill] sm:$0xff] }
 0x272   : > { %v3127_v37 = vpack.c.bf16 %v3050_v36, %v3048_v54  ;;  %5891 = vmatprep.subr.bf16.mxu1 %v7692_v25  ;;  %6283 = vrcp.f32 %v2913_v9  ;;  %v3052_v24 = vmul.f32 %v6272_v53, %v7143_v29  ;;  %v6067_v54 = vld [vmem:[%s7047_s9 + $0xc0] sm:$0xff]  }
 0x273   : > { %v6274_v51 = vpop.eup %6273 }
 0x274   : > { %v2919_v55 = vpop.xlane.xlu0 %2918  ;;  %v2916_v18 = vpop.xlane.xlu1 %2915  ;;  %v3054_v43 = vmul.f32 %v6274_v51, %v7150_v12  ;;  %5876 = vmatmul.mubr.msk.bf16.vlgmr.msra.gmra.mrb[96].mxu0 %vm2406_vm2, %v3127_v37  ;;  %v7729_v51 = vld [vmem:[#allocation8_spill] sm:$0xff] }
 0x275   : > { %v6276_v44 = vpop.eup %6275  ;;  %6285 = vrcp.f32 %v2916_v18  ;;  %5886 = vmatpush3.bf16.msra.mxu0 %v6061_v10  ;;  %5887 = vmatprep.mubr.msk.bf16.mxu0 %vm6340_vm0, %v7692_v25  ;;  %v7730_v18 = vld [vmem:[#allocation7_spill] sm:$0xff] }
 0x276   : > { %v3128_v22 = vpack.c.bf16 %v3054_v43, %v3052_v24  ;;  %5897 = vmatprep.subr.bf16.mxu0 %v7692_v25  ;;  %6287 = vrcp.f32 %v2919_v55  ;;  %v3056_v29 = vmul.f32 %v6276_v44, %v7153_v6  ;;  %v6068_v44 = vld [vmem:[%s7047_s9 + $0xc8] sm:$0xff]  }
 0x277   : > { %v6278_v33 = vpop.eup %6277 }
 0x278   : > { %v2925_v57 = vpop.xlane.xlu0 %2924  ;;  %v2922_v39 = vpop.xlane.xlu1 %2921  ;;  %v3058_v12 = vmul.f32 %v6278_v33, %v7160_v20  ;;  %5882 = vmatmul.mubr.msk.bf16.vlgmr.msra.gmra.mrb[96].mxu1 %vm2406_vm2, %v3128_v22 }
 0x279   : > { %v6280_v41 = vpop.eup %6279  ;;  %5892 = vmatpush3.bf16.msra.mxu1 %v6062_v0  ;;  %6289 = vrcp.f32 %v2922_v39  ;;  %5893 = vmatprep.mubr.msk.bf16.mxu1 %vm6340_vm0, %v7692_v25  ;;  %v7731_v39 = vld [vmem:[#allocation9_spill] sm:$0xff] }
 0x27a   : > { %v3129_v56 = vpack.c.bf16 %v3058_v12, %v3056_v29  ;;  %5903 = vmatprep.subr.bf16.mxu1 %v7692_v25  ;;  %6291 = vrcp.f32 %v2925_v57  ;;  %v3060_v6 = vmul.f32 %v6280_v41, %v7163_v60 }
 0x27b   : > { %v6282_v46 = vpop.eup %6281 }
 0x27c   : > { %v2931_v58 = vpop.xlane.xlu0 %2930  ;;  %v2928_v5 = vpop.xlane.xlu1 %2927  ;;  %v3062_v20 = vmul.f32 %v6282_v46, %v7170_v32  ;;  %5888 = vmatmul.mubr.msk.bf16.vlgmr.msra.gmra.mrb[100].mxu0 %vm2406_vm2, %v3129_v56  ;;  %v7724_v32 = vld [vmem:[#allocation2_spill] sm:$0xff] }
 0x27d   : > { %v6284_v45 = vpop.eup %6283  ;;  %6293 = vrcp.f32 %v2928_v5  ;;  %5898 = vmatpush3.bf16.msra.mxu0 %v6063_v11  ;;  %5899 = vmatprep.mubr.msk.bf16.mxu0 %vm6340_vm0, %v7692_v25  ;;  %v6069_v11 = vld [vmem:[%s7047_s9 + $0xd0] sm:$0xff]  }
 0x27e   : > { %v3130_v30 = vpack.c.bf16 %v3062_v20, %v3060_v6  ;;  %5909 = vmatprep.subr.bf16.mxu0 %v7692_v25  ;;  %6295 = vrcp.f32 %v2931_v58  ;;  %v3064_v60 = vmul.f32 %v6284_v45, %v7173_v21  ;;  %v7725_v21 = vld [vmem:[#allocation4_spill] sm:$0xff]  ;;  %v7732_v6 = vld [vmem:[#allocation10_spill] sm:$0xff] }
 0x27f   : > { %v6286_v59 = vpop.eup %6285 }
 0x280   : > { %v2937_v14 = vpop.xlane.xlu0 %2936  ;;  %v2934_v28 = vpop.xlane.xlu1 %2933  ;;  %v3066_v8 = vmul.f32 %v6286_v59, %v7724_v32  ;;  %5894 = vmatmul.mubr.msk.bf16.vlgmr.msra.gmra.mrb[100].mxu1 %vm2406_vm2, %v3130_v30 }
 0x281   : > { %v6288_v34 = vpop.eup %6287  ;;  %5904 = vmatpush3.bf16.msra.mxu1 %v6064_v63  ;;  %6297 = vrcp.f32 %v2934_v28  ;;  %5905 = vmatprep.mubr.msk.bf16.mxu1 %vm6340_vm0, %v7692_v25  ;;  %v6070_v63 = vld [vmem:[%s7047_s9 + $0xd8] sm:$0xff]  }
 0x282   : > { %v3131_v1 = vpack.c.bf16 %v3066_v8, %v3064_v60  ;;  %5915 = vmatprep.subr.bf16.mxu1 %v7692_v25  ;;  %6299 = vrcp.f32 %v2937_v14  ;;  %v3068_v35 = vmul.f32 %v6288_v34, %v7725_v21  ;;  %v6071_v8 = vld [vmem:[%s7047_s9 + $0xe0] sm:$0xff]  }
 0x283   : > { %v6290_v52 = vpop.eup %6289 }
 0x284   : > { %v2943_v15 = vpop.xlane.xlu0 %2942  ;;  %v2940_v17 = vpop.xlane.xlu1 %2939  ;;  %v3070_v50 = vmul.f32 %v6290_v52, %v7726_v31  ;;  %5900 = vmatmul.mubr.msk.bf16.vlgmr.msra.gmra.mrb[104].mxu0 %vm2406_vm2, %v3131_v1 }
 0x285   : > { %v6292_v27 = vpop.eup %6291  ;;  %6301 = vrcp.f32 %v2940_v17  ;;  %5910 = vmatpush3.bf16.msra.mxu0 %v6065_v2  ;;  %5911 = vmatprep.mubr.msk.bf16.mxu0 %vm6340_vm0, %v7692_v25  ;;  %v6072_v17 = vld [vmem:[%s7047_s9 + $0xe8] sm:$0xff]  }
 0x286   : > { %v3132_v38 = vpack.c.bf16 %v3070_v50, %v3068_v35  ;;  %5921 = vmatprep.subr.bf16.mxu0 %v7692_v25  ;;  %6303 = vrcp.f32 %v2943_v15  ;;  %v3072_v13 = vmul.f32 %v6292_v27, %v7727_v47  ;;  %v7733_v50 = vld [vmem:[#allocation12_spill] sm:$0xff]  ;;  %v7735_v47 = vld [vmem:[#allocation13_spill] sm:$0xff] }
 0x287   : > { %v6294_v42 = vpop.eup %6293 }
 0x288   : > { %v2949_v48 = vpop.xlane.xlu0 %2948  ;;  %v2946_v61 = vpop.xlane.xlu1 %2945  ;;  %v3074_v9 = vmul.f32 %v6294_v42, %v7728_v49  ;;  %5906 = vmatmul.mubr.msk.bf16.vlgmr.msra.gmra.mrb[104].mxu1 %vm2406_vm2, %v3132_v38  ;;  %v6074_v49 = vld [vmem:[%s7047_s9 + $0xf8] sm:$0xff]  }
 0x289   : > { %v6296_v40 = vpop.eup %6295  ;;  %5916 = vmatpush3.bf16.msra.mxu1 %v6066_v4  ;;  %6305 = vrcp.f32 %v2946_v61  ;;  %5917 = vmatprep.mubr.msk.bf16.mxu1 %vm6340_vm0, %v7692_v25  ;;  %v6073_v4 = vld [vmem:[%s7047_s9 + $0xf0] sm:$0xff]  }
 0x28a   : > { %v3133_v36 = vpack.c.bf16 %v3074_v9, %v3072_v13  ;;  %5927 = vmatprep.subr.bf16.mxu1 %v7692_v25  ;;  %6307 = vrcp.f32 %v2949_v48  ;;  %v3076_v55 = vmul.f32 %v6296_v40, %v7729_v51  ;;  %v7734_v48 = vld [vmem:[#allocation11_spill] sm:$0xff] }
 0x28b   : > { %v6298_v53 = vpop.eup %6297 }
 0x28c   : > { %v2955_v10 = vpop.xlane.xlu0 %2954  ;;  %v2952_v37 = vpop.xlane.xlu1 %2951  ;;  %v3078_v24 = vmul.f32 %v6298_v53, %v7730_v18  ;;  %5912 = vmatmul.mubr.msk.bf16.vlgmr.msra.gmra.mrb[108].mxu0 %vm2406_vm2, %v3133_v36  ;;  %v7736_v36 = vld [vmem:[#allocation14_spill] sm:$0xff]  ;;  %v7738_v18 = vld [vmem:[#allocation15_spill] sm:$0xff] }
 0x28d   : > { %v6300_v43 = vpop.eup %6299  ;;  %6309 = vrcp.f32 %v2952_v37  ;;  %5922 = vmatpush3.bf16.msra.mxu0 %v6067_v54  ;;  %5923 = vmatprep.mubr.msk.bf16.mxu0 %vm6340_vm0, %v7692_v25 }
 0x28e   : > { %v3134_v0 = vpack.c.bf16 %v3078_v24, %v3076_v55  ;;  %5933 = vmatprep.subr.bf16.mxu0 %v7692_v25  ;;  %6311 = vrcp.f32 %v2955_v10  ;;  %v3080_v29 = vmul.f32 %v6300_v43, %v7731_v39  ;;  %v7737_v10 = vld [vmem:[#allocation16_spill] sm:$0xff]  ;;  %v7739_v43 = vld [vmem:[#allocation17_spill] sm:$0xff] }
 0x28f   : > { %v6302_v22 = vpop.eup %6301 }
 0x290   : > { %v2961_v33 = vpop.xlane.xlu0 %2960  ;;  %v2958_v57 = vpop.xlane.xlu1 %2957  ;;  %v3082_v12 = vmul.f32 %v6302_v22, %v7220_v7  ;;  %5918 = vmatmul.mubr.msk.bf16.vlgmr.msra.gmra.mrb[108].mxu1 %vm2406_vm2, %v3134_v0 }
 0x291   : > { %v6304_v41 = vpop.eup %6303  ;;  %5928 = vmatpush3.bf16.msra.mxu1 %v6068_v44  ;;  %6313 = vrcp.f32 %v2958_v57  ;;  %5929 = vmatprep.mubr.msk.bf16.mxu1 %vm6340_vm0, %v7692_v25 }
 0x292   : > { %v3135_v56 = vpack.c.bf16 %v3082_v12, %v3080_v29  ;;  %5939 = vmatprep.subr.bf16.mxu1 %v7692_v25  ;;  %6315 = vrcp.f32 %v2961_v33  ;;  %v3084_v20 = vmul.f32 %v6304_v41, %v7732_v6 }
 0x293   : > { %v6306_v46 = vpop.eup %6305 }
 0x294   : > { %v2967_v58 = vpop.xlane.xlu0 %2966  ;;  %v2964_v5 = vpop.xlane.xlu1 %2963  ;;  %v3086_v7 = vmul.f32 %v6306_v46, %v7230_v19  ;;  %5924 = vmatmul.mubr.msk.bf16.vlgmr.msra.gmra.mrb[112].mxu0 %vm2406_vm2, %v3135_v56 }
 0x295   : > { %v6308_v45 = vpop.eup %6307  ;;  %6317 = vrcp.f32 %v2964_v5  ;;  %5934 = vmatpush3.bf16.msra.mxu0 %v6069_v11  ;;  %5935 = vmatprep.mubr.msk.bf16.mxu0 %vm6340_vm0, %v7692_v25 }
 0x296   : > { %v3136_v30 = vpack.c.bf16 %v3086_v7, %v3084_v20  ;;  %5945 = vmatprep.subr.bf16.mxu0 %v7692_v25  ;;  %6319 = vrcp.f32 %v2967_v58  ;;  %v3088_v60 = vmul.f32 %v6308_v45, %v7233_v62 }
 0x297   : > { %v6310_v59 = vpop.eup %6309 }
 0x298   : > { %v2973_v14 = vpop.xlane.xlu0 %2972  ;;  %v2970_v28 = vpop.xlane.xlu1 %2969  ;;  %v3090_v19 = vmul.f32 %v6310_v59, %v7240_v3  ;;  %5930 = vmatmul.mubr.msk.bf16.vlgmr.msra.gmra.mrb[112].mxu1 %vm2406_vm2, %v3136_v30 }
 0x299   : > { %v6312_v32 = vpop.eup %6311  ;;  %5940 = vmatpush3.bf16.msra.mxu1 %v6070_v63  ;;  %6321 = vrcp.f32 %v2970_v28  ;;  %5941 = vmatprep.mubr.msk.bf16.mxu1 %vm6340_vm0, %v7692_v25 }
 0x29a   : > { %v3137_v34 = vpack.c.bf16 %v3090_v19, %v3088_v60  ;;  %5951 = vmatprep.subr.bf16.mxu1 %v7692_v25  ;;  %6323 = vrcp.f32 %v2973_v14  ;;  %v3092_v62 = vmul.f32 %v6312_v32, %v7243_v16 }
 0x29b   : > { %v6314_v2 = vpop.eup %6313 }
 0x29c   : > { %v2979_v1 = vpop.xlane.xlu0 %2978  ;;  %v2976_v52 = vpop.xlane.xlu1 %2975  ;;  %v3094_v3 = vmul.f32 %v6314_v2, %v7250_v26  ;;  %5936 = vmatmul.mubr.msk.bf16.vlgmr.msra.gmra.mrb[116].mxu0 %vm2406_vm2, %v3137_v34 }
 0x29d   : > { %v6316_v15 = vpop.eup %6315  ;;  %6325 = vrcp.f32 %v2976_v52  ;;  %5946 = vmatpush3.bf16.msra.mxu0 %v6071_v8  ;;  %5947 = vmatprep.mubr.msk.bf16.mxu0 %vm6340_vm0, %v7692_v25 }
 0x29e   : > { %6327 = vrcp.f32 %v2979_v1  ;;  %v3138_v21 = vpack.c.bf16 %v3094_v3, %v3092_v62  ;;  %5957 = vmatprep.subr.bf16.mxu0 %v7692_v25  ;;  %v3096_v16 = vmul.f32 %v6316_v15, %v7253_v23 }
 0x29f   : > { %v6318_v35 = vpop.eup %6317 }
 0x2a0   : > { %v2982_v31 = vpop.xlane.xlu1 %2981  ;;  %v3098_v26 = vmul.f32 %v6318_v35, %v7733_v50  ;;  %5942 = vmatmul.mubr.msk.bf16.vlgmr.msra.gmra.mrb[116].mxu1 %vm2406_vm2, %v3138_v21  ;;  %v6320_v27 = vpop.eup %6319 }
 0x2a1   : > { %6329 = vrcp.f32 %v2982_v31  ;;  %5952 = vmatpush3.bf16.msra.mxu1 %v6072_v17  ;;  %5953 = vmatprep.mubr.msk.bf16.mxu1 %vm6340_vm0, %v7692_v25  ;;  %v3100_v61 = vmul.f32 %v6320_v27, %v7734_v48 }
 0x2a2   : > { %v3139_v38 = vpack.c.bf16 %v3098_v26, %v3096_v16  ;;  %5963 = vmatprep.subr.bf16.mxu1 %v7692_v25 }
 0x2a3   : > { %v6322_v42 = vpop.eup %6321 }
 0x2a4   : > { %v3102_v23 = vmul.f32 %v6322_v42, %v7735_v47  ;;  %5948 = vmatmul.mubr.msk.bf16.vlgmr.msra.gmra.mrb[120].mxu0 %vm2406_vm2, %v3139_v38  ;;  %v6324_v13 = vpop.eup %6323 }
 0x2a5   : > { %5958 = vmatpush3.bf16.msra.mxu0 %v6073_v4  ;;  %5959 = vmatprep.mubr.msk.bf16.mxu0 %vm6340_vm0, %v7692_v25  ;;  %v3104_v53 = vmul.f32 %v6324_v13, %v7736_v36 }
 0x2a6   : > { %v3140_v9 = vpack.c.bf16 %v3102_v23, %v3100_v61 }
 0x2a7   : > { %v6326_v40 = vpop.eup %6325 }
 0x2a8   : > { %v6328_v54 = vpop.eup %6327  ;;  %v3106_v37 = vmul.f32 %v6326_v40, %v7737_v10  ;;  %5954 = vmatmul.mubr.msk.bf16.vlgmr.msra.gmra.mrb[120].mxu1 %vm2406_vm2, %v3140_v9 }
 0x2a9   : > { %5964 = vmatpush3.bf16.msra.mxu1 %v6074_v49  ;;  %5965 = vmatprep.mubr.msk.bf16.mxu1 %vm6340_vm0, %v7692_v25  ;;  %v3108_v24 = vmul.f32 %v6328_v54, %v7738_v18 }
 0x2aa   : > { %v3141_v55 = vpack.c.bf16 %v3106_v37, %v3104_v53 }
 0x2ab   : > { %v6330_v51 = vpop.eup %6329 }
 0x2ac   : > { %v3110_v44 = vmul.f32 %v6330_v51, %v7739_v43  ;;  %5960 = vmatmul.mubr.msk.bf16.vlgmr.msra.gmra.mrb[124].mxu0 %vm2406_vm2, %v3141_v55 }
 0x2ae   : > { %v3142_v0 = vpack.c.bf16 %v3110_v44, %v3108_v24 }
 0x2b0   : > { %5966 = vmatmul.mubr.msk.bf16.vlgmr.msra.gmra.mrb[124].mxu1 %vm2406_vm2, %v3142_v0 }
 0x307   : > { %v3186_v25 = vpop.f32.mrb[64].mxu0 }
 0x308   : > { %v5393_v22 = vpack.c.bf16 %v3186_v25, %v3186_v25  ;;  %v5781_v33 = vpop.f32.mrb[65].mxu0 }
 0x309   : > { %v3189_v57 = vpop.f32.mrb[66].mxu0 }
 0x30a   : > { %5000 = vst.msk [vmem:[%s7506_s12] sm:$0xf] %vm4999_vm3, %v5393_v22  ;;  %v5394_v39 = vpack.c.bf16 %v3189_v57, %v3189_v57  ;;  %v5782_v29 = vpop.f32.mrb[67].mxu0 }
 0x30b   : > { %v3236_v12 = vpop.f32.mrb[64].mxu1 }
 0x30c   : > { %5001 = vst.msk [vmem:[%s7506_s12 + $0x4] sm:$0xf] %vm4999_vm3, %v5394_v39  ;;  %v5395_v41 = vpack.c.bf16 %v3236_v12, %v3236_v12  ;;  %v5787_v11 = vpop.f32.mrb[65].mxu1 }
 0x30d   : > { %v3239_v56 = vpop.f32.mrb[66].mxu1 }
 0x30e   : > { %5002 = vst.msk [vmem:[%s7506_s12 + $0x8] sm:$0xf] %vm4999_vm3, %v5395_v41  ;;  %v5396_v46 = vpack.c.bf16 %v3239_v56, %v3239_v56  ;;  %v5788_v58 = vpop.f32.mrb[67].mxu1 }
 0x30f   : > { %v3286_v5 = vpop.f32.mrb[68].mxu0 }
 0x310   : > { %5003 = vst.msk [vmem:[%s7506_s12 + $0xc] sm:$0xf] %vm4999_vm3, %v5396_v46  ;;  %v5397_v6 = vpack.c.bf16 %v3286_v5, %v3286_v5  ;;  %v5793_v20 = vpop.f32.mrb[69].mxu0 }
 0x311   : > { %v3289_v7 = vpop.f32.mrb[70].mxu0 }
 0x312   : > { %5004 = vst.msk [vmem:[%s7506_s12 + $0x10] sm:$0xf] %vm4999_vm3, %v5397_v6  ;;  %v5398_v45 = vpack.c.bf16 %v3289_v7, %v3289_v7  ;;  %v5794_v63 = vpop.f32.mrb[71].mxu0 }
 0x313   : > { %v3336_v30 = vpop.f32.mrb[68].mxu1 }
 0x314   : > { %5005 = vst.msk [vmem:[%s7506_s12 + $0x14] sm:$0xf] %vm4999_vm3, %v5398_v45  ;;  %v5399_v59 = vpack.c.bf16 %v3336_v30, %v3336_v30  ;;  %v5799_v14 = vpop.f32.mrb[69].mxu1 }
 0x315   : > { %v3339_v28 = vpop.f32.mrb[70].mxu1 }
 0x316   : > { %5006 = vst.msk [vmem:[%s7506_s12 + $0x18] sm:$0xf] %vm4999_vm3, %v5399_v59  ;;  %v5400_v60 = vpack.c.bf16 %v3339_v28, %v3339_v28  ;;  %v5800_v19 = vpop.f32.mrb[71].mxu1 }
 0x317   : > { %v3386_v32 = vpop.f32.mrb[72].mxu0 }
 0x318   : > { %5007 = vst.msk [vmem:[%s7506_s12 + $0x1c] sm:$0xf] %vm4999_vm3, %v5400_v60  ;;  %v5401_v8 = vpack.c.bf16 %v3386_v32, %v3386_v32  ;;  %v5805_v34 = vpop.f32.mrb[73].mxu0 }
 0x319   : > { %v3389_v2 = vpop.f32.mrb[74].mxu0 }
 0x31a   : > { %5008 = vst.msk [vmem:[%s7506_s12 + $0x20] sm:$0xf] %vm4999_vm3, %v5401_v8  ;;  %v5402_v1 = vpack.c.bf16 %v3389_v2, %v3389_v2  ;;  %v5806_v52 = vpop.f32.mrb[75].mxu0 }
 0x31b   : > { %v3436_v62 = vpop.f32.mrb[72].mxu1 }
 0x31c   : > { %5009 = vst.msk [vmem:[%s7506_s12 + $0x24] sm:$0xf] %vm4999_vm3, %v5402_v1  ;;  %v5403_v3 = vpack.c.bf16 %v3436_v62, %v3436_v62  ;;  %v5811_v15 = vpop.f32.mrb[73].mxu1 }
 0x31d   : > { %v3439_v17 = vpop.f32.mrb[74].mxu1 }
 0x31e   : > { %5010 = vst.msk [vmem:[%s7506_s12 + $0x28] sm:$0xf] %vm4999_vm3, %v5403_v3  ;;  %v5404_v21 = vpack.c.bf16 %v3439_v17, %v3439_v17  ;;  %v5812_v35 = vpop.f32.mrb[75].mxu1 }
 0x31f   : > { %v3486_v31 = vpop.f32.mrb[76].mxu0 }
 0x320   : > { %5011 = vst.msk [vmem:[%s7506_s12 + $0x2c] sm:$0xf] %vm4999_vm3, %v5404_v21  ;;  %v5405_v16 = vpack.c.bf16 %v3486_v31, %v3486_v31  ;;  %v5817_v50 = vpop.f32.mrb[77].mxu0 }
 0x321   : > { %v3489_v26 = vpop.f32.mrb[78].mxu0 }
 0x322   : > { %5012 = vst.msk [vmem:[%s7506_s12 + $0x30] sm:$0xf] %vm4999_vm3, %v5405_v16  ;;  %v5406_v27 = vpack.c.bf16 %v3489_v26, %v3489_v26  ;;  %v5818_v4 = vpop.f32.mrb[79].mxu0 }
 0x323   : > { %v3536_v38 = vpop.f32.mrb[76].mxu1 }
 0x324   : > { %5013 = vst.msk [vmem:[%s7506_s12 + $0x34] sm:$0xf] %vm4999_vm3, %v5406_v27  ;;  %v5407_v42 = vpack.c.bf16 %v3536_v38, %v3536_v38  ;;  %v5823_v48 = vpop.f32.mrb[77].mxu1 }
 0x325   : > { %v3539_v61 = vpop.f32.mrb[78].mxu1 }
 0x326   : > { %5014 = vst.msk [vmem:[%s7506_s12 + $0x38] sm:$0xf] %vm4999_vm3, %v5407_v42  ;;  %v5408_v47 = vpack.c.bf16 %v3539_v61, %v3539_v61  ;;  %v5824_v23 = vpop.f32.mrb[79].mxu1 }
 0x327   : > { %v3586_v13 = vpop.f32.mrb[80].mxu0 }
 0x328   : > { %5015 = vst.msk [vmem:[%s7506_s12 + $0x3c] sm:$0xf] %vm4999_vm3, %v5408_v47  ;;  %v5409_v49 = vpack.c.bf16 %v3586_v13, %v3586_v13  ;;  %v5829_v9 = vpop.f32.mrb[81].mxu0 }
 0x329   : > { %v3589_v40 = vpop.f32.mrb[82].mxu0 }
 0x32a   : > { %5016 = vst.msk [vmem:[%s7506_s12 + $0x40] sm:$0xf] %vm4999_vm3, %v5409_v49  ;;  %v5410_v54 = vpack.c.bf16 %v3589_v40, %v3589_v40  ;;  %v5830_v36 = vpop.f32.mrb[83].mxu0 }
 0x32b   : > { %v3636_v53 = vpop.f32.mrb[80].mxu1 }
 0x32c   : > { %5017 = vst.msk [vmem:[%s7506_s12 + $0x44] sm:$0xf] %vm4999_vm3, %v5410_v54  ;;  %v5411_v10 = vpack.c.bf16 %v3636_v53, %v3636_v53  ;;  %v5835_v37 = vpop.f32.mrb[81].mxu1 }
 0x32d   : > { %v3639_v51 = vpop.f32.mrb[82].mxu1 }
 0x32e   : > { %5018 = vst.msk [vmem:[%s7506_s12 + $0x48] sm:$0xf] %vm4999_vm3, %v5411_v10  ;;  %v5412_v55 = vpack.c.bf16 %v3639_v51, %v3639_v51  ;;  %v5836_v18 = vpop.f32.mrb[83].mxu1 }
 0x32f   : > { %v3686_v24 = vpop.f32.mrb[84].mxu0 }
 0x330   : > { %5019 = vst.msk [vmem:[%s7506_s12 + $0x4c] sm:$0xf] %vm4999_vm3, %v5412_v55  ;;  %v5413_v43 = vpack.c.bf16 %v3686_v24, %v3686_v24  ;;  %v5841_v44 = vpop.f32.mrb[85].mxu0 }
 0x331   : > { %v3689_v0 = vpop.f32.mrb[86].mxu0 }
 0x332   : > { %5020 = vst.msk [vmem:[%s7506_s12 + $0x50] sm:$0xf] %vm4999_vm3, %v5413_v43  ;;  %v5414_v25 = vpack.c.bf16 %v3689_v0, %v3689_v0  ;;  %v5842_v22 = vpop.f32.mrb[87].mxu0 }
 0x333   : > { %v3736_v33 = vpop.f32.mrb[84].mxu1 }
 0x334   : > { %5021 = vst.msk [vmem:[%s7506_s12 + $0x54] sm:$0xf] %vm4999_vm3, %v5414_v25  ;;  %v5415_v57 = vpack.c.bf16 %v3736_v33, %v3736_v33  ;;  %v5847_v39 = vpop.f32.mrb[85].mxu1 }
 0x335   : > { %v3739_v29 = vpop.f32.mrb[86].mxu1 }
 0x336   : > { %5022 = vst.msk [vmem:[%s7506_s12 + $0x58] sm:$0xf] %vm4999_vm3, %v5415_v57  ;;  %v5416_v12 = vpack.c.bf16 %v3739_v29, %v3739_v29  ;;  %v5848_v41 = vpop.f32.mrb[87].mxu1 }
 0x337   : > { %v3786_v11 = vpop.f32.mrb[88].mxu0 }
 0x338   : > { %5023 = vst.msk [vmem:[%s7506_s12 + $0x5c] sm:$0xf] %vm4999_vm3, %v5416_v12  ;;  %v5417_v56 = vpack.c.bf16 %v3786_v11, %v3786_v11  ;;  %v5853_v46 = vpop.f32.mrb[89].mxu0 }
 0x339   : > { %v3789_v58 = vpop.f32.mrb[90].mxu0 }
 0x33a   : > { %5024 = vst.msk [vmem:[%s7506_s12 + $0x60] sm:$0xf] %vm4999_vm3, %v5417_v56  ;;  %v5418_v5 = vpack.c.bf16 %v3789_v58, %v3789_v58  ;;  %v5854_v6 = vpop.f32.mrb[91].mxu0 }
 0x33b   : > { %v3836_v20 = vpop.f32.mrb[88].mxu1 }
 0x33c   : > { %5025 = vst.msk [vmem:[%s7506_s12 + $0x64] sm:$0xf] %vm4999_vm3, %v5418_v5  ;;  %v5419_v7 = vpack.c.bf16 %v3836_v20, %v3836_v20  ;;  %v5859_v45 = vpop.f32.mrb[89].mxu1 }
 0x33d   : > { %v3839_v63 = vpop.f32.mrb[90].mxu1 }
 0x33e   : > { %5026 = vst.msk [vmem:[%s7506_s12 + $0x68] sm:$0xf] %vm4999_vm3, %v5419_v7  ;;  %v5420_v30 = vpack.c.bf16 %v3839_v63, %v3839_v63  ;;  %v5860_v59 = vpop.f32.mrb[91].mxu1 }
 0x33f   : > { %v3886_v14 = vpop.f32.mrb[92].mxu0 }
 0x340   : > { %5027 = vst.msk [vmem:[%s7506_s12 + $0x6c] sm:$0xf] %vm4999_vm3, %v5420_v30  ;;  %v5421_v28 = vpack.c.bf16 %v3886_v14, %v3886_v14  ;;  %v5865_v60 = vpop.f32.mrb[93].mxu0 }
 0x341   : > { %v3889_v19 = vpop.f32.mrb[94].mxu0 }
 0x342   : > { %5028 = vst.msk [vmem:[%s7506_s12 + $0x70] sm:$0xf] %vm4999_vm3, %v5421_v28  ;;  %v5422_v32 = vpack.c.bf16 %v3889_v19, %v3889_v19  ;;  %v5866_v8 = vpop.f32.mrb[95].mxu0 }
 0x343   : > { %v3936_v34 = vpop.f32.mrb[92].mxu1 }
 0x344   : > { %5029 = vst.msk [vmem:[%s7506_s12 + $0x74] sm:$0xf] %vm4999_vm3, %v5422_v32  ;;  %v5423_v2 = vpack.c.bf16 %v3936_v34, %v3936_v34  ;;  %v5871_v1 = vpop.f32.mrb[93].mxu1 }
 0x345   : > { %v3939_v52 = vpop.f32.mrb[94].mxu1 }
 0x346   : > { %5030 = vst.msk [vmem:[%s7506_s12 + $0x78] sm:$0xf] %vm4999_vm3, %v5423_v2  ;;  %v5424_v62 = vpack.c.bf16 %v3939_v52, %v3939_v52  ;;  %v5872_v3 = vpop.f32.mrb[95].mxu1 }
 0x347   : > { %v3986_v15 = vpop.f32.mrb[96].mxu0 }
 0x348   : > { %5031 = vst.msk [vmem:[%s7506_s12 + $0x7c] sm:$0xf] %vm4999_vm3, %v5424_v62  ;;  %v5425_v17 = vpack.c.bf16 %v3986_v15, %v3986_v15  ;;  %v5877_v21 = vpop.f32.mrb[97].mxu0 }
 0x349   : > { %v3989_v35 = vpop.f32.mrb[98].mxu0 }
 0x34a   : > { %5032 = vst.msk [vmem:[%s7506_s12 + $0x80] sm:$0xf] %vm4999_vm3, %v5425_v17  ;;  %v5426_v31 = vpack.c.bf16 %v3989_v35, %v3989_v35  ;;  %v5878_v16 = vpop.f32.mrb[99].mxu0 }
 0x34b   : > { %v4036_v50 = vpop.f32.mrb[96].mxu1 }
 0x34c   : > { %5033 = vst.msk [vmem:[%s7506_s12 + $0x84] sm:$0xf] %vm4999_vm3, %v5426_v31  ;;  %v5427_v26 = vpack.c.bf16 %v4036_v50, %v4036_v50  ;;  %v5883_v27 = vpop.f32.mrb[97].mxu1 }
 0x34d   : > { %v4039_v4 = vpop.f32.mrb[98].mxu1 }
 0x34e   : > { %5034 = vst.msk [vmem:[%s7506_s12 + $0x88] sm:$0xf] %vm4999_vm3, %v5427_v26  ;;  %v5428_v38 = vpack.c.bf16 %v4039_v4, %v4039_v4  ;;  %v5884_v42 = vpop.f32.mrb[99].mxu1 }
 0x34f   : > { %v4086_v48 = vpop.f32.mrb[100].mxu0 }
 0x350   : > { %5035 = vst.msk [vmem:[%s7506_s12 + $0x8c] sm:$0xf] %vm4999_vm3, %v5428_v38  ;;  %v5429_v61 = vpack.c.bf16 %v4086_v48, %v4086_v48  ;;  %v5889_v47 = vpop.f32.mrb[101].mxu0 }
 0x351   : > { %v4089_v23 = vpop.f32.mrb[102].mxu0 }
 0x352   : > { %5036 = vst.msk [vmem:[%s7506_s12 + $0x90] sm:$0xf] %vm4999_vm3, %v5429_v61  ;;  %v5430_v13 = vpack.c.bf16 %v4089_v23, %v4089_v23  ;;  %v5890_v49 = vpop.f32.mrb[103].mxu0 }
 0x353   : > { %v4136_v9 = vpop.f32.mrb[100].mxu1 }
 0x354   : > { %5037 = vst.msk [vmem:[%s7506_s12 + $0x94] sm:$0xf] %vm4999_vm3, %v5430_v13  ;;  %v5431_v40 = vpack.c.bf16 %v4136_v9, %v4136_v9  ;;  %v5895_v54 = vpop.f32.mrb[101].mxu1 }
 0x355   : > { %v4139_v36 = vpop.f32.mrb[102].mxu1 }
 0x356   : > { %5038 = vst.msk [vmem:[%s7506_s12 + $0x98] sm:$0xf] %vm4999_vm3, %v5431_v40  ;;  %v5432_v53 = vpack.c.bf16 %v4139_v36, %v4139_v36  ;;  %v5896_v10 = vpop.f32.mrb[103].mxu1 }
 0x357   : > { %v4186_v37 = vpop.f32.mrb[104].mxu0 }
 0x358   : > { %5039 = vst.msk [vmem:[%s7506_s12 + $0x9c] sm:$0xf] %vm4999_vm3, %v5432_v53  ;;  %v5433_v51 = vpack.c.bf16 %v4186_v37, %v4186_v37  ;;  %v5901_v55 = vpop.f32.mrb[105].mxu0 }
 0x359   : > { %v4189_v18 = vpop.f32.mrb[106].mxu0 }
 0x35a   : > { %5040 = vst.msk [vmem:[%s7506_s12 + $0xa0] sm:$0xf] %vm4999_vm3, %v5433_v51  ;;  %v5434_v24 = vpack.c.bf16 %v4189_v18, %v4189_v18  ;;  %v5902_v43 = vpop.f32.mrb[107].mxu0 }
 0x35b   : > { %v4236_v44 = vpop.f32.mrb[104].mxu1 }
 0x35c   : > { %5041 = vst.msk [vmem:[%s7506_s12 + $0xa4] sm:$0xf] %vm4999_vm3, %v5434_v24  ;;  %v5435_v0 = vpack.c.bf16 %v4236_v44, %v4236_v44  ;;  %v5907_v25 = vpop.f32.mrb[105].mxu1 }
 0x35d   : > { %v4239_v22 = vpop.f32.mrb[106].mxu1 }
 0x35e   : > { %5042 = vst.msk [vmem:[%s7506_s12 + $0xa8] sm:$0xf] %vm4999_vm3, %v5435_v0  ;;  %v5436_v33 = vpack.c.bf16 %v4239_v22, %v4239_v22  ;;  %v5908_v57 = vpop.f32.mrb[107].mxu1 }
 0x35f   : > { %v4286_v39 = vpop.f32.mrb[108].mxu0 }
 0x360   : > { %5043 = vst.msk [vmem:[%s7506_s12 + $0xac] sm:$0xf] %vm4999_vm3, %v5436_v33  ;;  %v5437_v29 = vpack.c.bf16 %v4286_v39, %v4286_v39  ;;  %v5913_v12 = vpop.f32.mrb[109].mxu0 }
 0x361   : > { %v4289_v41 = vpop.f32.mrb[110].mxu0 }
 0x362   : > { %5044 = vst.msk [vmem:[%s7506_s12 + $0xb0] sm:$0xf] %vm4999_vm3, %v5437_v29  ;;  %v5438_v11 = vpack.c.bf16 %v4289_v41, %v4289_v41  ;;  %v5914_v56 = vpop.f32.mrb[111].mxu0 }
 0x363   : > { %v4336_v46 = vpop.f32.mrb[108].mxu1 }
 0x364   : > { %5045 = vst.msk [vmem:[%s7506_s12 + $0xb4] sm:$0xf] %vm4999_vm3, %v5438_v11  ;;  %v5439_v58 = vpack.c.bf16 %v4336_v46, %v4336_v46  ;;  %v5919_v5 = vpop.f32.mrb[109].mxu1 }
 0x365   : > { %v4339_v6 = vpop.f32.mrb[110].mxu1 }
 0x366   : > { %5046 = vst.msk [vmem:[%s7506_s12 + $0xb8] sm:$0xf] %vm4999_vm3, %v5439_v58  ;;  %v5440_v20 = vpack.c.bf16 %v4339_v6, %v4339_v6  ;;  %v5920_v7 = vpop.f32.mrb[111].mxu1 }
 0x367   : > { %v4386_v45 = vpop.f32.mrb[112].mxu0 }
 0x368   : > { %5047 = vst.msk [vmem:[%s7506_s12 + $0xbc] sm:$0xf] %vm4999_vm3, %v5440_v20  ;;  %v5441_v63 = vpack.c.bf16 %v4386_v45, %v4386_v45  ;;  %v5925_v30 = vpop.f32.mrb[113].mxu0 }
 0x369   : > { %v4389_v59 = vpop.f32.mrb[114].mxu0 }
 0x36a   : > { %5048 = vst.msk [vmem:[%s7506_s12 + $0xc0] sm:$0xf] %vm4999_vm3, %v5441_v63  ;;  %v5442_v14 = vpack.c.bf16 %v4389_v59, %v4389_v59  ;;  %v5926_v28 = vpop.f32.mrb[115].mxu0 }
 0x36b   : > { %v4436_v60 = vpop.f32.mrb[112].mxu1 }
 0x36c   : > { %5049 = vst.msk [vmem:[%s7506_s12 + $0xc4] sm:$0xf] %vm4999_vm3, %v5442_v14  ;;  %v5443_v19 = vpack.c.bf16 %v4436_v60, %v4436_v60  ;;  %v5931_v32 = vpop.f32.mrb[113].mxu1 }
 0x36d   : > { %v4439_v8 = vpop.f32.mrb[114].mxu1 }
 0x36e   : > { %5050 = vst.msk [vmem:[%s7506_s12 + $0xc8] sm:$0xf] %vm4999_vm3, %v5443_v19  ;;  %v5444_v34 = vpack.c.bf16 %v4439_v8, %v4439_v8  ;;  %v5932_v2 = vpop.f32.mrb[115].mxu1 }
 0x36f   : > { %v4486_v1 = vpop.f32.mrb[116].mxu0 }
 0x370   : > { %5051 = vst.msk [vmem:[%s7506_s12 + $0xcc] sm:$0xf] %vm4999_vm3, %v5444_v34  ;;  %v5445_v52 = vpack.c.bf16 %v4486_v1, %v4486_v1  ;;  %v5937_v62 = vpop.f32.mrb[117].mxu0 }
 0x371   : > { %v4489_v3 = vpop.f32.mrb[118].mxu0 }
 0x372   : > { %5052 = vst.msk [vmem:[%s7506_s12 + $0xd0] sm:$0xf] %vm4999_vm3, %v5445_v52  ;;  %v5446_v15 = vpack.c.bf16 %v4489_v3, %v4489_v3  ;;  %v5938_v17 = vpop.f32.mrb[119].mxu0 }
 0x373   : > { %v4536_v21 = vpop.f32.mrb[116].mxu1 }
 0x374   : > { %5053 = vst.msk [vmem:[%s7506_s12 + $0xd4] sm:$0xf] %vm4999_vm3, %v5446_v15  ;;  %v5447_v35 = vpack.c.bf16 %v4536_v21, %v4536_v21  ;;  %v5943_v31 = vpop.f32.mrb[117].mxu1 }
 0x375   : > { %v4539_v16 = vpop.f32.mrb[118].mxu1 }
 0x376   : > { %5054 = vst.msk [vmem:[%s7506_s12 + $0xd8] sm:$0xf] %vm4999_vm3, %v5447_v35  ;;  %v5448_v50 = vpack.c.bf16 %v4539_v16, %v4539_v16  ;;  %v5944_v26 = vpop.f32.mrb[119].mxu1 }
 0x377   : > { %v4586_v27 = vpop.f32.mrb[120].mxu0 }
 0x378   : > { %5055 = vst.msk [vmem:[%s7506_s12 + $0xdc] sm:$0xf] %vm4999_vm3, %v5448_v50  ;;  %v5449_v4 = vpack.c.bf16 %v4586_v27, %v4586_v27  ;;  %v5949_v38 = vpop.f32.mrb[121].mxu0 }
 0x379   : > { %v4589_v42 = vpop.f32.mrb[122].mxu0 }
 0x37a   : > { %5056 = vst.msk [vmem:[%s7506_s12 + $0xe0] sm:$0xf] %vm4999_vm3, %v5449_v4  ;;  %v5450_v48 = vpack.c.bf16 %v4589_v42, %v4589_v42  ;;  %v5950_v61 = vpop.f32.mrb[123].mxu0 }
 0x37b   : > { %v4636_v47 = vpop.f32.mrb[120].mxu1 }
 0x37c   : > { %5057 = vst.msk [vmem:[%s7506_s12 + $0xe4] sm:$0xf] %vm4999_vm3, %v5450_v48  ;;  %v5451_v23 = vpack.c.bf16 %v4636_v47, %v4636_v47  ;;  %v5955_v13 = vpop.f32.mrb[121].mxu1 }
 0x37d   : > { %v4639_v49 = vpop.f32.mrb[122].mxu1 }
 0x37e   : > { %5058 = vst.msk [vmem:[%s7506_s12 + $0xe8] sm:$0xf] %vm4999_vm3, %v5451_v23  ;;  %v5452_v9 = vpack.c.bf16 %v4639_v49, %v4639_v49  ;;  %v5956_v40 = vpop.f32.mrb[123].mxu1 }
 0x37f   : > { %v4686_v54 = vpop.f32.mrb[124].mxu0 }
 0x380   : > { %5059 = vst.msk [vmem:[%s7506_s12 + $0xec] sm:$0xf] %vm4999_vm3, %v5452_v9  ;;  %v5453_v36 = vpack.c.bf16 %v4686_v54, %v4686_v54  ;;  %v5961_v53 = vpop.f32.mrb[125].mxu0 }
 0x381   : > { %v4689_v10 = vpop.f32.mrb[126].mxu0 }
 0x382   : > { %5060 = vst.msk [vmem:[%s7506_s12 + $0xf0] sm:$0xf] %vm4999_vm3, %v5453_v36  ;;  %v5454_v37 = vpack.c.bf16 %v4689_v10, %v4689_v10  ;;  %v5962_v51 = vpop.f32.mrb[127].mxu0 }
 0x383   : > { %v4736_v55 = vpop.f32.mrb[124].mxu1 }
 0x384   : > { %5061 = vst.msk [vmem:[%s7506_s12 + $0xf4] sm:$0xf] %vm4999_vm3, %v5454_v37  ;;  %v5455_v18 = vpack.c.bf16 %v4736_v55, %v4736_v55  ;;  %v5967_v24 = vpop.f32.mrb[125].mxu1 }
 0x385   : > { %v4739_v43 = vpop.f32.mrb[126].mxu1 }
 0x386   : > { %5062 = vst.msk [vmem:[%s7506_s12 + $0xf8] sm:$0xf] %vm4999_vm3, %v5455_v18  ;;  %v5456_v44 = vpack.c.bf16 %v4739_v43, %v4739_v43  ;;  %v5968_v0 = vpop.f32.mrb[127].mxu1 }
 0x388   : > { %5063 = vst.msk [vmem:[%s7506_s12 + $0xfc] sm:$0xf] %vm4999_vm3, %v5456_v44 }
 0x389 PF: > { %s14_s15 = sadd.s32 1, %s6337_s15  }
 0x38a   : > { %p11_p4 = scmp.ge.s32.totalorder %s14_s15, 4  }
 0x38c   :  { %13 = sbr.rel (!%p11_p4) target bundleno = 1 (0x1), region = 72 }

</bundles_post_ra>
